<compile_context>
chip_gen: v7x
topology: tpu7x:2x2x1
jax: 0.10.0
libtpu: 0.0.40
codegen_flags: <defaults>
</compile_context>

<pallas_src>
import jax
import jax.numpy as jnp
import numpy as np
from jax import lax
from jax.experimental import pallas as pl
from jax.experimental.pallas import tpu as pltpu


# ----------------------------------------------------------------------------
# Fused per-batch-block kernel
# ----------------------------------------------------------------------------
def arbiter_kernel(
    inst_emb_ref,    # (BB, Li, E)
    can_ref,         # (BB, Ls, Fp)
    img_ref,         # (BB, Ls*K, Fp)     36-view features, flattened over (step, view)
    pool_ref,        # (Ls, Ls*K)         constant averaging operator
    am_i2f_ref,      # (1, BB*Li, BB*Ls)  attention mask (feat padding OR cross-batch)
    am_f2i_ref,      # (1, BB*Ls, BB*Li)  attention mask (inst padding OR cross-batch)
    imask_col_ref,   # (BB, Li, 1)        1.0 = padded (for max-pool)
    fmask_col_ref,   # (BB, Ls, 1)
    wih_inst_ref, whh_inst_ref, b_inst_ref,              # inst_lstm   (E,4H),(H,4H),(1,4H)
    wih_can_ref, wih_img_ref, whh_feat_ref, b_feat_ref,  # feat_lstm   (Fp,4H)x2,(H,4H),(1,4H)
    win_i2f_ref, woutc_i2f_ref, wouth_i2f_ref,           # inst2feat attention (H,H) each
    win_f2i_ref, woutc_f2i_ref, wouth_f2i_ref,           # feat2inst attention
    wih_mi_ref, whh_mi_ref, b_mi_ref,                    # inst_modeling LSTM
    wih_mf_ref, whh_mf_ref, b_mf_ref,                    # feat_modeling LSTM
    w1i_ref, w1f_ref, b1_ref, w2_ref, b2_ref,            # projection head
    out_ref,         # (BB, 1)
):
    f32 = jnp.float32
    BB, Li, E = inst_emb_ref.shape
    _, Ls, Fp = can_ref.shape
    H = whh_inst_ref.shape[0]

    def mm(a, b):
        return jnp.dot(a, b, preferred_element_type=f32)

    def lstm(xw, whh):
        # Fused-gate recurrence, gate order [i, f, o, g], batched over BB rows.
        # The input projection (+ bias) is already hoisted into xw (BB, T, 4H);
        # only h_prev @ W_hh stays inside the serial chain.  Fully unrolled
        # (T small & static) so the scheduler can interleave independent chains.
        T = xw.shape[1]
        h = jnp.zeros((BB, H), f32)
        c = jnp.zeros((BB, H), f32)
        hs = []
        for t in range(T):
            gates = xw[:, t, :] + mm(h, whh)          # (BB, 4H) lane-dense
            sig = jax.nn.sigmoid(gates)               # one pass over all 4H lanes
            g = jnp.tanh(gates[:, 3 * H:])
            c = sig[:, H:2 * H] * c + sig[:, :H] * g
            h = sig[:, 2 * H:3 * H] * jnp.tanh(c)
            hs.append(h[:, None, :])
        return jnp.concatenate(hs, axis=1)            # (BB, T, H)

    def soft_dot(q3, ctx3, blkmask, win, woutc, wouth):
        # SoftDotAttention for the whole batch block at once.  blkmask already
        # encodes both the key-padding mask and the cross-batch-row mask, so a
        # single (BB*Tq, H) x (BB*Tc, H)^T GEMM + masked softmax reproduces the
        # per-row bmm exactly (cross-batch weights become exp(-1e30)=0).
        Tq, Tc = q3.shape[1], ctx3.shape[1]
        q2 = q3.reshape(BB * Tq, H)
        ctx2 = ctx3.reshape(BB * Tc, H)
        target = mm(q2, win)                                              # (BB*Tq, H)
        logits = lax.dot_general(target, ctx2, (((1,), (1,)), ((), ())),
                                 preferred_element_type=f32)              # (BB*Tq, BB*Tc)
        logits = jnp.where(blkmask > 0.5, -1e30, logits)
        m = jnp.max(logits, axis=-1, keepdims=True)
        e = jnp.exp(logits - m)
        attn = e * pl.reciprocal(jnp.sum(e, axis=-1, keepdims=True), approx=True)
        weighted = mm(attn, ctx2)                                         # (BB*Tq, H)
        # linear_out(cat([weighted, h])) split into two matmuls (no lane concat).
        return jnp.tanh(mm(weighted, woutc) + mm(q2, wouth)).reshape(BB, Tq, H)

    # ---- instruction stream: hoisted input GEMM + fused-gate batched LSTM ----
    xw_inst = (mm(inst_emb_ref[...].reshape(BB * Li, E), wih_inst_ref[...])
               + b_inst_ref[...]).reshape(BB, Li, 4 * H)
    inst_ctx = lstm(xw_inst, whh_inst_ref[...])                           # (BB, Li, H)

    # ---- visual stream: 36-view mean as MXU GEMMs, split concat-matmul -------
    pool = pool_ref[...]
    attn_feat = jnp.concatenate([mm(pool, img_ref[b]) for b in range(BB)],
                                axis=0)                                   # (BB*Ls, Fp)
    xw_feat = (mm(can_ref[...].reshape(BB * Ls, Fp), wih_can_ref[...])
               + mm(attn_feat, wih_img_ref[...])
               + b_feat_ref[...]).reshape(BB, Ls, 4 * H)
    feat_ctx = lstm(xw_feat, whh_feat_ref[...])                           # (BB, Ls, H)

    # ---- cross attentions (single fused GEMM pair each) ----------------------
    att_inst = soft_dot(inst_ctx, feat_ctx, am_i2f_ref[0],
                        win_i2f_ref[...], woutc_i2f_ref[...], wouth_i2f_ref[...])
    att_feat = soft_dot(feat_ctx, inst_ctx, am_f2i_ref[0],
                        win_f2i_ref[...], woutc_f2i_ref[...], wouth_f2i_ref[...])

    # ---- modeling LSTMs -------------------------------------------------------
    xw_mi = (mm(att_inst.reshape(BB * Li, H), wih_mi_ref[...])
             + b_mi_ref[...]).reshape(BB, Li, 4 * H)
    post_inst = lstm(xw_mi, whh_mi_ref[...])                              # (BB, Li, H)
    xw_mf = (mm(att_feat.reshape(BB * Ls, H), wih_mf_ref[...])
             + b_mf_ref[...]).reshape(BB, Ls, 4 * H)
    post_feat = lstm(xw_mf, whh_mf_ref[...])                              # (BB, Ls, H)

    # ---- masked max over time + projection head ------------------------------
    max_inst = jnp.max(jnp.where(imask_col_ref[...] > 0.5, -1e30, post_inst),
                       axis=1)                                            # (BB, H)
    max_feat = jnp.max(jnp.where(fmask_col_ref[...] > 0.5, -1e30, post_feat),
                       axis=1)                                            # (BB, H)
    hproj = jnp.tanh(mm(max_inst, w1i_ref[...]) + mm(max_feat, w1f_ref[...])
                     + b1_ref[...])                                       # (BB, H)
    logit = jnp.sum(hproj * w2_ref[...], axis=-1, keepdims=True) + b2_ref[...]
    out_ref[...] = logit                                                  # (BB, 1)


# ----------------------------------------------------------------------------
# Wrapper: builds masks / pooling operator and launches the single pallas_call.
# ----------------------------------------------------------------------------
def arbiter_forward(params, img_feats, can_feats, feat_mask, insts, inst_mask,
                    block_b=8):
    B, Ls, K, Fp = img_feats.shape
    _, Li = insts.shape
    E = params["wih_inst"].shape[0]
    H = params["whh_inst"].shape[0]
    f32 = jnp.float32

    # Batch blocking: BB rows per grid step (pad batch to a multiple of BB).
    BB = max(1, min(block_b, B))
    n_blocks = -(-B // BB)
    B_pad = n_blocks * BB

    def pad_b(x, value=0):
        if B_pad == B:
            return x
        widths = [(0, B_pad - B)] + [(0, 0)] * (x.ndim - 1)
        return jnp.pad(x, widths, constant_values=value)

    insts_p = pad_b(insts, 0)
    imask = pad_b(inst_mask.astype(f32), 1.0)          # padded rows: all masked
    fmask = pad_b(feat_mask.astype(f32), 1.0)
    img_flat = pad_b(img_feats).reshape(B_pad, Ls * K, Fp)
    can_p = pad_b(can_feats)

    # Embedding lookup (XLA gather; tiny).  Dropout is identity in eval mode.
    inst_emb = jnp.take(params["emb"], insts_p, axis=0)        # (B_pad, Li, E)

    # Constant view-pooling operator: pool[s, s*K + k] = 1/K.
    rows = jnp.arange(Ls, dtype=jnp.int32)[:, None]
    cols = jnp.arange(Ls * K, dtype=jnp.int32)[None, :]
    pool = jnp.where(cols // K == rows, jnp.float32(1.0 / K), jnp.float32(0.0))

    # Combined attention masks per batch block: key padding OR different row.
    cross = 1.0 - jnp.eye(BB, dtype=f32)                        # (BB, BB)
    imask_blk = imask.reshape(n_blocks, BB, Li)
    fmask_blk = fmask.reshape(n_blocks, BB, Ls)
    am_i2f = jnp.maximum(
        jnp.broadcast_to(cross[None, :, None, :, None], (n_blocks, BB, Li, BB, Ls)),
        jnp.broadcast_to(fmask_blk[:, None, None, :, :], (n_blocks, BB, Li, BB, Ls)),
    ).reshape(n_blocks, BB * Li, BB * Ls)
    am_f2i = jnp.maximum(
        jnp.broadcast_to(cross[None, :, None, :, None], (n_blocks, BB, Ls, BB, Li)),
        jnp.broadcast_to(imask_blk[:, None, None, :, :], (n_blocks, BB, Ls, BB, Li)),
    ).reshape(n_blocks, BB * Ls, BB * Li)

    imask_col = imask.reshape(B_pad, Li, 1)
    fmask_col = fmask.reshape(B_pad, Ls, 1)

    def full(shape):
        n = len(shape)
        return pl.BlockSpec(shape, lambda g, n=n: (0,) * n)

    in_specs = [
        pl.BlockSpec((BB, Li, E), lambda g: (g, 0, 0)),
        pl.BlockSpec((BB, Ls, Fp), lambda g: (g, 0, 0)),
        pl.BlockSpec((BB, Ls * K, Fp), lambda g: (g, 0, 0)),
        full((Ls, Ls * K)),
        pl.BlockSpec((1, BB * Li, BB * Ls), lambda g: (g, 0, 0)),
        pl.BlockSpec((1, BB * Ls, BB * Li), lambda g: (g, 0, 0)),
        pl.BlockSpec((BB, Li, 1), lambda g: (g, 0, 0)),
        pl.BlockSpec((BB, Ls, 1), lambda g: (g, 0, 0)),
        full((E, 4 * H)), full((H, 4 * H)), full((1, 4 * H)),
        full((Fp, 4 * H)), full((Fp, 4 * H)), full((H, 4 * H)), full((1, 4 * H)),
        full((H, H)), full((H, H)), full((H, H)),
        full((H, H)), full((H, H)), full((H, H)),
        full((H, 4 * H)), full((H, 4 * H)), full((1, 4 * H)),
        full((H, 4 * H)), full((H, 4 * H)), full((1, 4 * H)),
        full((H, H)), full((H, H)), full((1, H)), full((1, H)), full((1, 1)),
    ]

    out = pl.pallas_call(
        arbiter_kernel,
        out_shape=jax.ShapeDtypeStruct((B_pad, 1), jnp.float32),
        grid_spec=pltpu.PrefetchScalarGridSpec(
            num_scalar_prefetch=0,
            grid=(n_blocks,),
            in_specs=in_specs,
            out_specs=pl.BlockSpec((BB, 1), lambda g: (g, 0)),
        ),
        compiler_params=pltpu.CompilerParams(
            dimension_semantics=("parallel",)),   # v7x: batch blocks shard across TCs
    )(
        inst_emb, can_p, img_flat, pool,
        am_i2f, am_f2i, imask_col, fmask_col,
        params["wih_inst"], params["whh_inst"], params["b_inst"],
        params["wih_feat_can"], params["wih_feat_img"], params["whh_feat"], params["b_feat"],
        params["win_i2f"], params["woutc_i2f"], params["wouth_i2f"],
        params["win_f2i"], params["woutc_f2i"], params["wouth_f2i"],
        params["wih_mi"], params["whh_mi"], params["b_mi"],
        params["wih_mf"], params["whh_mf"], params["b_mf"],
        params["w1_inst"], params["w1_feat"], params["b1"], params["w2"], params["b2"],
    )
    return out.reshape(B_pad)[:B]


# ----------------------------------------------------------------------------
# Pure-JAX reference (mirrors the PyTorch module, uses raw PyTorch-layout params)
# ----------------------------------------------------------------------------
def ref_lstm(x, W_ih, W_hh, b_ih, b_hh):
    H = W_hh.shape[1]
    B = x.shape[0]

    def step(carry, xt):
        h, c = carry
        gates = xt @ W_ih.T + h @ W_hh.T + b_ih + b_hh
        i = jax.nn.sigmoid(gates[:, 0:H])
        f = jax.nn.sigmoid(gates[:, H:2 * H])
        g = jnp.tanh(gates[:, 2 * H:3 * H])
        o = jax.nn.sigmoid(gates[:, 3 * H:4 * H])
        c = f * c + i * g
        h = o * jnp.tanh(c)
        return (h, c), h

    init = (jnp.zeros((B, H), jnp.float32), jnp.zeros((B, H), jnp.float32))
    _, ys = lax.scan(step, init, jnp.transpose(x, (1, 0, 2)))
    return jnp.transpose(ys, (1, 0, 2))


def ref_cross_att(q_ctx, kv_ctx, kv_mask, W_in, W_out):
    target = q_ctx @ W_in.T
    logits = jnp.einsum("bqh,bkh->bqk", target, kv_ctx)
    logits = jnp.where(kv_mask[:, None, :] > 0.5, -jnp.inf, logits)
    attn = jax.nn.softmax(logits, axis=-1)
    weighted = jnp.einsum("bqk,bkh->bqh", attn, kv_ctx)
    return jnp.tanh(jnp.concatenate([weighted, q_ctx], axis=-1) @ W_out.T)


def ref_forward(raw, img_feats, can_feats, feat_mask, insts, inst_mask):
    inst_emb = raw["emb"][insts]
    inst_ctx = ref_lstm(inst_emb, *raw["inst_lstm"])
    attn_feat = jnp.mean(img_feats, axis=2)
    feat_emb = jnp.concatenate([can_feats, attn_feat], axis=2)
    feat_ctx = ref_lstm(feat_emb, *raw["feat_lstm"])
    att_inst = ref_cross_att(inst_ctx, feat_ctx, feat_mask, *raw["inst2feat"])
    att_feat = ref_cross_att(feat_ctx, inst_ctx, inst_mask, *raw["feat2inst"])
    post_inst = ref_lstm(att_inst, *raw["inst_modeling"])
    post_feat = ref_lstm(att_feat, *raw["feat_modeling"])
    max_inst = jnp.max(jnp.where(inst_mask[:, :, None] > 0.5, -jnp.inf, post_inst), axis=1)
    max_feat = jnp.max(jnp.where(feat_mask[:, :, None] > 0.5, -jnp.inf, post_feat), axis=1)
    x = jnp.concatenate([max_inst, max_feat], axis=1)
    W1, b1, W2, b2 = raw["projection"]
    return (jnp.tanh(x @ W1.T + b1) @ W2.T + b2)[:, 0]


# ----------------------------------------------------------------------------
if __name__ == "__main__":
    # Small shapes consistent with the module.
    B, Li, Ls, K = 2, 8, 8, 36
    V, E, H = 100, 64, 32
    feature_size = 60
    Fp = feature_size + 4      # per-view / candidate feature width (64)
    Df = 2 * Fp                # feat_lstm input width (128)

    key = jax.random.PRNGKey(0)
    ks = iter(jax.random.split(key, 40))
    s = 0.1

    def rnd(shape):
        return jax.random.normal(next(ks), shape, jnp.float32) * s

    def raw_lstm(D):   # PyTorch layout, gate order [i, f, g, o]
        return (rnd((4 * H, D)), rnd((4 * H, H)), rnd((4 * H,)), rnd((4 * H,)))

    emb = rnd((V, E)).at[0].set(0.0)   # padding_idx = 0
    raw = {
        "emb": emb,
        "inst_lstm": raw_lstm(E),
        "feat_lstm": raw_lstm(Df),
        "inst2feat": (rnd((H, H)), rnd((H, 2 * H))),   # (W_in, W_out)
        "feat2inst": (rnd((H, H)), rnd((H, 2 * H))),
        "inst_modeling": raw_lstm(H),
        "feat_modeling": raw_lstm(H),
        "projection": (rnd((H, 2 * H)), rnd((H,)), rnd((1, H)), rnd((1,))),
    }

    # ---- fuse LSTM weights: (4H, D) per-gate -> lane-dense (D, 4H), order [i,f,o,g]
    GATE_ORDER = [0, 1, 3, 2]

    def fuse_lstm(W_ih, W_hh, b_ih, b_hh):
        def reorder(W):
            Wg = W.reshape(4, H, W.shape[1])[GATE_ORDER, :, :]
            return jnp.transpose(Wg, (2, 0, 1)).reshape(W.shape[1], 4 * H)
        b = (b_ih + b_hh).reshape(4, H)[GATE_ORDER, :].reshape(1, 4 * H)
        return reorder(W_ih), reorder(W_hh), b

    wih_inst, whh_inst, b_inst = fuse_lstm(*raw["inst_lstm"])
    wih_feat, whh_feat, b_feat = fuse_lstm(*raw["feat_lstm"])
    wih_mi, whh_mi, b_mi = fuse_lstm(*raw["inst_modeling"])
    wih_mf, whh_mf, b_mf = fuse_lstm(*raw["feat_modeling"])
    W_in_i2f, W_out_i2f = raw["inst2feat"]
    W_in_f2i, W_out_f2i = raw["feat2inst"]
    W1, b1, W2, b2 = raw["projection"]

    params = {
        "emb": emb,
        "wih_inst": wih_inst, "whh_inst": whh_inst, "b_inst": b_inst,
        "wih_feat_can": wih_feat[:Fp], "wih_feat_img": wih_feat[Fp:],
        "whh_feat": whh_feat, "b_feat": b_feat,
        "win_i2f": W_in_i2f.T, "woutc_i2f": W_out_i2f[:, :H].T, "wouth_i2f": W_out_i2f[:, H:].T,
        "win_f2i": W_in_f2i.T, "woutc_f2i": W_out_f2i[:, :H].T, "wouth_f2i": W_out_f2i[:, H:].T,
        "wih_mi": wih_mi, "whh_mi": whh_mi, "b_mi": b_mi,
        "wih_mf": wih_mf, "whh_mf": whh_mf, "b_mf": b_mf,
        "w1_inst": W1[:, :H].T, "w1_feat": W1[:, H:].T, "b1": b1.reshape(1, H),
        "w2": W2, "b2": b2.reshape(1, 1),
    }

    # ---- deterministic example inputs ----
    img_feats = jax.random.normal(next(ks), (B, Ls, K, Fp), jnp.float32)
    can_feats = jax.random.normal(next(ks), (B, Ls, Fp), jnp.float32)
    insts = jax.random.randint(next(ks), (B, Li), 1, V)
    inst_len = jnp.array([Li, 5], jnp.int32)
    feat_len = jnp.array([Ls, 6], jnp.int32)
    inst_mask = (jnp.arange(Li)[None, :] >= inst_len[:, None]).astype(jnp.float32)
    feat_mask = (jnp.arange(Ls)[None, :] >= feat_len[:, None]).astype(jnp.float32)
    insts = jnp.where(inst_mask > 0.5, 0, insts).astype(jnp.int32)

    out = arbiter_forward(params, img_feats, can_feats, feat_mask, insts, inst_mask)
    out = jax.block_until_ready(out)

    with jax.default_matmul_precision("highest"):
        ref = jax.block_until_ready(
            ref_forward(raw, img_feats, can_feats, feat_mask, insts, inst_mask))

    np.testing.assert_allclose(np.asarray(out), np.asarray(ref), rtol=5e-3, atol=5e-3)
    assert out.shape == (B,)
    print("KERNEL_OK")
</pallas_src>

<mosaic_0001>
module attributes {stable_mosaic.version = 11 : i64} {
  func.func @arbiter_kernel(%arg0: i32, %arg1: memref<2x8x64xf32, #tpu.memory_space<vmem>>, %arg2: memref<2x8x64xf32, #tpu.memory_space<vmem>>, %arg3: memref<2x288x64xf32, #tpu.memory_space<vmem>>, %arg4: memref<8x288xf32, #tpu.memory_space<vmem>>, %arg5: memref<1x16x16xf32, #tpu.memory_space<vmem>>, %arg6: memref<1x16x16xf32, #tpu.memory_space<vmem>>, %arg7: memref<2x8x1xf32, #tpu.memory_space<vmem>>, %arg8: memref<2x8x1xf32, #tpu.memory_space<vmem>>, %arg9: memref<64x128xf32, #tpu.memory_space<vmem>>, %arg10: memref<32x128xf32, #tpu.memory_space<vmem>>, %arg11: memref<1x128xf32, #tpu.memory_space<vmem>>, %arg12: memref<64x128xf32, #tpu.memory_space<vmem>>, %arg13: memref<64x128xf32, #tpu.memory_space<vmem>>, %arg14: memref<32x128xf32, #tpu.memory_space<vmem>>, %arg15: memref<1x128xf32, #tpu.memory_space<vmem>>, %arg16: memref<32x32xf32, #tpu.memory_space<vmem>>, %arg17: memref<32x32xf32, #tpu.memory_space<vmem>>, %arg18: memref<32x32xf32, #tpu.memory_space<vmem>>, %arg19: memref<32x32xf32, #tpu.memory_space<vmem>>, %arg20: memref<32x32xf32, #tpu.memory_space<vmem>>, %arg21: memref<32x32xf32, #tpu.memory_space<vmem>>, %arg22: memref<32x128xf32, #tpu.memory_space<vmem>>, %arg23: memref<32x128xf32, #tpu.memory_space<vmem>>, %arg24: memref<1x128xf32, #tpu.memory_space<vmem>>, %arg25: memref<32x128xf32, #tpu.memory_space<vmem>>, %arg26: memref<32x128xf32, #tpu.memory_space<vmem>>, %arg27: memref<1x128xf32, #tpu.memory_space<vmem>>, %arg28: memref<32x32xf32, #tpu.memory_space<vmem>>, %arg29: memref<32x32xf32, #tpu.memory_space<vmem>>, %arg30: memref<1x32xf32, #tpu.memory_space<vmem>>, %arg31: memref<1x32xf32, #tpu.memory_space<vmem>>, %arg32: memref<1x1xf32, #tpu.memory_space<vmem>>, %arg33: memref<2x1xf32, #tpu.memory_space<vmem>>) attributes {dimension_semantics = [#tpu.dimension_semantics<parallel>], iteration_bounds = array<i64: 1>, scalar_prefetch = 0 : i64, scratch_operands = 0 : i64, tpu.core_type = #tpu.core_type<tc>, window_params = [{transform_indices = @transform_0, window_bounds = array<i64: 2, 8, 64>}, {transform_indices = @transform_1, window_bounds = array<i64: 2, 8, 64>}, {transform_indices = @transform_2, window_bounds = array<i64: 2, 288, 64>}, {pipeline_mode = #tpu.pipeline_mode<synchronous>, transform_indices = @transform_3, window_bounds = array<i64: 8, 288>}, {transform_indices = @transform_4, window_bounds = array<i64: 1, 16, 16>}, {transform_indices = @transform_5, window_bounds = array<i64: 1, 16, 16>}, {transform_indices = @transform_6, window_bounds = array<i64: 2, 8, 1>}, {transform_indices = @transform_7, window_bounds = array<i64: 2, 8, 1>}, {pipeline_mode = #tpu.pipeline_mode<synchronous>, transform_indices = @transform_8, window_bounds = array<i64: 64, 128>}, {pipeline_mode = #tpu.pipeline_mode<synchronous>, transform_indices = @transform_9, window_bounds = array<i64: 32, 128>}, {pipeline_mode = #tpu.pipeline_mode<synchronous>, transform_indices = @transform_10, window_bounds = array<i64: 1, 128>}, {pipeline_mode = #tpu.pipeline_mode<synchronous>, transform_indices = @transform_11, window_bounds = array<i64: 64, 128>}, {pipeline_mode = #tpu.pipeline_mode<synchronous>, transform_indices = @transform_12, window_bounds = array<i64: 64, 128>}, {pipeline_mode = #tpu.pipeline_mode<synchronous>, transform_indices = @transform_13, window_bounds = array<i64: 32, 128>}, {pipeline_mode = #tpu.pipeline_mode<synchronous>, transform_indices = @transform_14, window_bounds = array<i64: 1, 128>}, {pipeline_mode = #tpu.pipeline_mode<synchronous>, transform_indices = @transform_15, window_bounds = array<i64: 32, 32>}, {pipeline_mode = #tpu.pipeline_mode<synchronous>, transform_indices = @transform_16, window_bounds = array<i64: 32, 32>}, {pipeline_mode = #tpu.pipeline_mode<synchronous>, transform_indices = @transform_17, window_bounds = array<i64: 32, 32>}, {pipeline_mode = #tpu.pipeline_mode<synchronous>, transform_indices = @transform_18, window_bounds = array<i64: 32, 32>}, {pipeline_mode = #tpu.pipeline_mode<synchronous>, transform_indices = @transform_19, window_bounds = array<i64: 32, 32>}, {pipeline_mode = #tpu.pipeline_mode<synchronous>, transform_indices = @transform_20, window_bounds = array<i64: 32, 32>}, {pipeline_mode = #tpu.pipeline_mode<synchronous>, transform_indices = @transform_21, window_bounds = array<i64: 32, 128>}, {pipeline_mode = #tpu.pipeline_mode<synchronous>, transform_indices = @transform_22, window_bounds = array<i64: 32, 128>}, {pipeline_mode = #tpu.pipeline_mode<synchronous>, transform_indices = @transform_23, window_bounds = array<i64: 1, 128>}, {pipeline_mode = #tpu.pipeline_mode<synchronous>, transform_indices = @transform_24, window_bounds = array<i64: 32, 128>}, {pipeline_mode = #tpu.pipeline_mode<synchronous>, transform_indices = @transform_25, window_bounds = array<i64: 32, 128>}, {pipeline_mode = #tpu.pipeline_mode<synchronous>, transform_indices = @transform_26, window_bounds = array<i64: 1, 128>}, {pipeline_mode = #tpu.pipeline_mode<synchronous>, transform_indices = @transform_27, window_bounds = array<i64: 32, 32>}, {pipeline_mode = #tpu.pipeline_mode<synchronous>, transform_indices = @transform_28, window_bounds = array<i64: 32, 32>}, {pipeline_mode = #tpu.pipeline_mode<synchronous>, transform_indices = @transform_29, window_bounds = array<i64: 1, 32>}, {pipeline_mode = #tpu.pipeline_mode<synchronous>, transform_indices = @transform_30, window_bounds = array<i64: 1, 32>}, {pipeline_mode = #tpu.pipeline_mode<synchronous>, transform_indices = @transform_31, window_bounds = array<i64: 1, 1>}, {transform_indices = @transform_32, window_bounds = array<i64: 2, 1>}]} {
    %c0 = arith.constant 0 : index
    %c0_0 = arith.constant 0 : index
    %c0_1 = arith.constant 0 : index
    %0 = vector.load %arg1[%c0, %c0_0, %c0_1] : memref<2x8x64xf32, #tpu.memory_space<vmem>>, vector<2x8x64xf32>
    %1 = vector.shape_cast %0 : vector<2x8x64xf32> to vector<16x64xf32>
    %c0_2 = arith.constant 0 : index
    %c0_3 = arith.constant 0 : index
    %2 = vector.load %arg9[%c0_2, %c0_3] : memref<64x128xf32, #tpu.memory_space<vmem>>, vector<64x128xf32>
    %cst = arith.constant dense<0.000000e+00> : vector<16x128xf32>
    %3 = tpu.matmul %1, %2, %cst {dimension_numbers = #tpu.dot_dimension_numbers<[1], [0], [0], [1], [0, 0, 1, 1], [], []>} : vector<16x64xf32>, vector<64x128xf32>, vector<16x128xf32> -> vector<16x128xf32>
    %c0_4 = arith.constant 0 : index
    %c0_5 = arith.constant 0 : index
    %4 = vector.load %arg11[%c0_4, %c0_5] : memref<1x128xf32, #tpu.memory_space<vmem>>, vector<1x128xf32>
    %5 = vector.broadcast %4 : vector<1x128xf32> to vector<16x128xf32>
    %6 = arith.addf %3, %5 : vector<16x128xf32>
    %7 = vector.shape_cast %6 : vector<16x128xf32> to vector<2x8x128xf32>
    %c0_6 = arith.constant 0 : index
    %c0_7 = arith.constant 0 : index
    %8 = vector.load %arg10[%c0_6, %c0_7] : memref<32x128xf32, #tpu.memory_space<vmem>>, vector<32x128xf32>
    %cst_8 = arith.constant 0.000000e+00 : f32
    %9 = vector.broadcast %cst_8 : f32 to vector<2x32xf32>
    %cst_9 = arith.constant 0.000000e+00 : f32
    %10 = vector.broadcast %cst_9 : f32 to vector<2x32xf32>
    %11 = vector.extract_strided_slice %7 {offsets = [0, 0, 0], sizes = [2, 1, 128], strides = [1, 1, 1]} : vector<2x8x128xf32> to vector<2x1x128xf32>
    %12 = vector.shape_cast %11 : vector<2x1x128xf32> to vector<2x128xf32>
    %cst_10 = arith.constant dense<0.000000e+00> : vector<2x128xf32>
    %13 = tpu.matmul %9, %8, %cst_10 {dimension_numbers = #tpu.dot_dimension_numbers<[1], [0], [0], [1], [0, 0, 1, 1], [], []>} : vector<2x32xf32>, vector<32x128xf32>, vector<2x128xf32> -> vector<2x128xf32>
    %14 = arith.addf %12, %13 : vector<2x128xf32>
    %15 = arith.negf %14 : vector<2x128xf32>
    %16 = math.exp %15 : vector<2x128xf32>
    %cst_11 = arith.constant 1.000000e+00 : f32
    %17 = vector.broadcast %cst_11 : f32 to vector<2x128xf32>
    %18 = arith.addf %17, %16 : vector<2x128xf32>
    %19 = arith.divf %17, %18 : vector<2x128xf32>
    %20 = vector.extract_strided_slice %14 {offsets = [0, 96], sizes = [2, 32], strides = [1, 1]} : vector<2x128xf32> to vector<2x32xf32>
    %21 = math.tanh %20 : vector<2x32xf32>
    %22 = vector.extract_strided_slice %19 {offsets = [0, 32], sizes = [2, 32], strides = [1, 1]} : vector<2x128xf32> to vector<2x32xf32>
    %23 = arith.mulf %22, %10 : vector<2x32xf32>
    %24 = vector.extract_strided_slice %19 {offsets = [0, 0], sizes = [2, 32], strides = [1, 1]} : vector<2x128xf32> to vector<2x32xf32>
    %25 = arith.mulf %24, %21 : vector<2x32xf32>
    %26 = arith.addf %23, %25 : vector<2x32xf32>
    %27 = vector.extract_strided_slice %19 {offsets = [0, 64], sizes = [2, 32], strides = [1, 1]} : vector<2x128xf32> to vector<2x32xf32>
    %28 = math.tanh %26 : vector<2x32xf32>
    %29 = arith.mulf %27, %28 : vector<2x32xf32>
    %30 = vector.shape_cast %29 : vector<2x32xf32> to vector<2x1x32xf32>
    %31 = vector.extract_strided_slice %7 {offsets = [0, 1, 0], sizes = [2, 1, 128], strides = [1, 1, 1]} : vector<2x8x128xf32> to vector<2x1x128xf32>
    %32 = vector.shape_cast %31 : vector<2x1x128xf32> to vector<2x128xf32>
    %cst_12 = arith.constant dense<0.000000e+00> : vector<2x128xf32>
    %33 = tpu.matmul %29, %8, %cst_12 {dimension_numbers = #tpu.dot_dimension_numbers<[1], [0], [0], [1], [0, 0, 1, 1], [], []>} : vector<2x32xf32>, vector<32x128xf32>, vector<2x128xf32> -> vector<2x128xf32>
    %34 = arith.addf %32, %33 : vector<2x128xf32>
    %35 = arith.negf %34 : vector<2x128xf32>
    %36 = math.exp %35 : vector<2x128xf32>
    %cst_13 = arith.constant 1.000000e+00 : f32
    %37 = vector.broadcast %cst_13 : f32 to vector<2x128xf32>
    %38 = arith.addf %37, %36 : vector<2x128xf32>
    %39 = arith.divf %37, %38 : vector<2x128xf32>
    %40 = vector.extract_strided_slice %34 {offsets = [0, 96], sizes = [2, 32], strides = [1, 1]} : vector<2x128xf32> to vector<2x32xf32>
    %41 = math.tanh %40 : vector<2x32xf32>
    %42 = vector.extract_strided_slice %39 {offsets = [0, 32], sizes = [2, 32], strides = [1, 1]} : vector<2x128xf32> to vector<2x32xf32>
    %43 = arith.mulf %42, %26 : vector<2x32xf32>
    %44 = vector.extract_strided_slice %39 {offsets = [0, 0], sizes = [2, 32], strides = [1, 1]} : vector<2x128xf32> to vector<2x32xf32>
    %45 = arith.mulf %44, %41 : vector<2x32xf32>
    %46 = arith.addf %43, %45 : vector<2x32xf32>
    %47 = vector.extract_strided_slice %39 {offsets = [0, 64], sizes = [2, 32], strides = [1, 1]} : vector<2x128xf32> to vector<2x32xf32>
    %48 = math.tanh %46 : vector<2x32xf32>
    %49 = arith.mulf %47, %48 : vector<2x32xf32>
    %50 = vector.shape_cast %49 : vector<2x32xf32> to vector<2x1x32xf32>
    %51 = vector.extract_strided_slice %7 {offsets = [0, 2, 0], sizes = [2, 1, 128], strides = [1, 1, 1]} : vector<2x8x128xf32> to vector<2x1x128xf32>
    %52 = vector.shape_cast %51 : vector<2x1x128xf32> to vector<2x128xf32>
    %cst_14 = arith.constant dense<0.000000e+00> : vector<2x128xf32>
    %53 = tpu.matmul %49, %8, %cst_14 {dimension_numbers = #tpu.dot_dimension_numbers<[1], [0], [0], [1], [0, 0, 1, 1], [], []>} : vector<2x32xf32>, vector<32x128xf32>, vector<2x128xf32> -> vector<2x128xf32>
    %54 = arith.addf %52, %53 : vector<2x128xf32>
    %55 = arith.negf %54 : vector<2x128xf32>
    %56 = math.exp %55 : vector<2x128xf32>
    %cst_15 = arith.constant 1.000000e+00 : f32
    %57 = vector.broadcast %cst_15 : f32 to vector<2x128xf32>
    %58 = arith.addf %57, %56 : vector<2x128xf32>
    %59 = arith.divf %57, %58 : vector<2x128xf32>
    %60 = vector.extract_strided_slice %54 {offsets = [0, 96], sizes = [2, 32], strides = [1, 1]} : vector<2x128xf32> to vector<2x32xf32>
    %61 = math.tanh %60 : vector<2x32xf32>
    %62 = vector.extract_strided_slice %59 {offsets = [0, 32], sizes = [2, 32], strides = [1, 1]} : vector<2x128xf32> to vector<2x32xf32>
    %63 = arith.mulf %62, %46 : vector<2x32xf32>
    %64 = vector.extract_strided_slice %59 {offsets = [0, 0], sizes = [2, 32], strides = [1, 1]} : vector<2x128xf32> to vector<2x32xf32>
    %65 = arith.mulf %64, %61 : vector<2x32xf32>
    %66 = arith.addf %63, %65 : vector<2x32xf32>
    %67 = vector.extract_strided_slice %59 {offsets = [0, 64], sizes = [2, 32], strides = [1, 1]} : vector<2x128xf32> to vector<2x32xf32>
    %68 = math.tanh %66 : vector<2x32xf32>
    %69 = arith.mulf %67, %68 : vector<2x32xf32>
    %70 = vector.shape_cast %69 : vector<2x32xf32> to vector<2x1x32xf32>
    %71 = vector.extract_strided_slice %7 {offsets = [0, 3, 0], sizes = [2, 1, 128], strides = [1, 1, 1]} : vector<2x8x128xf32> to vector<2x1x128xf32>
    %72 = vector.shape_cast %71 : vector<2x1x128xf32> to vector<2x128xf32>
    %cst_16 = arith.constant dense<0.000000e+00> : vector<2x128xf32>
    %73 = tpu.matmul %69, %8, %cst_16 {dimension_numbers = #tpu.dot_dimension_numbers<[1], [0], [0], [1], [0, 0, 1, 1], [], []>} : vector<2x32xf32>, vector<32x128xf32>, vector<2x128xf32> -> vector<2x128xf32>
    %74 = arith.addf %72, %73 : vector<2x128xf32>
    %75 = arith.negf %74 : vector<2x128xf32>
    %76 = math.exp %75 : vector<2x128xf32>
    %cst_17 = arith.constant 1.000000e+00 : f32
    %77 = vector.broadcast %cst_17 : f32 to vector<2x128xf32>
    %78 = arith.addf %77, %76 : vector<2x128xf32>
    %79 = arith.divf %77, %78 : vector<2x128xf32>
    %80 = vector.extract_strided_slice %74 {offsets = [0, 96], sizes = [2, 32], strides = [1, 1]} : vector<2x128xf32> to vector<2x32xf32>
    %81 = math.tanh %80 : vector<2x32xf32>
    %82 = vector.extract_strided_slice %79 {offsets = [0, 32], sizes = [2, 32], strides = [1, 1]} : vector<2x128xf32> to vector<2x32xf32>
    %83 = arith.mulf %82, %66 : vector<2x32xf32>
    %84 = vector.extract_strided_slice %79 {offsets = [0, 0], sizes = [2, 32], strides = [1, 1]} : vector<2x128xf32> to vector<2x32xf32>
    %85 = arith.mulf %84, %81 : vector<2x32xf32>
    %86 = arith.addf %83, %85 : vector<2x32xf32>
    %87 = vector.extract_strided_slice %79 {offsets = [0, 64], sizes = [2, 32], strides = [1, 1]} : vector<2x128xf32> to vector<2x32xf32>
    %88 = math.tanh %86 : vector<2x32xf32>
    %89 = arith.mulf %87, %88 : vector<2x32xf32>
    %90 = vector.shape_cast %89 : vector<2x32xf32> to vector<2x1x32xf32>
    %91 = vector.extract_strided_slice %7 {offsets = [0, 4, 0], sizes = [2, 1, 128], strides = [1, 1, 1]} : vector<2x8x128xf32> to vector<2x1x128xf32>
    %92 = vector.shape_cast %91 : vector<2x1x128xf32> to vector<2x128xf32>
    %cst_18 = arith.constant dense<0.000000e+00> : vector<2x128xf32>
    %93 = tpu.matmul %89, %8, %cst_18 {dimension_numbers = #tpu.dot_dimension_numbers<[1], [0], [0], [1], [0, 0, 1, 1], [], []>} : vector<2x32xf32>, vector<32x128xf32>, vector<2x128xf32> -> vector<2x128xf32>
    %94 = arith.addf %92, %93 : vector<2x128xf32>
    %95 = arith.negf %94 : vector<2x128xf32>
    %96 = math.exp %95 : vector<2x128xf32>
    %cst_19 = arith.constant 1.000000e+00 : f32
    %97 = vector.broadcast %cst_19 : f32 to vector<2x128xf32>
    %98 = arith.addf %97, %96 : vector<2x128xf32>
    %99 = arith.divf %97, %98 : vector<2x128xf32>
    %100 = vector.extract_strided_slice %94 {offsets = [0, 96], sizes = [2, 32], strides = [1, 1]} : vector<2x128xf32> to vector<2x32xf32>
    %101 = math.tanh %100 : vector<2x32xf32>
    %102 = vector.extract_strided_slice %99 {offsets = [0, 32], sizes = [2, 32], strides = [1, 1]} : vector<2x128xf32> to vector<2x32xf32>
    %103 = arith.mulf %102, %86 : vector<2x32xf32>
    %104 = vector.extract_strided_slice %99 {offsets = [0, 0], sizes = [2, 32], strides = [1, 1]} : vector<2x128xf32> to vector<2x32xf32>
    %105 = arith.mulf %104, %101 : vector<2x32xf32>
    %106 = arith.addf %103, %105 : vector<2x32xf32>
    %107 = vector.extract_strided_slice %99 {offsets = [0, 64], sizes = [2, 32], strides = [1, 1]} : vector<2x128xf32> to vector<2x32xf32>
    %108 = math.tanh %106 : vector<2x32xf32>
    %109 = arith.mulf %107, %108 : vector<2x32xf32>
    %110 = vector.shape_cast %109 : vector<2x32xf32> to vector<2x1x32xf32>
    %111 = vector.extract_strided_slice %7 {offsets = [0, 5, 0], sizes = [2, 1, 128], strides = [1, 1, 1]} : vector<2x8x128xf32> to vector<2x1x128xf32>
    %112 = vector.shape_cast %111 : vector<2x1x128xf32> to vector<2x128xf32>
    %cst_20 = arith.constant dense<0.000000e+00> : vector<2x128xf32>
    %113 = tpu.matmul %109, %8, %cst_20 {dimension_numbers = #tpu.dot_dimension_numbers<[1], [0], [0], [1], [0, 0, 1, 1], [], []>} : vector<2x32xf32>, vector<32x128xf32>, vector<2x128xf32> -> vector<2x128xf32>
    %114 = arith.addf %112, %113 : vector<2x128xf32>
    %115 = arith.negf %114 : vector<2x128xf32>
    %116 = math.exp %115 : vector<2x128xf32>
    %cst_21 = arith.constant 1.000000e+00 : f32
    %117 = vector.broadcast %cst_21 : f32 to vector<2x128xf32>
    %118 = arith.addf %117, %116 : vector<2x128xf32>
    %119 = arith.divf %117, %118 : vector<2x128xf32>
    %120 = vector.extract_strided_slice %114 {offsets = [0, 96], sizes = [2, 32], strides = [1, 1]} : vector<2x128xf32> to vector<2x32xf32>
    %121 = math.tanh %120 : vector<2x32xf32>
    %122 = vector.extract_strided_slice %119 {offsets = [0, 32], sizes = [2, 32], strides = [1, 1]} : vector<2x128xf32> to vector<2x32xf32>
    %123 = arith.mulf %122, %106 : vector<2x32xf32>
    %124 = vector.extract_strided_slice %119 {offsets = [0, 0], sizes = [2, 32], strides = [1, 1]} : vector<2x128xf32> to vector<2x32xf32>
    %125 = arith.mulf %124, %121 : vector<2x32xf32>
    %126 = arith.addf %123, %125 : vector<2x32xf32>
    %127 = vector.extract_strided_slice %119 {offsets = [0, 64], sizes = [2, 32], strides = [1, 1]} : vector<2x128xf32> to vector<2x32xf32>
    %128 = math.tanh %126 : vector<2x32xf32>
    %129 = arith.mulf %127, %128 : vector<2x32xf32>
    %130 = vector.shape_cast %129 : vector<2x32xf32> to vector<2x1x32xf32>
    %131 = vector.extract_strided_slice %7 {offsets = [0, 6, 0], sizes = [2, 1, 128], strides = [1, 1, 1]} : vector<2x8x128xf32> to vector<2x1x128xf32>
    %132 = vector.shape_cast %131 : vector<2x1x128xf32> to vector<2x128xf32>
    %cst_22 = arith.constant dense<0.000000e+00> : vector<2x128xf32>
    %133 = tpu.matmul %129, %8, %cst_22 {dimension_numbers = #tpu.dot_dimension_numbers<[1], [0], [0], [1], [0, 0, 1, 1], [], []>} : vector<2x32xf32>, vector<32x128xf32>, vector<2x128xf32> -> vector<2x128xf32>
    %134 = arith.addf %132, %133 : vector<2x128xf32>
    %135 = arith.negf %134 : vector<2x128xf32>
    %136 = math.exp %135 : vector<2x128xf32>
    %cst_23 = arith.constant 1.000000e+00 : f32
    %137 = vector.broadcast %cst_23 : f32 to vector<2x128xf32>
    %138 = arith.addf %137, %136 : vector<2x128xf32>
    %139 = arith.divf %137, %138 : vector<2x128xf32>
    %140 = vector.extract_strided_slice %134 {offsets = [0, 96], sizes = [2, 32], strides = [1, 1]} : vector<2x128xf32> to vector<2x32xf32>
    %141 = math.tanh %140 : vector<2x32xf32>
    %142 = vector.extract_strided_slice %139 {offsets = [0, 32], sizes = [2, 32], strides = [1, 1]} : vector<2x128xf32> to vector<2x32xf32>
    %143 = arith.mulf %142, %126 : vector<2x32xf32>
    %144 = vector.extract_strided_slice %139 {offsets = [0, 0], sizes = [2, 32], strides = [1, 1]} : vector<2x128xf32> to vector<2x32xf32>
    %145 = arith.mulf %144, %141 : vector<2x32xf32>
    %146 = arith.addf %143, %145 : vector<2x32xf32>
    %147 = vector.extract_strided_slice %139 {offsets = [0, 64], sizes = [2, 32], strides = [1, 1]} : vector<2x128xf32> to vector<2x32xf32>
    %148 = math.tanh %146 : vector<2x32xf32>
    %149 = arith.mulf %147, %148 : vector<2x32xf32>
    %150 = vector.shape_cast %149 : vector<2x32xf32> to vector<2x1x32xf32>
    %151 = vector.extract_strided_slice %7 {offsets = [0, 7, 0], sizes = [2, 1, 128], strides = [1, 1, 1]} : vector<2x8x128xf32> to vector<2x1x128xf32>
    %152 = vector.shape_cast %151 : vector<2x1x128xf32> to vector<2x128xf32>
    %cst_24 = arith.constant dense<0.000000e+00> : vector<2x128xf32>
    %153 = tpu.matmul %149, %8, %cst_24 {dimension_numbers = #tpu.dot_dimension_numbers<[1], [0], [0], [1], [0, 0, 1, 1], [], []>} : vector<2x32xf32>, vector<32x128xf32>, vector<2x128xf32> -> vector<2x128xf32>
    %154 = arith.addf %152, %153 : vector<2x128xf32>
    %155 = arith.negf %154 : vector<2x128xf32>
    %156 = math.exp %155 : vector<2x128xf32>
    %cst_25 = arith.constant 1.000000e+00 : f32
    %157 = vector.broadcast %cst_25 : f32 to vector<2x128xf32>
    %158 = arith.addf %157, %156 : vector<2x128xf32>
    %159 = arith.divf %157, %158 : vector<2x128xf32>
    %160 = vector.extract_strided_slice %154 {offsets = [0, 96], sizes = [2, 32], strides = [1, 1]} : vector<2x128xf32> to vector<2x32xf32>
    %161 = math.tanh %160 : vector<2x32xf32>
    %162 = vector.extract_strided_slice %159 {offsets = [0, 32], sizes = [2, 32], strides = [1, 1]} : vector<2x128xf32> to vector<2x32xf32>
    %163 = arith.mulf %162, %146 : vector<2x32xf32>
    %164 = vector.extract_strided_slice %159 {offsets = [0, 0], sizes = [2, 32], strides = [1, 1]} : vector<2x128xf32> to vector<2x32xf32>
    %165 = arith.mulf %164, %161 : vector<2x32xf32>
    %166 = arith.addf %163, %165 : vector<2x32xf32>
    %167 = vector.extract_strided_slice %159 {offsets = [0, 64], sizes = [2, 32], strides = [1, 1]} : vector<2x128xf32> to vector<2x32xf32>
    %168 = math.tanh %166 : vector<2x32xf32>
    %169 = arith.mulf %167, %168 : vector<2x32xf32>
    %170 = vector.shape_cast %169 : vector<2x32xf32> to vector<2x1x32xf32>
    %171 = tpu.concatenate %30, %50, %70, %90, %110, %130, %150, %170 in 1 : vector<2x1x32xf32>, vector<2x1x32xf32>, vector<2x1x32xf32>, vector<2x1x32xf32>, vector<2x1x32xf32>, vector<2x1x32xf32>, vector<2x1x32xf32>, vector<2x1x32xf32> -> vector<2x8x32xf32>
    %c0_26 = arith.constant 0 : index
    %c0_27 = arith.constant 0 : index
    %172 = vector.load %arg4[%c0_26, %c0_27] : memref<8x288xf32, #tpu.memory_space<vmem>>, vector<8x288xf32>
    %c0_28 = arith.constant 0 : index
    %c0_29 = arith.constant 0 : index
    %c0_30 = arith.constant 0 : index
    %173 = vector.load %arg3[%c0_28, %c0_29, %c0_30] : memref<2x288x64xf32, #tpu.memory_space<vmem>>, vector<1x288x64xf32>
    %174 = vector.shape_cast %173 : vector<1x288x64xf32> to vector<288x64xf32>
    %cst_31 = arith.constant dense<0.000000e+00> : vector<8x64xf32>
    %175 = tpu.matmul %172, %174, %cst_31 {dimension_numbers = #tpu.dot_dimension_numbers<[1], [0], [0], [1], [0, 0, 1, 1], [], []>} : vector<8x288xf32>, vector<288x64xf32>, vector<8x64xf32> -> vector<8x64xf32>
    %c1 = arith.constant 1 : index
    %c0_32 = arith.constant 0 : index
    %c0_33 = arith.constant 0 : index
    %176 = vector.load %arg3[%c1, %c0_32, %c0_33] : memref<2x288x64xf32, #tpu.memory_space<vmem>>, vector<1x288x64xf32>
    %177 = vector.shape_cast %176 : vector<1x288x64xf32> to vector<288x64xf32>
    %cst_34 = arith.constant dense<0.000000e+00> : vector<8x64xf32>
    %178 = tpu.matmul %172, %177, %cst_34 {dimension_numbers = #tpu.dot_dimension_numbers<[1], [0], [0], [1], [0, 0, 1, 1], [], []>} : vector<8x288xf32>, vector<288x64xf32>, vector<8x64xf32> -> vector<8x64xf32>
    %179 = tpu.concatenate %175, %178 in 0 : vector<8x64xf32>, vector<8x64xf32> -> vector<16x64xf32>
    %c0_35 = arith.constant 0 : index
    %c0_36 = arith.constant 0 : index
    %c0_37 = arith.constant 0 : index
    %180 = vector.load %arg2[%c0_35, %c0_36, %c0_37] : memref<2x8x64xf32, #tpu.memory_space<vmem>>, vector<2x8x64xf32>
    %181 = vector.shape_cast %180 : vector<2x8x64xf32> to vector<16x64xf32>
    %c0_38 = arith.constant 0 : index
    %c0_39 = arith.constant 0 : index
    %182 = vector.load %arg12[%c0_38, %c0_39] : memref<64x128xf32, #tpu.memory_space<vmem>>, vector<64x128xf32>
    %cst_40 = arith.constant dense<0.000000e+00> : vector<16x128xf32>
    %183 = tpu.matmul %181, %182, %cst_40 {dimension_numbers = #tpu.dot_dimension_numbers<[1], [0], [0], [1], [0, 0, 1, 1], [], []>} : vector<16x64xf32>, vector<64x128xf32>, vector<16x128xf32> -> vector<16x128xf32>
    %c0_41 = arith.constant 0 : index
    %c0_42 = arith.constant 0 : index
    %184 = vector.load %arg13[%c0_41, %c0_42] : memref<64x128xf32, #tpu.memory_space<vmem>>, vector<64x128xf32>
    %cst_43 = arith.constant dense<0.000000e+00> : vector<16x128xf32>
    %185 = tpu.matmul %179, %184, %cst_43 {dimension_numbers = #tpu.dot_dimension_numbers<[1], [0], [0], [1], [0, 0, 1, 1], [], []>} : vector<16x64xf32>, vector<64x128xf32>, vector<16x128xf32> -> vector<16x128xf32>
    %186 = arith.addf %183, %185 : vector<16x128xf32>
    %c0_44 = arith.constant 0 : index
    %c0_45 = arith.constant 0 : index
    %187 = vector.load %arg15[%c0_44, %c0_45] : memref<1x128xf32, #tpu.memory_space<vmem>>, vector<1x128xf32>
    %188 = vector.broadcast %187 : vector<1x128xf32> to vector<16x128xf32>
    %189 = arith.addf %186, %188 : vector<16x128xf32>
    %190 = vector.shape_cast %189 : vector<16x128xf32> to vector<2x8x128xf32>
    %c0_46 = arith.constant 0 : index
    %c0_47 = arith.constant 0 : index
    %191 = vector.load %arg14[%c0_46, %c0_47] : memref<32x128xf32, #tpu.memory_space<vmem>>, vector<32x128xf32>
    %cst_48 = arith.constant 0.000000e+00 : f32
    %192 = vector.broadcast %cst_48 : f32 to vector<2x32xf32>
    %cst_49 = arith.constant 0.000000e+00 : f32
    %193 = vector.broadcast %cst_49 : f32 to vector<2x32xf32>
    %194 = vector.extract_strided_slice %190 {offsets = [0, 0, 0], sizes = [2, 1, 128], strides = [1, 1, 1]} : vector<2x8x128xf32> to vector<2x1x128xf32>
    %195 = vector.shape_cast %194 : vector<2x1x128xf32> to vector<2x128xf32>
    %cst_50 = arith.constant dense<0.000000e+00> : vector<2x128xf32>
    %196 = tpu.matmul %192, %191, %cst_50 {dimension_numbers = #tpu.dot_dimension_numbers<[1], [0], [0], [1], [0, 0, 1, 1], [], []>} : vector<2x32xf32>, vector<32x128xf32>, vector<2x128xf32> -> vector<2x128xf32>
    %197 = arith.addf %195, %196 : vector<2x128xf32>
    %198 = arith.negf %197 : vector<2x128xf32>
    %199 = math.exp %198 : vector<2x128xf32>
    %cst_51 = arith.constant 1.000000e+00 : f32
    %200 = vector.broadcast %cst_51 : f32 to vector<2x128xf32>
    %201 = arith.addf %200, %199 : vector<2x128xf32>
    %202 = arith.divf %200, %201 : vector<2x128xf32>
    %203 = vector.extract_strided_slice %197 {offsets = [0, 96], sizes = [2, 32], strides = [1, 1]} : vector<2x128xf32> to vector<2x32xf32>
    %204 = math.tanh %203 : vector<2x32xf32>
    %205 = vector.extract_strided_slice %202 {offsets = [0, 32], sizes = [2, 32], strides = [1, 1]} : vector<2x128xf32> to vector<2x32xf32>
    %206 = arith.mulf %205, %193 : vector<2x32xf32>
    %207 = vector.extract_strided_slice %202 {offsets = [0, 0], sizes = [2, 32], strides = [1, 1]} : vector<2x128xf32> to vector<2x32xf32>
    %208 = arith.mulf %207, %204 : vector<2x32xf32>
    %209 = arith.addf %206, %208 : vector<2x32xf32>
    %210 = vector.extract_strided_slice %202 {offsets = [0, 64], sizes = [2, 32], strides = [1, 1]} : vector<2x128xf32> to vector<2x32xf32>
    %211 = math.tanh %209 : vector<2x32xf32>
    %212 = arith.mulf %210, %211 : vector<2x32xf32>
    %213 = vector.shape_cast %212 : vector<2x32xf32> to vector<2x1x32xf32>
    %214 = vector.extract_strided_slice %190 {offsets = [0, 1, 0], sizes = [2, 1, 128], strides = [1, 1, 1]} : vector<2x8x128xf32> to vector<2x1x128xf32>
    %215 = vector.shape_cast %214 : vector<2x1x128xf32> to vector<2x128xf32>
    %cst_52 = arith.constant dense<0.000000e+00> : vector<2x128xf32>
    %216 = tpu.matmul %212, %191, %cst_52 {dimension_numbers = #tpu.dot_dimension_numbers<[1], [0], [0], [1], [0, 0, 1, 1], [], []>} : vector<2x32xf32>, vector<32x128xf32>, vector<2x128xf32> -> vector<2x128xf32>
    %217 = arith.addf %215, %216 : vector<2x128xf32>
    %218 = arith.negf %217 : vector<2x128xf32>
    %219 = math.exp %218 : vector<2x128xf32>
    %cst_53 = arith.constant 1.000000e+00 : f32
    %220 = vector.broadcast %cst_53 : f32 to vector<2x128xf32>
    %221 = arith.addf %220, %219 : vector<2x128xf32>
    %222 = arith.divf %220, %221 : vector<2x128xf32>
    %223 = vector.extract_strided_slice %217 {offsets = [0, 96], sizes = [2, 32], strides = [1, 1]} : vector<2x128xf32> to vector<2x32xf32>
    %224 = math.tanh %223 : vector<2x32xf32>
    %225 = vector.extract_strided_slice %222 {offsets = [0, 32], sizes = [2, 32], strides = [1, 1]} : vector<2x128xf32> to vector<2x32xf32>
    %226 = arith.mulf %225, %209 : vector<2x32xf32>
    %227 = vector.extract_strided_slice %222 {offsets = [0, 0], sizes = [2, 32], strides = [1, 1]} : vector<2x128xf32> to vector<2x32xf32>
    %228 = arith.mulf %227, %224 : vector<2x32xf32>
    %229 = arith.addf %226, %228 : vector<2x32xf32>
    %230 = vector.extract_strided_slice %222 {offsets = [0, 64], sizes = [2, 32], strides = [1, 1]} : vector<2x128xf32> to vector<2x32xf32>
    %231 = math.tanh %229 : vector<2x32xf32>
    %232 = arith.mulf %230, %231 : vector<2x32xf32>
    %233 = vector.shape_cast %232 : vector<2x32xf32> to vector<2x1x32xf32>
    %234 = vector.extract_strided_slice %190 {offsets = [0, 2, 0], sizes = [2, 1, 128], strides = [1, 1, 1]} : vector<2x8x128xf32> to vector<2x1x128xf32>
    %235 = vector.shape_cast %234 : vector<2x1x128xf32> to vector<2x128xf32>
    %cst_54 = arith.constant dense<0.000000e+00> : vector<2x128xf32>
    %236 = tpu.matmul %232, %191, %cst_54 {dimension_numbers = #tpu.dot_dimension_numbers<[1], [0], [0], [1], [0, 0, 1, 1], [], []>} : vector<2x32xf32>, vector<32x128xf32>, vector<2x128xf32> -> vector<2x128xf32>
    %237 = arith.addf %235, %236 : vector<2x128xf32>
    %238 = arith.negf %237 : vector<2x128xf32>
    %239 = math.exp %238 : vector<2x128xf32>
    %cst_55 = arith.constant 1.000000e+00 : f32
    %240 = vector.broadcast %cst_55 : f32 to vector<2x128xf32>
    %241 = arith.addf %240, %239 : vector<2x128xf32>
    %242 = arith.divf %240, %241 : vector<2x128xf32>
    %243 = vector.extract_strided_slice %237 {offsets = [0, 96], sizes = [2, 32], strides = [1, 1]} : vector<2x128xf32> to vector<2x32xf32>
    %244 = math.tanh %243 : vector<2x32xf32>
    %245 = vector.extract_strided_slice %242 {offsets = [0, 32], sizes = [2, 32], strides = [1, 1]} : vector<2x128xf32> to vector<2x32xf32>
    %246 = arith.mulf %245, %229 : vector<2x32xf32>
    %247 = vector.extract_strided_slice %242 {offsets = [0, 0], sizes = [2, 32], strides = [1, 1]} : vector<2x128xf32> to vector<2x32xf32>
    %248 = arith.mulf %247, %244 : vector<2x32xf32>
    %249 = arith.addf %246, %248 : vector<2x32xf32>
    %250 = vector.extract_strided_slice %242 {offsets = [0, 64], sizes = [2, 32], strides = [1, 1]} : vector<2x128xf32> to vector<2x32xf32>
    %251 = math.tanh %249 : vector<2x32xf32>
    %252 = arith.mulf %250, %251 : vector<2x32xf32>
    %253 = vector.shape_cast %252 : vector<2x32xf32> to vector<2x1x32xf32>
    %254 = vector.extract_strided_slice %190 {offsets = [0, 3, 0], sizes = [2, 1, 128], strides = [1, 1, 1]} : vector<2x8x128xf32> to vector<2x1x128xf32>
    %255 = vector.shape_cast %254 : vector<2x1x128xf32> to vector<2x128xf32>
    %cst_56 = arith.constant dense<0.000000e+00> : vector<2x128xf32>
    %256 = tpu.matmul %252, %191, %cst_56 {dimension_numbers = #tpu.dot_dimension_numbers<[1], [0], [0], [1], [0, 0, 1, 1], [], []>} : vector<2x32xf32>, vector<32x128xf32>, vector<2x128xf32> -> vector<2x128xf32>
    %257 = arith.addf %255, %256 : vector<2x128xf32>
    %258 = arith.negf %257 : vector<2x128xf32>
    %259 = math.exp %258 : vector<2x128xf32>
    %cst_57 = arith.constant 1.000000e+00 : f32
    %260 = vector.broadcast %cst_57 : f32 to vector<2x128xf32>
    %261 = arith.addf %260, %259 : vector<2x128xf32>
    %262 = arith.divf %260, %261 : vector<2x128xf32>
    %263 = vector.extract_strided_slice %257 {offsets = [0, 96], sizes = [2, 32], strides = [1, 1]} : vector<2x128xf32> to vector<2x32xf32>
    %264 = math.tanh %263 : vector<2x32xf32>
    %265 = vector.extract_strided_slice %262 {offsets = [0, 32], sizes = [2, 32], strides = [1, 1]} : vector<2x128xf32> to vector<2x32xf32>
    %266 = arith.mulf %265, %249 : vector<2x32xf32>
    %267 = vector.extract_strided_slice %262 {offsets = [0, 0], sizes = [2, 32], strides = [1, 1]} : vector<2x128xf32> to vector<2x32xf32>
    %268 = arith.mulf %267, %264 : vector<2x32xf32>
    %269 = arith.addf %266, %268 : vector<2x32xf32>
    %270 = vector.extract_strided_slice %262 {offsets = [0, 64], sizes = [2, 32], strides = [1, 1]} : vector<2x128xf32> to vector<2x32xf32>
    %271 = math.tanh %269 : vector<2x32xf32>
    %272 = arith.mulf %270, %271 : vector<2x32xf32>
    %273 = vector.shape_cast %272 : vector<2x32xf32> to vector<2x1x32xf32>
    %274 = vector.extract_strided_slice %190 {offsets = [0, 4, 0], sizes = [2, 1, 128], strides = [1, 1, 1]} : vector<2x8x128xf32> to vector<2x1x128xf32>
    %275 = vector.shape_cast %274 : vector<2x1x128xf32> to vector<2x128xf32>
    %cst_58 = arith.constant dense<0.000000e+00> : vector<2x128xf32>
    %276 = tpu.matmul %272, %191, %cst_58 {dimension_numbers = #tpu.dot_dimension_numbers<[1], [0], [0], [1], [0, 0, 1, 1], [], []>} : vector<2x32xf32>, vector<32x128xf32>, vector<2x128xf32> -> vector<2x128xf32>
    %277 = arith.addf %275, %276 : vector<2x128xf32>
    %278 = arith.negf %277 : vector<2x128xf32>
    %279 = math.exp %278 : vector<2x128xf32>
    %cst_59 = arith.constant 1.000000e+00 : f32
    %280 = vector.broadcast %cst_59 : f32 to vector<2x128xf32>
    %281 = arith.addf %280, %279 : vector<2x128xf32>
    %282 = arith.divf %280, %281 : vector<2x128xf32>
    %283 = vector.extract_strided_slice %277 {offsets = [0, 96], sizes = [2, 32], strides = [1, 1]} : vector<2x128xf32> to vector<2x32xf32>
    %284 = math.tanh %283 : vector<2x32xf32>
    %285 = vector.extract_strided_slice %282 {offsets = [0, 32], sizes = [2, 32], strides = [1, 1]} : vector<2x128xf32> to vector<2x32xf32>
    %286 = arith.mulf %285, %269 : vector<2x32xf32>
    %287 = vector.extract_strided_slice %282 {offsets = [0, 0], sizes = [2, 32], strides = [1, 1]} : vector<2x128xf32> to vector<2x32xf32>
    %288 = arith.mulf %287, %284 : vector<2x32xf32>
    %289 = arith.addf %286, %288 : vector<2x32xf32>
    %290 = vector.extract_strided_slice %282 {offsets = [0, 64], sizes = [2, 32], strides = [1, 1]} : vector<2x128xf32> to vector<2x32xf32>
    %291 = math.tanh %289 : vector<2x32xf32>
    %292 = arith.mulf %290, %291 : vector<2x32xf32>
    %293 = vector.shape_cast %292 : vector<2x32xf32> to vector<2x1x32xf32>
    %294 = vector.extract_strided_slice %190 {offsets = [0, 5, 0], sizes = [2, 1, 128], strides = [1, 1, 1]} : vector<2x8x128xf32> to vector<2x1x128xf32>
    %295 = vector.shape_cast %294 : vector<2x1x128xf32> to vector<2x128xf32>
    %cst_60 = arith.constant dense<0.000000e+00> : vector<2x128xf32>
    %296 = tpu.matmul %292, %191, %cst_60 {dimension_numbers = #tpu.dot_dimension_numbers<[1], [0], [0], [1], [0, 0, 1, 1], [], []>} : vector<2x32xf32>, vector<32x128xf32>, vector<2x128xf32> -> vector<2x128xf32>
    %297 = arith.addf %295, %296 : vector<2x128xf32>
    %298 = arith.negf %297 : vector<2x128xf32>
    %299 = math.exp %298 : vector<2x128xf32>
    %cst_61 = arith.constant 1.000000e+00 : f32
    %300 = vector.broadcast %cst_61 : f32 to vector<2x128xf32>
    %301 = arith.addf %300, %299 : vector<2x128xf32>
    %302 = arith.divf %300, %301 : vector<2x128xf32>
    %303 = vector.extract_strided_slice %297 {offsets = [0, 96], sizes = [2, 32], strides = [1, 1]} : vector<2x128xf32> to vector<2x32xf32>
    %304 = math.tanh %303 : vector<2x32xf32>
    %305 = vector.extract_strided_slice %302 {offsets = [0, 32], sizes = [2, 32], strides = [1, 1]} : vector<2x128xf32> to vector<2x32xf32>
    %306 = arith.mulf %305, %289 : vector<2x32xf32>
    %307 = vector.extract_strided_slice %302 {offsets = [0, 0], sizes = [2, 32], strides = [1, 1]} : vector<2x128xf32> to vector<2x32xf32>
    %308 = arith.mulf %307, %304 : vector<2x32xf32>
    %309 = arith.addf %306, %308 : vector<2x32xf32>
    %310 = vector.extract_strided_slice %302 {offsets = [0, 64], sizes = [2, 32], strides = [1, 1]} : vector<2x128xf32> to vector<2x32xf32>
    %311 = math.tanh %309 : vector<2x32xf32>
    %312 = arith.mulf %310, %311 : vector<2x32xf32>
    %313 = vector.shape_cast %312 : vector<2x32xf32> to vector<2x1x32xf32>
    %314 = vector.extract_strided_slice %190 {offsets = [0, 6, 0], sizes = [2, 1, 128], strides = [1, 1, 1]} : vector<2x8x128xf32> to vector<2x1x128xf32>
    %315 = vector.shape_cast %314 : vector<2x1x128xf32> to vector<2x128xf32>
    %cst_62 = arith.constant dense<0.000000e+00> : vector<2x128xf32>
    %316 = tpu.matmul %312, %191, %cst_62 {dimension_numbers = #tpu.dot_dimension_numbers<[1], [0], [0], [1], [0, 0, 1, 1], [], []>} : vector<2x32xf32>, vector<32x128xf32>, vector<2x128xf32> -> vector<2x128xf32>
    %317 = arith.addf %315, %316 : vector<2x128xf32>
    %318 = arith.negf %317 : vector<2x128xf32>
    %319 = math.exp %318 : vector<2x128xf32>
    %cst_63 = arith.constant 1.000000e+00 : f32
    %320 = vector.broadcast %cst_63 : f32 to vector<2x128xf32>
    %321 = arith.addf %320, %319 : vector<2x128xf32>
    %322 = arith.divf %320, %321 : vector<2x128xf32>
    %323 = vector.extract_strided_slice %317 {offsets = [0, 96], sizes = [2, 32], strides = [1, 1]} : vector<2x128xf32> to vector<2x32xf32>
    %324 = math.tanh %323 : vector<2x32xf32>
    %325 = vector.extract_strided_slice %322 {offsets = [0, 32], sizes = [2, 32], strides = [1, 1]} : vector<2x128xf32> to vector<2x32xf32>
    %326 = arith.mulf %325, %309 : vector<2x32xf32>
    %327 = vector.extract_strided_slice %322 {offsets = [0, 0], sizes = [2, 32], strides = [1, 1]} : vector<2x128xf32> to vector<2x32xf32>
    %328 = arith.mulf %327, %324 : vector<2x32xf32>
    %329 = arith.addf %326, %328 : vector<2x32xf32>
    %330 = vector.extract_strided_slice %322 {offsets = [0, 64], sizes = [2, 32], strides = [1, 1]} : vector<2x128xf32> to vector<2x32xf32>
    %331 = math.tanh %329 : vector<2x32xf32>
    %332 = arith.mulf %330, %331 : vector<2x32xf32>
    %333 = vector.shape_cast %332 : vector<2x32xf32> to vector<2x1x32xf32>
    %334 = vector.extract_strided_slice %190 {offsets = [0, 7, 0], sizes = [2, 1, 128], strides = [1, 1, 1]} : vector<2x8x128xf32> to vector<2x1x128xf32>
    %335 = vector.shape_cast %334 : vector<2x1x128xf32> to vector<2x128xf32>
    %cst_64 = arith.constant dense<0.000000e+00> : vector<2x128xf32>
    %336 = tpu.matmul %332, %191, %cst_64 {dimension_numbers = #tpu.dot_dimension_numbers<[1], [0], [0], [1], [0, 0, 1, 1], [], []>} : vector<2x32xf32>, vector<32x128xf32>, vector<2x128xf32> -> vector<2x128xf32>
    %337 = arith.addf %335, %336 : vector<2x128xf32>
    %338 = arith.negf %337 : vector<2x128xf32>
    %339 = math.exp %338 : vector<2x128xf32>
    %cst_65 = arith.constant 1.000000e+00 : f32
    %340 = vector.broadcast %cst_65 : f32 to vector<2x128xf32>
    %341 = arith.addf %340, %339 : vector<2x128xf32>
    %342 = arith.divf %340, %341 : vector<2x128xf32>
    %343 = vector.extract_strided_slice %337 {offsets = [0, 96], sizes = [2, 32], strides = [1, 1]} : vector<2x128xf32> to vector<2x32xf32>
    %344 = math.tanh %343 : vector<2x32xf32>
    %345 = vector.extract_strided_slice %342 {offsets = [0, 32], sizes = [2, 32], strides = [1, 1]} : vector<2x128xf32> to vector<2x32xf32>
    %346 = arith.mulf %345, %329 : vector<2x32xf32>
    %347 = vector.extract_strided_slice %342 {offsets = [0, 0], sizes = [2, 32], strides = [1, 1]} : vector<2x128xf32> to vector<2x32xf32>
    %348 = arith.mulf %347, %344 : vector<2x32xf32>
    %349 = arith.addf %346, %348 : vector<2x32xf32>
    %350 = vector.extract_strided_slice %342 {offsets = [0, 64], sizes = [2, 32], strides = [1, 1]} : vector<2x128xf32> to vector<2x32xf32>
    %351 = math.tanh %349 : vector<2x32xf32>
    %352 = arith.mulf %350, %351 : vector<2x32xf32>
    %353 = vector.shape_cast %352 : vector<2x32xf32> to vector<2x1x32xf32>
    %354 = tpu.concatenate %213, %233, %253, %273, %293, %313, %333, %353 in 1 : vector<2x1x32xf32>, vector<2x1x32xf32>, vector<2x1x32xf32>, vector<2x1x32xf32>, vector<2x1x32xf32>, vector<2x1x32xf32>, vector<2x1x32xf32>, vector<2x1x32xf32> -> vector<2x8x32xf32>
    %c0_66 = arith.constant 0 : index
    %c0_67 = arith.constant 0 : index
    %c0_68 = arith.constant 0 : index
    %355 = vector.load %arg5[%c0_66, %c0_67, %c0_68] : memref<1x16x16xf32, #tpu.memory_space<vmem>>, vector<1x16x16xf32>
    %356 = vector.shape_cast %355 : vector<1x16x16xf32> to vector<16x16xf32>
    %c0_69 = arith.constant 0 : index
    %c0_70 = arith.constant 0 : index
    %357 = vector.load %arg16[%c0_69, %c0_70] : memref<32x32xf32, #tpu.memory_space<vmem>>, vector<32x32xf32>
    %c0_71 = arith.constant 0 : index
    %c0_72 = arith.constant 0 : index
    %358 = vector.load %arg17[%c0_71, %c0_72] : memref<32x32xf32, #tpu.memory_space<vmem>>, vector<32x32xf32>
    %c0_73 = arith.constant 0 : index
    %c0_74 = arith.constant 0 : index
    %359 = vector.load %arg18[%c0_73, %c0_74] : memref<32x32xf32, #tpu.memory_space<vmem>>, vector<32x32xf32>
    %360 = vector.shape_cast %171 : vector<2x8x32xf32> to vector<16x32xf32>
    %361 = vector.shape_cast %354 : vector<2x8x32xf32> to vector<16x32xf32>
    %cst_75 = arith.constant dense<0.000000e+00> : vector<16x32xf32>
    %362 = tpu.matmul %360, %357, %cst_75 {dimension_numbers = #tpu.dot_dimension_numbers<[1], [0], [0], [1], [0, 0, 1, 1], [], []>} : vector<16x32xf32>, vector<32x32xf32>, vector<16x32xf32> -> vector<16x32xf32>
    %cst_76 = arith.constant dense<0.000000e+00> : vector<16x16xf32>
    %363 = tpu.matmul %362, %361, %cst_76 {dimension_numbers = #tpu.dot_dimension_numbers<[1], [1], [0], [0], [0, 0, 1, 0], [], []>} : vector<16x32xf32>, vector<16x32xf32>, vector<16x16xf32> -> vector<16x16xf32>
    %cst_77 = arith.constant 5.000000e-01 : f32
    %364 = vector.broadcast %cst_77 : f32 to vector<16x16xf32>
    %365 = arith.cmpf ogt, %356, %364 : vector<16x16xf32>
    %cst_78 = arith.constant -1.000000e+30 : f32
    %366 = vector.broadcast %cst_78 : f32 to vector<16x16xf32>
    %367 = arith.select %365, %366, %363 : vector<16x16xi1>, vector<16x16xf32>
    %cst_79 = arith.constant dense<0xFF800000> : vector<16xf32>
    %368 = vector.multi_reduction <maximumf>, %367, %cst_79 [1] : vector<16x16xf32> to vector<16xf32>
    %369 = vector.shape_cast %368 : vector<16xf32> to vector<16x1xf32>
    %370 = vector.broadcast %369 : vector<16x1xf32> to vector<16x16xf32>
    %371 = arith.subf %367, %370 : vector<16x16xf32>
    %372 = math.exp %371 : vector<16x16xf32>
    %cst_80 = arith.constant dense<0.000000e+00> : vector<16xf32>
    %373 = vector.multi_reduction <add>, %372, %cst_80 [1] : vector<16x16xf32> to vector<16xf32>
    %374 = vector.shape_cast %373 : vector<16xf32> to vector<16x1xf32>
    %375 = tpu.reciprocal %374 {approx = true} : vector<16x1xf32> -> vector<16x1xf32>
    %376 = vector.broadcast %375 : vector<16x1xf32> to vector<16x16xf32>
    %377 = arith.mulf %372, %376 : vector<16x16xf32>
    %cst_81 = arith.constant dense<0.000000e+00> : vector<16x32xf32>
    %378 = tpu.matmul %377, %361, %cst_81 {dimension_numbers = #tpu.dot_dimension_numbers<[1], [0], [0], [1], [0, 0, 1, 1], [], []>} : vector<16x16xf32>, vector<16x32xf32>, vector<16x32xf32> -> vector<16x32xf32>
    %cst_82 = arith.constant dense<0.000000e+00> : vector<16x32xf32>
    %379 = tpu.matmul %378, %358, %cst_82 {dimension_numbers = #tpu.dot_dimension_numbers<[1], [0], [0], [1], [0, 0, 1, 1], [], []>} : vector<16x32xf32>, vector<32x32xf32>, vector<16x32xf32> -> vector<16x32xf32>
    %cst_83 = arith.constant dense<0.000000e+00> : vector<16x32xf32>
    %380 = tpu.matmul %360, %359, %cst_83 {dimension_numbers = #tpu.dot_dimension_numbers<[1], [0], [0], [1], [0, 0, 1, 1], [], []>} : vector<16x32xf32>, vector<32x32xf32>, vector<16x32xf32> -> vector<16x32xf32>
    %381 = arith.addf %379, %380 : vector<16x32xf32>
    %382 = math.tanh %381 : vector<16x32xf32>
    %383 = vector.shape_cast %382 : vector<16x32xf32> to vector<2x8x32xf32>
    %c0_84 = arith.constant 0 : index
    %c0_85 = arith.constant 0 : index
    %c0_86 = arith.constant 0 : index
    %384 = vector.load %arg6[%c0_84, %c0_85, %c0_86] : memref<1x16x16xf32, #tpu.memory_space<vmem>>, vector<1x16x16xf32>
    %385 = vector.shape_cast %384 : vector<1x16x16xf32> to vector<16x16xf32>
    %c0_87 = arith.constant 0 : index
    %c0_88 = arith.constant 0 : index
    %386 = vector.load %arg19[%c0_87, %c0_88] : memref<32x32xf32, #tpu.memory_space<vmem>>, vector<32x32xf32>
    %c0_89 = arith.constant 0 : index
    %c0_90 = arith.constant 0 : index
    %387 = vector.load %arg20[%c0_89, %c0_90] : memref<32x32xf32, #tpu.memory_space<vmem>>, vector<32x32xf32>
    %c0_91 = arith.constant 0 : index
    %c0_92 = arith.constant 0 : index
    %388 = vector.load %arg21[%c0_91, %c0_92] : memref<32x32xf32, #tpu.memory_space<vmem>>, vector<32x32xf32>
    %389 = vector.shape_cast %354 : vector<2x8x32xf32> to vector<16x32xf32>
    %390 = vector.shape_cast %171 : vector<2x8x32xf32> to vector<16x32xf32>
    %cst_93 = arith.constant dense<0.000000e+00> : vector<16x32xf32>
    %391 = tpu.matmul %389, %386, %cst_93 {dimension_numbers = #tpu.dot_dimension_numbers<[1], [0], [0], [1], [0, 0, 1, 1], [], []>} : vector<16x32xf32>, vector<32x32xf32>, vector<16x32xf32> -> vector<16x32xf32>
    %cst_94 = arith.constant dense<0.000000e+00> : vector<16x16xf32>
    %392 = tpu.matmul %391, %390, %cst_94 {dimension_numbers = #tpu.dot_dimension_numbers<[1], [1], [0], [0], [0, 0, 1, 0], [], []>} : vector<16x32xf32>, vector<16x32xf32>, vector<16x16xf32> -> vector<16x16xf32>
    %cst_95 = arith.constant 5.000000e-01 : f32
    %393 = vector.broadcast %cst_95 : f32 to vector<16x16xf32>
    %394 = arith.cmpf ogt, %385, %393 : vector<16x16xf32>
    %cst_96 = arith.constant -1.000000e+30 : f32
    %395 = vector.broadcast %cst_96 : f32 to vector<16x16xf32>
    %396 = arith.select %394, %395, %392 : vector<16x16xi1>, vector<16x16xf32>
    %cst_97 = arith.constant dense<0xFF800000> : vector<16xf32>
    %397 = vector.multi_reduction <maximumf>, %396, %cst_97 [1] : vector<16x16xf32> to vector<16xf32>
    %398 = vector.shape_cast %397 : vector<16xf32> to vector<16x1xf32>
    %399 = vector.broadcast %398 : vector<16x1xf32> to vector<16x16xf32>
    %400 = arith.subf %396, %399 : vector<16x16xf32>
    %401 = math.exp %400 : vector<16x16xf32>
    %cst_98 = arith.constant dense<0.000000e+00> : vector<16xf32>
    %402 = vector.multi_reduction <add>, %401, %cst_98 [1] : vector<16x16xf32> to vector<16xf32>
    %403 = vector.shape_cast %402 : vector<16xf32> to vector<16x1xf32>
    %404 = tpu.reciprocal %403 {approx = true} : vector<16x1xf32> -> vector<16x1xf32>
    %405 = vector.broadcast %404 : vector<16x1xf32> to vector<16x16xf32>
    %406 = arith.mulf %401, %405 : vector<16x16xf32>
    %cst_99 = arith.constant dense<0.000000e+00> : vector<16x32xf32>
    %407 = tpu.matmul %406, %390, %cst_99 {dimension_numbers = #tpu.dot_dimension_numbers<[1], [0], [0], [1], [0, 0, 1, 1], [], []>} : vector<16x16xf32>, vector<16x32xf32>, vector<16x32xf32> -> vector<16x32xf32>
    %cst_100 = arith.constant dense<0.000000e+00> : vector<16x32xf32>
    %408 = tpu.matmul %407, %387, %cst_100 {dimension_numbers = #tpu.dot_dimension_numbers<[1], [0], [0], [1], [0, 0, 1, 1], [], []>} : vector<16x32xf32>, vector<32x32xf32>, vector<16x32xf32> -> vector<16x32xf32>
    %cst_101 = arith.constant dense<0.000000e+00> : vector<16x32xf32>
    %409 = tpu.matmul %389, %388, %cst_101 {dimension_numbers = #tpu.dot_dimension_numbers<[1], [0], [0], [1], [0, 0, 1, 1], [], []>} : vector<16x32xf32>, vector<32x32xf32>, vector<16x32xf32> -> vector<16x32xf32>
    %410 = arith.addf %408, %409 : vector<16x32xf32>
    %411 = math.tanh %410 : vector<16x32xf32>
    %412 = vector.shape_cast %411 : vector<16x32xf32> to vector<2x8x32xf32>
    %413 = vector.shape_cast %383 : vector<2x8x32xf32> to vector<16x32xf32>
    %c0_102 = arith.constant 0 : index
    %c0_103 = arith.constant 0 : index
    %414 = vector.load %arg22[%c0_102, %c0_103] : memref<32x128xf32, #tpu.memory_space<vmem>>, vector<32x128xf32>
    %cst_104 = arith.constant dense<0.000000e+00> : vector<16x128xf32>
    %415 = tpu.matmul %413, %414, %cst_104 {dimension_numbers = #tpu.dot_dimension_numbers<[1], [0], [0], [1], [0, 0, 1, 1], [], []>} : vector<16x32xf32>, vector<32x128xf32>, vector<16x128xf32> -> vector<16x128xf32>
    %c0_105 = arith.constant 0 : index
    %c0_106 = arith.constant 0 : index
    %416 = vector.load %arg24[%c0_105, %c0_106] : memref<1x128xf32, #tpu.memory_space<vmem>>, vector<1x128xf32>
    %417 = vector.broadcast %416 : vector<1x128xf32> to vector<16x128xf32>
    %418 = arith.addf %415, %417 : vector<16x128xf32>
    %419 = vector.shape_cast %418 : vector<16x128xf32> to vector<2x8x128xf32>
    %c0_107 = arith.constant 0 : index
    %c0_108 = arith.constant 0 : index
    %420 = vector.load %arg23[%c0_107, %c0_108] : memref<32x128xf32, #tpu.memory_space<vmem>>, vector<32x128xf32>
    %cst_109 = arith.constant 0.000000e+00 : f32
    %421 = vector.broadcast %cst_109 : f32 to vector<2x32xf32>
    %cst_110 = arith.constant 0.000000e+00 : f32
    %422 = vector.broadcast %cst_110 : f32 to vector<2x32xf32>
    %423 = vector.extract_strided_slice %419 {offsets = [0, 0, 0], sizes = [2, 1, 128], strides = [1, 1, 1]} : vector<2x8x128xf32> to vector<2x1x128xf32>
    %424 = vector.shape_cast %423 : vector<2x1x128xf32> to vector<2x128xf32>
    %cst_111 = arith.constant dense<0.000000e+00> : vector<2x128xf32>
    %425 = tpu.matmul %421, %420, %cst_111 {dimension_numbers = #tpu.dot_dimension_numbers<[1], [0], [0], [1], [0, 0, 1, 1], [], []>} : vector<2x32xf32>, vector<32x128xf32>, vector<2x128xf32> -> vector<2x128xf32>
    %426 = arith.addf %424, %425 : vector<2x128xf32>
    %427 = arith.negf %426 : vector<2x128xf32>
    %428 = math.exp %427 : vector<2x128xf32>
    %cst_112 = arith.constant 1.000000e+00 : f32
    %429 = vector.broadcast %cst_112 : f32 to vector<2x128xf32>
    %430 = arith.addf %429, %428 : vector<2x128xf32>
    %431 = arith.divf %429, %430 : vector<2x128xf32>
    %432 = vector.extract_strided_slice %426 {offsets = [0, 96], sizes = [2, 32], strides = [1, 1]} : vector<2x128xf32> to vector<2x32xf32>
    %433 = math.tanh %432 : vector<2x32xf32>
    %434 = vector.extract_strided_slice %431 {offsets = [0, 32], sizes = [2, 32], strides = [1, 1]} : vector<2x128xf32> to vector<2x32xf32>
    %435 = arith.mulf %434, %422 : vector<2x32xf32>
    %436 = vector.extract_strided_slice %431 {offsets = [0, 0], sizes = [2, 32], strides = [1, 1]} : vector<2x128xf32> to vector<2x32xf32>
    %437 = arith.mulf %436, %433 : vector<2x32xf32>
    %438 = arith.addf %435, %437 : vector<2x32xf32>
    %439 = vector.extract_strided_slice %431 {offsets = [0, 64], sizes = [2, 32], strides = [1, 1]} : vector<2x128xf32> to vector<2x32xf32>
    %440 = math.tanh %438 : vector<2x32xf32>
    %441 = arith.mulf %439, %440 : vector<2x32xf32>
    %442 = vector.shape_cast %441 : vector<2x32xf32> to vector<2x1x32xf32>
    %443 = vector.extract_strided_slice %419 {offsets = [0, 1, 0], sizes = [2, 1, 128], strides = [1, 1, 1]} : vector<2x8x128xf32> to vector<2x1x128xf32>
    %444 = vector.shape_cast %443 : vector<2x1x128xf32> to vector<2x128xf32>
    %cst_113 = arith.constant dense<0.000000e+00> : vector<2x128xf32>
    %445 = tpu.matmul %441, %420, %cst_113 {dimension_numbers = #tpu.dot_dimension_numbers<[1], [0], [0], [1], [0, 0, 1, 1], [], []>} : vector<2x32xf32>, vector<32x128xf32>, vector<2x128xf32> -> vector<2x128xf32>
    %446 = arith.addf %444, %445 : vector<2x128xf32>
    %447 = arith.negf %446 : vector<2x128xf32>
    %448 = math.exp %447 : vector<2x128xf32>
    %cst_114 = arith.constant 1.000000e+00 : f32
    %449 = vector.broadcast %cst_114 : f32 to vector<2x128xf32>
    %450 = arith.addf %449, %448 : vector<2x128xf32>
    %451 = arith.divf %449, %450 : vector<2x128xf32>
    %452 = vector.extract_strided_slice %446 {offsets = [0, 96], sizes = [2, 32], strides = [1, 1]} : vector<2x128xf32> to vector<2x32xf32>
    %453 = math.tanh %452 : vector<2x32xf32>
    %454 = vector.extract_strided_slice %451 {offsets = [0, 32], sizes = [2, 32], strides = [1, 1]} : vector<2x128xf32> to vector<2x32xf32>
    %455 = arith.mulf %454, %438 : vector<2x32xf32>
    %456 = vector.extract_strided_slice %451 {offsets = [0, 0], sizes = [2, 32], strides = [1, 1]} : vector<2x128xf32> to vector<2x32xf32>
    %457 = arith.mulf %456, %453 : vector<2x32xf32>
    %458 = arith.addf %455, %457 : vector<2x32xf32>
    %459 = vector.extract_strided_slice %451 {offsets = [0, 64], sizes = [2, 32], strides = [1, 1]} : vector<2x128xf32> to vector<2x32xf32>
    %460 = math.tanh %458 : vector<2x32xf32>
    %461 = arith.mulf %459, %460 : vector<2x32xf32>
    %462 = vector.shape_cast %461 : vector<2x32xf32> to vector<2x1x32xf32>
    %463 = vector.extract_strided_slice %419 {offsets = [0, 2, 0], sizes = [2, 1, 128], strides = [1, 1, 1]} : vector<2x8x128xf32> to vector<2x1x128xf32>
    %464 = vector.shape_cast %463 : vector<2x1x128xf32> to vector<2x128xf32>
    %cst_115 = arith.constant dense<0.000000e+00> : vector<2x128xf32>
    %465 = tpu.matmul %461, %420, %cst_115 {dimension_numbers = #tpu.dot_dimension_numbers<[1], [0], [0], [1], [0, 0, 1, 1], [], []>} : vector<2x32xf32>, vector<32x128xf32>, vector<2x128xf32> -> vector<2x128xf32>
    %466 = arith.addf %464, %465 : vector<2x128xf32>
    %467 = arith.negf %466 : vector<2x128xf32>
    %468 = math.exp %467 : vector<2x128xf32>
    %cst_116 = arith.constant 1.000000e+00 : f32
    %469 = vector.broadcast %cst_116 : f32 to vector<2x128xf32>
    %470 = arith.addf %469, %468 : vector<2x128xf32>
    %471 = arith.divf %469, %470 : vector<2x128xf32>
    %472 = vector.extract_strided_slice %466 {offsets = [0, 96], sizes = [2, 32], strides = [1, 1]} : vector<2x128xf32> to vector<2x32xf32>
    %473 = math.tanh %472 : vector<2x32xf32>
    %474 = vector.extract_strided_slice %471 {offsets = [0, 32], sizes = [2, 32], strides = [1, 1]} : vector<2x128xf32> to vector<2x32xf32>
    %475 = arith.mulf %474, %458 : vector<2x32xf32>
    %476 = vector.extract_strided_slice %471 {offsets = [0, 0], sizes = [2, 32], strides = [1, 1]} : vector<2x128xf32> to vector<2x32xf32>
    %477 = arith.mulf %476, %473 : vector<2x32xf32>
    %478 = arith.addf %475, %477 : vector<2x32xf32>
    %479 = vector.extract_strided_slice %471 {offsets = [0, 64], sizes = [2, 32], strides = [1, 1]} : vector<2x128xf32> to vector<2x32xf32>
    %480 = math.tanh %478 : vector<2x32xf32>
    %481 = arith.mulf %479, %480 : vector<2x32xf32>
    %482 = vector.shape_cast %481 : vector<2x32xf32> to vector<2x1x32xf32>
    %483 = vector.extract_strided_slice %419 {offsets = [0, 3, 0], sizes = [2, 1, 128], strides = [1, 1, 1]} : vector<2x8x128xf32> to vector<2x1x128xf32>
    %484 = vector.shape_cast %483 : vector<2x1x128xf32> to vector<2x128xf32>
    %cst_117 = arith.constant dense<0.000000e+00> : vector<2x128xf32>
    %485 = tpu.matmul %481, %420, %cst_117 {dimension_numbers = #tpu.dot_dimension_numbers<[1], [0], [0], [1], [0, 0, 1, 1], [], []>} : vector<2x32xf32>, vector<32x128xf32>, vector<2x128xf32> -> vector<2x128xf32>
    %486 = arith.addf %484, %485 : vector<2x128xf32>
    %487 = arith.negf %486 : vector<2x128xf32>
    %488 = math.exp %487 : vector<2x128xf32>
    %cst_118 = arith.constant 1.000000e+00 : f32
    %489 = vector.broadcast %cst_118 : f32 to vector<2x128xf32>
    %490 = arith.addf %489, %488 : vector<2x128xf32>
    %491 = arith.divf %489, %490 : vector<2x128xf32>
    %492 = vector.extract_strided_slice %486 {offsets = [0, 96], sizes = [2, 32], strides = [1, 1]} : vector<2x128xf32> to vector<2x32xf32>
    %493 = math.tanh %492 : vector<2x32xf32>
    %494 = vector.extract_strided_slice %491 {offsets = [0, 32], sizes = [2, 32], strides = [1, 1]} : vector<2x128xf32> to vector<2x32xf32>
    %495 = arith.mulf %494, %478 : vector<2x32xf32>
    %496 = vector.extract_strided_slice %491 {offsets = [0, 0], sizes = [2, 32], strides = [1, 1]} : vector<2x128xf32> to vector<2x32xf32>
    %497 = arith.mulf %496, %493 : vector<2x32xf32>
    %498 = arith.addf %495, %497 : vector<2x32xf32>
    %499 = vector.extract_strided_slice %491 {offsets = [0, 64], sizes = [2, 32], strides = [1, 1]} : vector<2x128xf32> to vector<2x32xf32>
    %500 = math.tanh %498 : vector<2x32xf32>
    %501 = arith.mulf %499, %500 : vector<2x32xf32>
    %502 = vector.shape_cast %501 : vector<2x32xf32> to vector<2x1x32xf32>
    %503 = vector.extract_strided_slice %419 {offsets = [0, 4, 0], sizes = [2, 1, 128], strides = [1, 1, 1]} : vector<2x8x128xf32> to vector<2x1x128xf32>
    %504 = vector.shape_cast %503 : vector<2x1x128xf32> to vector<2x128xf32>
    %cst_119 = arith.constant dense<0.000000e+00> : vector<2x128xf32>
    %505 = tpu.matmul %501, %420, %cst_119 {dimension_numbers = #tpu.dot_dimension_numbers<[1], [0], [0], [1], [0, 0, 1, 1], [], []>} : vector<2x32xf32>, vector<32x128xf32>, vector<2x128xf32> -> vector<2x128xf32>
    %506 = arith.addf %504, %505 : vector<2x128xf32>
    %507 = arith.negf %506 : vector<2x128xf32>
    %508 = math.exp %507 : vector<2x128xf32>
    %cst_120 = arith.constant 1.000000e+00 : f32
    %509 = vector.broadcast %cst_120 : f32 to vector<2x128xf32>
    %510 = arith.addf %509, %508 : vector<2x128xf32>
    %511 = arith.divf %509, %510 : vector<2x128xf32>
    %512 = vector.extract_strided_slice %506 {offsets = [0, 96], sizes = [2, 32], strides = [1, 1]} : vector<2x128xf32> to vector<2x32xf32>
    %513 = math.tanh %512 : vector<2x32xf32>
    %514 = vector.extract_strided_slice %511 {offsets = [0, 32], sizes = [2, 32], strides = [1, 1]} : vector<2x128xf32> to vector<2x32xf32>
    %515 = arith.mulf %514, %498 : vector<2x32xf32>
    %516 = vector.extract_strided_slice %511 {offsets = [0, 0], sizes = [2, 32], strides = [1, 1]} : vector<2x128xf32> to vector<2x32xf32>
    %517 = arith.mulf %516, %513 : vector<2x32xf32>
    %518 = arith.addf %515, %517 : vector<2x32xf32>
    %519 = vector.extract_strided_slice %511 {offsets = [0, 64], sizes = [2, 32], strides = [1, 1]} : vector<2x128xf32> to vector<2x32xf32>
    %520 = math.tanh %518 : vector<2x32xf32>
    %521 = arith.mulf %519, %520 : vector<2x32xf32>
    %522 = vector.shape_cast %521 : vector<2x32xf32> to vector<2x1x32xf32>
    %523 = vector.extract_strided_slice %419 {offsets = [0, 5, 0], sizes = [2, 1, 128], strides = [1, 1, 1]} : vector<2x8x128xf32> to vector<2x1x128xf32>
    %524 = vector.shape_cast %523 : vector<2x1x128xf32> to vector<2x128xf32>
    %cst_121 = arith.constant dense<0.000000e+00> : vector<2x128xf32>
    %525 = tpu.matmul %521, %420, %cst_121 {dimension_numbers = #tpu.dot_dimension_numbers<[1], [0], [0], [1], [0, 0, 1, 1], [], []>} : vector<2x32xf32>, vector<32x128xf32>, vector<2x128xf32> -> vector<2x128xf32>
    %526 = arith.addf %524, %525 : vector<2x128xf32>
    %527 = arith.negf %526 : vector<2x128xf32>
    %528 = math.exp %527 : vector<2x128xf32>
    %cst_122 = arith.constant 1.000000e+00 : f32
    %529 = vector.broadcast %cst_122 : f32 to vector<2x128xf32>
    %530 = arith.addf %529, %528 : vector<2x128xf32>
    %531 = arith.divf %529, %530 : vector<2x128xf32>
    %532 = vector.extract_strided_slice %526 {offsets = [0, 96], sizes = [2, 32], strides = [1, 1]} : vector<2x128xf32> to vector<2x32xf32>
    %533 = math.tanh %532 : vector<2x32xf32>
    %534 = vector.extract_strided_slice %531 {offsets = [0, 32], sizes = [2, 32], strides = [1, 1]} : vector<2x128xf32> to vector<2x32xf32>
    %535 = arith.mulf %534, %518 : vector<2x32xf32>
    %536 = vector.extract_strided_slice %531 {offsets = [0, 0], sizes = [2, 32], strides = [1, 1]} : vector<2x128xf32> to vector<2x32xf32>
    %537 = arith.mulf %536, %533 : vector<2x32xf32>
    %538 = arith.addf %535, %537 : vector<2x32xf32>
    %539 = vector.extract_strided_slice %531 {offsets = [0, 64], sizes = [2, 32], strides = [1, 1]} : vector<2x128xf32> to vector<2x32xf32>
    %540 = math.tanh %538 : vector<2x32xf32>
    %541 = arith.mulf %539, %540 : vector<2x32xf32>
    %542 = vector.shape_cast %541 : vector<2x32xf32> to vector<2x1x32xf32>
    %543 = vector.extract_strided_slice %419 {offsets = [0, 6, 0], sizes = [2, 1, 128], strides = [1, 1, 1]} : vector<2x8x128xf32> to vector<2x1x128xf32>
    %544 = vector.shape_cast %543 : vector<2x1x128xf32> to vector<2x128xf32>
    %cst_123 = arith.constant dense<0.000000e+00> : vector<2x128xf32>
    %545 = tpu.matmul %541, %420, %cst_123 {dimension_numbers = #tpu.dot_dimension_numbers<[1], [0], [0], [1], [0, 0, 1, 1], [], []>} : vector<2x32xf32>, vector<32x128xf32>, vector<2x128xf32> -> vector<2x128xf32>
    %546 = arith.addf %544, %545 : vector<2x128xf32>
    %547 = arith.negf %546 : vector<2x128xf32>
    %548 = math.exp %547 : vector<2x128xf32>
    %cst_124 = arith.constant 1.000000e+00 : f32
    %549 = vector.broadcast %cst_124 : f32 to vector<2x128xf32>
    %550 = arith.addf %549, %548 : vector<2x128xf32>
    %551 = arith.divf %549, %550 : vector<2x128xf32>
    %552 = vector.extract_strided_slice %546 {offsets = [0, 96], sizes = [2, 32], strides = [1, 1]} : vector<2x128xf32> to vector<2x32xf32>
    %553 = math.tanh %552 : vector<2x32xf32>
    %554 = vector.extract_strided_slice %551 {offsets = [0, 32], sizes = [2, 32], strides = [1, 1]} : vector<2x128xf32> to vector<2x32xf32>
    %555 = arith.mulf %554, %538 : vector<2x32xf32>
    %556 = vector.extract_strided_slice %551 {offsets = [0, 0], sizes = [2, 32], strides = [1, 1]} : vector<2x128xf32> to vector<2x32xf32>
    %557 = arith.mulf %556, %553 : vector<2x32xf32>
    %558 = arith.addf %555, %557 : vector<2x32xf32>
    %559 = vector.extract_strided_slice %551 {offsets = [0, 64], sizes = [2, 32], strides = [1, 1]} : vector<2x128xf32> to vector<2x32xf32>
    %560 = math.tanh %558 : vector<2x32xf32>
    %561 = arith.mulf %559, %560 : vector<2x32xf32>
    %562 = vector.shape_cast %561 : vector<2x32xf32> to vector<2x1x32xf32>
    %563 = vector.extract_strided_slice %419 {offsets = [0, 7, 0], sizes = [2, 1, 128], strides = [1, 1, 1]} : vector<2x8x128xf32> to vector<2x1x128xf32>
    %564 = vector.shape_cast %563 : vector<2x1x128xf32> to vector<2x128xf32>
    %cst_125 = arith.constant dense<0.000000e+00> : vector<2x128xf32>
    %565 = tpu.matmul %561, %420, %cst_125 {dimension_numbers = #tpu.dot_dimension_numbers<[1], [0], [0], [1], [0, 0, 1, 1], [], []>} : vector<2x32xf32>, vector<32x128xf32>, vector<2x128xf32> -> vector<2x128xf32>
    %566 = arith.addf %564, %565 : vector<2x128xf32>
    %567 = arith.negf %566 : vector<2x128xf32>
    %568 = math.exp %567 : vector<2x128xf32>
    %cst_126 = arith.constant 1.000000e+00 : f32
    %569 = vector.broadcast %cst_126 : f32 to vector<2x128xf32>
    %570 = arith.addf %569, %568 : vector<2x128xf32>
    %571 = arith.divf %569, %570 : vector<2x128xf32>
    %572 = vector.extract_strided_slice %566 {offsets = [0, 96], sizes = [2, 32], strides = [1, 1]} : vector<2x128xf32> to vector<2x32xf32>
    %573 = math.tanh %572 : vector<2x32xf32>
    %574 = vector.extract_strided_slice %571 {offsets = [0, 32], sizes = [2, 32], strides = [1, 1]} : vector<2x128xf32> to vector<2x32xf32>
    %575 = arith.mulf %574, %558 : vector<2x32xf32>
    %576 = vector.extract_strided_slice %571 {offsets = [0, 0], sizes = [2, 32], strides = [1, 1]} : vector<2x128xf32> to vector<2x32xf32>
    %577 = arith.mulf %576, %573 : vector<2x32xf32>
    %578 = arith.addf %575, %577 : vector<2x32xf32>
    %579 = vector.extract_strided_slice %571 {offsets = [0, 64], sizes = [2, 32], strides = [1, 1]} : vector<2x128xf32> to vector<2x32xf32>
    %580 = math.tanh %578 : vector<2x32xf32>
    %581 = arith.mulf %579, %580 : vector<2x32xf32>
    %582 = vector.shape_cast %581 : vector<2x32xf32> to vector<2x1x32xf32>
    %583 = tpu.concatenate %442, %462, %482, %502, %522, %542, %562, %582 in 1 : vector<2x1x32xf32>, vector<2x1x32xf32>, vector<2x1x32xf32>, vector<2x1x32xf32>, vector<2x1x32xf32>, vector<2x1x32xf32>, vector<2x1x32xf32>, vector<2x1x32xf32> -> vector<2x8x32xf32>
    %584 = vector.shape_cast %412 : vector<2x8x32xf32> to vector<16x32xf32>
    %c0_127 = arith.constant 0 : index
    %c0_128 = arith.constant 0 : index
    %585 = vector.load %arg25[%c0_127, %c0_128] : memref<32x128xf32, #tpu.memory_space<vmem>>, vector<32x128xf32>
    %cst_129 = arith.constant dense<0.000000e+00> : vector<16x128xf32>
    %586 = tpu.matmul %584, %585, %cst_129 {dimension_numbers = #tpu.dot_dimension_numbers<[1], [0], [0], [1], [0, 0, 1, 1], [], []>} : vector<16x32xf32>, vector<32x128xf32>, vector<16x128xf32> -> vector<16x128xf32>
    %c0_130 = arith.constant 0 : index
    %c0_131 = arith.constant 0 : index
    %587 = vector.load %arg27[%c0_130, %c0_131] : memref<1x128xf32, #tpu.memory_space<vmem>>, vector<1x128xf32>
    %588 = vector.broadcast %587 : vector<1x128xf32> to vector<16x128xf32>
    %589 = arith.addf %586, %588 : vector<16x128xf32>
    %590 = vector.shape_cast %589 : vector<16x128xf32> to vector<2x8x128xf32>
    %c0_132 = arith.constant 0 : index
    %c0_133 = arith.constant 0 : index
    %591 = vector.load %arg26[%c0_132, %c0_133] : memref<32x128xf32, #tpu.memory_space<vmem>>, vector<32x128xf32>
    %cst_134 = arith.constant 0.000000e+00 : f32
    %592 = vector.broadcast %cst_134 : f32 to vector<2x32xf32>
    %cst_135 = arith.constant 0.000000e+00 : f32
    %593 = vector.broadcast %cst_135 : f32 to vector<2x32xf32>
    %594 = vector.extract_strided_slice %590 {offsets = [0, 0, 0], sizes = [2, 1, 128], strides = [1, 1, 1]} : vector<2x8x128xf32> to vector<2x1x128xf32>
    %595 = vector.shape_cast %594 : vector<2x1x128xf32> to vector<2x128xf32>
    %cst_136 = arith.constant dense<0.000000e+00> : vector<2x128xf32>
    %596 = tpu.matmul %592, %591, %cst_136 {dimension_numbers = #tpu.dot_dimension_numbers<[1], [0], [0], [1], [0, 0, 1, 1], [], []>} : vector<2x32xf32>, vector<32x128xf32>, vector<2x128xf32> -> vector<2x128xf32>
    %597 = arith.addf %595, %596 : vector<2x128xf32>
    %598 = arith.negf %597 : vector<2x128xf32>
    %599 = math.exp %598 : vector<2x128xf32>
    %cst_137 = arith.constant 1.000000e+00 : f32
    %600 = vector.broadcast %cst_137 : f32 to vector<2x128xf32>
    %601 = arith.addf %600, %599 : vector<2x128xf32>
    %602 = arith.divf %600, %601 : vector<2x128xf32>
    %603 = vector.extract_strided_slice %597 {offsets = [0, 96], sizes = [2, 32], strides = [1, 1]} : vector<2x128xf32> to vector<2x32xf32>
    %604 = math.tanh %603 : vector<2x32xf32>
    %605 = vector.extract_strided_slice %602 {offsets = [0, 32], sizes = [2, 32], strides = [1, 1]} : vector<2x128xf32> to vector<2x32xf32>
    %606 = arith.mulf %605, %593 : vector<2x32xf32>
    %607 = vector.extract_strided_slice %602 {offsets = [0, 0], sizes = [2, 32], strides = [1, 1]} : vector<2x128xf32> to vector<2x32xf32>
    %608 = arith.mulf %607, %604 : vector<2x32xf32>
    %609 = arith.addf %606, %608 : vector<2x32xf32>
    %610 = vector.extract_strided_slice %602 {offsets = [0, 64], sizes = [2, 32], strides = [1, 1]} : vector<2x128xf32> to vector<2x32xf32>
    %611 = math.tanh %609 : vector<2x32xf32>
    %612 = arith.mulf %610, %611 : vector<2x32xf32>
    %613 = vector.shape_cast %612 : vector<2x32xf32> to vector<2x1x32xf32>
    %614 = vector.extract_strided_slice %590 {offsets = [0, 1, 0], sizes = [2, 1, 128], strides = [1, 1, 1]} : vector<2x8x128xf32> to vector<2x1x128xf32>
    %615 = vector.shape_cast %614 : vector<2x1x128xf32> to vector<2x128xf32>
    %cst_138 = arith.constant dense<0.000000e+00> : vector<2x128xf32>
    %616 = tpu.matmul %612, %591, %cst_138 {dimension_numbers = #tpu.dot_dimension_numbers<[1], [0], [0], [1], [0, 0, 1, 1], [], []>} : vector<2x32xf32>, vector<32x128xf32>, vector<2x128xf32> -> vector<2x128xf32>
    %617 = arith.addf %615, %616 : vector<2x128xf32>
    %618 = arith.negf %617 : vector<2x128xf32>
    %619 = math.exp %618 : vector<2x128xf32>
    %cst_139 = arith.constant 1.000000e+00 : f32
    %620 = vector.broadcast %cst_139 : f32 to vector<2x128xf32>
    %621 = arith.addf %620, %619 : vector<2x128xf32>
    %622 = arith.divf %620, %621 : vector<2x128xf32>
    %623 = vector.extract_strided_slice %617 {offsets = [0, 96], sizes = [2, 32], strides = [1, 1]} : vector<2x128xf32> to vector<2x32xf32>
    %624 = math.tanh %623 : vector<2x32xf32>
    %625 = vector.extract_strided_slice %622 {offsets = [0, 32], sizes = [2, 32], strides = [1, 1]} : vector<2x128xf32> to vector<2x32xf32>
    %626 = arith.mulf %625, %609 : vector<2x32xf32>
    %627 = vector.extract_strided_slice %622 {offsets = [0, 0], sizes = [2, 32], strides = [1, 1]} : vector<2x128xf32> to vector<2x32xf32>
    %628 = arith.mulf %627, %624 : vector<2x32xf32>
    %629 = arith.addf %626, %628 : vector<2x32xf32>
    %630 = vector.extract_strided_slice %622 {offsets = [0, 64], sizes = [2, 32], strides = [1, 1]} : vector<2x128xf32> to vector<2x32xf32>
    %631 = math.tanh %629 : vector<2x32xf32>
    %632 = arith.mulf %630, %631 : vector<2x32xf32>
    %633 = vector.shape_cast %632 : vector<2x32xf32> to vector<2x1x32xf32>
    %634 = vector.extract_strided_slice %590 {offsets = [0, 2, 0], sizes = [2, 1, 128], strides = [1, 1, 1]} : vector<2x8x128xf32> to vector<2x1x128xf32>
    %635 = vector.shape_cast %634 : vector<2x1x128xf32> to vector<2x128xf32>
    %cst_140 = arith.constant dense<0.000000e+00> : vector<2x128xf32>
    %636 = tpu.matmul %632, %591, %cst_140 {dimension_numbers = #tpu.dot_dimension_numbers<[1], [0], [0], [1], [0, 0, 1, 1], [], []>} : vector<2x32xf32>, vector<32x128xf32>, vector<2x128xf32> -> vector<2x128xf32>
    %637 = arith.addf %635, %636 : vector<2x128xf32>
    %638 = arith.negf %637 : vector<2x128xf32>
    %639 = math.exp %638 : vector<2x128xf32>
    %cst_141 = arith.constant 1.000000e+00 : f32
    %640 = vector.broadcast %cst_141 : f32 to vector<2x128xf32>
    %641 = arith.addf %640, %639 : vector<2x128xf32>
    %642 = arith.divf %640, %641 : vector<2x128xf32>
    %643 = vector.extract_strided_slice %637 {offsets = [0, 96], sizes = [2, 32], strides = [1, 1]} : vector<2x128xf32> to vector<2x32xf32>
    %644 = math.tanh %643 : vector<2x32xf32>
    %645 = vector.extract_strided_slice %642 {offsets = [0, 32], sizes = [2, 32], strides = [1, 1]} : vector<2x128xf32> to vector<2x32xf32>
    %646 = arith.mulf %645, %629 : vector<2x32xf32>
    %647 = vector.extract_strided_slice %642 {offsets = [0, 0], sizes = [2, 32], strides = [1, 1]} : vector<2x128xf32> to vector<2x32xf32>
    %648 = arith.mulf %647, %644 : vector<2x32xf32>
    %649 = arith.addf %646, %648 : vector<2x32xf32>
    %650 = vector.extract_strided_slice %642 {offsets = [0, 64], sizes = [2, 32], strides = [1, 1]} : vector<2x128xf32> to vector<2x32xf32>
    %651 = math.tanh %649 : vector<2x32xf32>
    %652 = arith.mulf %650, %651 : vector<2x32xf32>
    %653 = vector.shape_cast %652 : vector<2x32xf32> to vector<2x1x32xf32>
    %654 = vector.extract_strided_slice %590 {offsets = [0, 3, 0], sizes = [2, 1, 128], strides = [1, 1, 1]} : vector<2x8x128xf32> to vector<2x1x128xf32>
    %655 = vector.shape_cast %654 : vector<2x1x128xf32> to vector<2x128xf32>
    %cst_142 = arith.constant dense<0.000000e+00> : vector<2x128xf32>
    %656 = tpu.matmul %652, %591, %cst_142 {dimension_numbers = #tpu.dot_dimension_numbers<[1], [0], [0], [1], [0, 0, 1, 1], [], []>} : vector<2x32xf32>, vector<32x128xf32>, vector<2x128xf32> -> vector<2x128xf32>
    %657 = arith.addf %655, %656 : vector<2x128xf32>
    %658 = arith.negf %657 : vector<2x128xf32>
    %659 = math.exp %658 : vector<2x128xf32>
    %cst_143 = arith.constant 1.000000e+00 : f32
    %660 = vector.broadcast %cst_143 : f32 to vector<2x128xf32>
    %661 = arith.addf %660, %659 : vector<2x128xf32>
    %662 = arith.divf %660, %661 : vector<2x128xf32>
    %663 = vector.extract_strided_slice %657 {offsets = [0, 96], sizes = [2, 32], strides = [1, 1]} : vector<2x128xf32> to vector<2x32xf32>
    %664 = math.tanh %663 : vector<2x32xf32>
    %665 = vector.extract_strided_slice %662 {offsets = [0, 32], sizes = [2, 32], strides = [1, 1]} : vector<2x128xf32> to vector<2x32xf32>
    %666 = arith.mulf %665, %649 : vector<2x32xf32>
    %667 = vector.extract_strided_slice %662 {offsets = [0, 0], sizes = [2, 32], strides = [1, 1]} : vector<2x128xf32> to vector<2x32xf32>
    %668 = arith.mulf %667, %664 : vector<2x32xf32>
    %669 = arith.addf %666, %668 : vector<2x32xf32>
    %670 = vector.extract_strided_slice %662 {offsets = [0, 64], sizes = [2, 32], strides = [1, 1]} : vector<2x128xf32> to vector<2x32xf32>
    %671 = math.tanh %669 : vector<2x32xf32>
    %672 = arith.mulf %670, %671 : vector<2x32xf32>
    %673 = vector.shape_cast %672 : vector<2x32xf32> to vector<2x1x32xf32>
    %674 = vector.extract_strided_slice %590 {offsets = [0, 4, 0], sizes = [2, 1, 128], strides = [1, 1, 1]} : vector<2x8x128xf32> to vector<2x1x128xf32>
    %675 = vector.shape_cast %674 : vector<2x1x128xf32> to vector<2x128xf32>
    %cst_144 = arith.constant dense<0.000000e+00> : vector<2x128xf32>
    %676 = tpu.matmul %672, %591, %cst_144 {dimension_numbers = #tpu.dot_dimension_numbers<[1], [0], [0], [1], [0, 0, 1, 1], [], []>} : vector<2x32xf32>, vector<32x128xf32>, vector<2x128xf32> -> vector<2x128xf32>
    %677 = arith.addf %675, %676 : vector<2x128xf32>
    %678 = arith.negf %677 : vector<2x128xf32>
    %679 = math.exp %678 : vector<2x128xf32>
    %cst_145 = arith.constant 1.000000e+00 : f32
    %680 = vector.broadcast %cst_145 : f32 to vector<2x128xf32>
    %681 = arith.addf %680, %679 : vector<2x128xf32>
    %682 = arith.divf %680, %681 : vector<2x128xf32>
    %683 = vector.extract_strided_slice %677 {offsets = [0, 96], sizes = [2, 32], strides = [1, 1]} : vector<2x128xf32> to vector<2x32xf32>
    %684 = math.tanh %683 : vector<2x32xf32>
    %685 = vector.extract_strided_slice %682 {offsets = [0, 32], sizes = [2, 32], strides = [1, 1]} : vector<2x128xf32> to vector<2x32xf32>
    %686 = arith.mulf %685, %669 : vector<2x32xf32>
    %687 = vector.extract_strided_slice %682 {offsets = [0, 0], sizes = [2, 32], strides = [1, 1]} : vector<2x128xf32> to vector<2x32xf32>
    %688 = arith.mulf %687, %684 : vector<2x32xf32>
    %689 = arith.addf %686, %688 : vector<2x32xf32>
    %690 = vector.extract_strided_slice %682 {offsets = [0, 64], sizes = [2, 32], strides = [1, 1]} : vector<2x128xf32> to vector<2x32xf32>
    %691 = math.tanh %689 : vector<2x32xf32>
    %692 = arith.mulf %690, %691 : vector<2x32xf32>
    %693 = vector.shape_cast %692 : vector<2x32xf32> to vector<2x1x32xf32>
    %694 = vector.extract_strided_slice %590 {offsets = [0, 5, 0], sizes = [2, 1, 128], strides = [1, 1, 1]} : vector<2x8x128xf32> to vector<2x1x128xf32>
    %695 = vector.shape_cast %694 : vector<2x1x128xf32> to vector<2x128xf32>
    %cst_146 = arith.constant dense<0.000000e+00> : vector<2x128xf32>
    %696 = tpu.matmul %692, %591, %cst_146 {dimension_numbers = #tpu.dot_dimension_numbers<[1], [0], [0], [1], [0, 0, 1, 1], [], []>} : vector<2x32xf32>, vector<32x128xf32>, vector<2x128xf32> -> vector<2x128xf32>
    %697 = arith.addf %695, %696 : vector<2x128xf32>
    %698 = arith.negf %697 : vector<2x128xf32>
    %699 = math.exp %698 : vector<2x128xf32>
    %cst_147 = arith.constant 1.000000e+00 : f32
    %700 = vector.broadcast %cst_147 : f32 to vector<2x128xf32>
    %701 = arith.addf %700, %699 : vector<2x128xf32>
    %702 = arith.divf %700, %701 : vector<2x128xf32>
    %703 = vector.extract_strided_slice %697 {offsets = [0, 96], sizes = [2, 32], strides = [1, 1]} : vector<2x128xf32> to vector<2x32xf32>
    %704 = math.tanh %703 : vector<2x32xf32>
    %705 = vector.extract_strided_slice %702 {offsets = [0, 32], sizes = [2, 32], strides = [1, 1]} : vector<2x128xf32> to vector<2x32xf32>
    %706 = arith.mulf %705, %689 : vector<2x32xf32>
    %707 = vector.extract_strided_slice %702 {offsets = [0, 0], sizes = [2, 32], strides = [1, 1]} : vector<2x128xf32> to vector<2x32xf32>
    %708 = arith.mulf %707, %704 : vector<2x32xf32>
    %709 = arith.addf %706, %708 : vector<2x32xf32>
    %710 = vector.extract_strided_slice %702 {offsets = [0, 64], sizes = [2, 32], strides = [1, 1]} : vector<2x128xf32> to vector<2x32xf32>
    %711 = math.tanh %709 : vector<2x32xf32>
    %712 = arith.mulf %710, %711 : vector<2x32xf32>
    %713 = vector.shape_cast %712 : vector<2x32xf32> to vector<2x1x32xf32>
    %714 = vector.extract_strided_slice %590 {offsets = [0, 6, 0], sizes = [2, 1, 128], strides = [1, 1, 1]} : vector<2x8x128xf32> to vector<2x1x128xf32>
    %715 = vector.shape_cast %714 : vector<2x1x128xf32> to vector<2x128xf32>
    %cst_148 = arith.constant dense<0.000000e+00> : vector<2x128xf32>
    %716 = tpu.matmul %712, %591, %cst_148 {dimension_numbers = #tpu.dot_dimension_numbers<[1], [0], [0], [1], [0, 0, 1, 1], [], []>} : vector<2x32xf32>, vector<32x128xf32>, vector<2x128xf32> -> vector<2x128xf32>
    %717 = arith.addf %715, %716 : vector<2x128xf32>
    %718 = arith.negf %717 : vector<2x128xf32>
    %719 = math.exp %718 : vector<2x128xf32>
    %cst_149 = arith.constant 1.000000e+00 : f32
    %720 = vector.broadcast %cst_149 : f32 to vector<2x128xf32>
    %721 = arith.addf %720, %719 : vector<2x128xf32>
    %722 = arith.divf %720, %721 : vector<2x128xf32>
    %723 = vector.extract_strided_slice %717 {offsets = [0, 96], sizes = [2, 32], strides = [1, 1]} : vector<2x128xf32> to vector<2x32xf32>
    %724 = math.tanh %723 : vector<2x32xf32>
    %725 = vector.extract_strided_slice %722 {offsets = [0, 32], sizes = [2, 32], strides = [1, 1]} : vector<2x128xf32> to vector<2x32xf32>
    %726 = arith.mulf %725, %709 : vector<2x32xf32>
    %727 = vector.extract_strided_slice %722 {offsets = [0, 0], sizes = [2, 32], strides = [1, 1]} : vector<2x128xf32> to vector<2x32xf32>
    %728 = arith.mulf %727, %724 : vector<2x32xf32>
    %729 = arith.addf %726, %728 : vector<2x32xf32>
    %730 = vector.extract_strided_slice %722 {offsets = [0, 64], sizes = [2, 32], strides = [1, 1]} : vector<2x128xf32> to vector<2x32xf32>
    %731 = math.tanh %729 : vector<2x32xf32>
    %732 = arith.mulf %730, %731 : vector<2x32xf32>
    %733 = vector.shape_cast %732 : vector<2x32xf32> to vector<2x1x32xf32>
    %734 = vector.extract_strided_slice %590 {offsets = [0, 7, 0], sizes = [2, 1, 128], strides = [1, 1, 1]} : vector<2x8x128xf32> to vector<2x1x128xf32>
    %735 = vector.shape_cast %734 : vector<2x1x128xf32> to vector<2x128xf32>
    %cst_150 = arith.constant dense<0.000000e+00> : vector<2x128xf32>
    %736 = tpu.matmul %732, %591, %cst_150 {dimension_numbers = #tpu.dot_dimension_numbers<[1], [0], [0], [1], [0, 0, 1, 1], [], []>} : vector<2x32xf32>, vector<32x128xf32>, vector<2x128xf32> -> vector<2x128xf32>
    %737 = arith.addf %735, %736 : vector<2x128xf32>
    %738 = arith.negf %737 : vector<2x128xf32>
    %739 = math.exp %738 : vector<2x128xf32>
    %cst_151 = arith.constant 1.000000e+00 : f32
    %740 = vector.broadcast %cst_151 : f32 to vector<2x128xf32>
    %741 = arith.addf %740, %739 : vector<2x128xf32>
    %742 = arith.divf %740, %741 : vector<2x128xf32>
    %743 = vector.extract_strided_slice %737 {offsets = [0, 96], sizes = [2, 32], strides = [1, 1]} : vector<2x128xf32> to vector<2x32xf32>
    %744 = math.tanh %743 : vector<2x32xf32>
    %745 = vector.extract_strided_slice %742 {offsets = [0, 32], sizes = [2, 32], strides = [1, 1]} : vector<2x128xf32> to vector<2x32xf32>
    %746 = arith.mulf %745, %729 : vector<2x32xf32>
    %747 = vector.extract_strided_slice %742 {offsets = [0, 0], sizes = [2, 32], strides = [1, 1]} : vector<2x128xf32> to vector<2x32xf32>
    %748 = arith.mulf %747, %744 : vector<2x32xf32>
    %749 = arith.addf %746, %748 : vector<2x32xf32>
    %750 = vector.extract_strided_slice %742 {offsets = [0, 64], sizes = [2, 32], strides = [1, 1]} : vector<2x128xf32> to vector<2x32xf32>
    %751 = math.tanh %749 : vector<2x32xf32>
    %752 = arith.mulf %750, %751 : vector<2x32xf32>
    %753 = vector.shape_cast %752 : vector<2x32xf32> to vector<2x1x32xf32>
    %754 = tpu.concatenate %613, %633, %653, %673, %693, %713, %733, %753 in 1 : vector<2x1x32xf32>, vector<2x1x32xf32>, vector<2x1x32xf32>, vector<2x1x32xf32>, vector<2x1x32xf32>, vector<2x1x32xf32>, vector<2x1x32xf32>, vector<2x1x32xf32> -> vector<2x8x32xf32>
    %c0_152 = arith.constant 0 : index
    %c0_153 = arith.constant 0 : index
    %c0_154 = arith.constant 0 : index
    %755 = vector.load %arg7[%c0_152, %c0_153, %c0_154] : memref<2x8x1xf32, #tpu.memory_space<vmem>>, vector<2x8x1xf32>
    %cst_155 = arith.constant 5.000000e-01 : f32
    %756 = vector.broadcast %cst_155 : f32 to vector<2x8x1xf32>
    %757 = arith.cmpf ogt, %755, %756 : vector<2x8x1xf32>
    %cst_156 = arith.constant -1.000000e+30 : f32
    %758 = vector.shape_cast %757 : vector<2x8x1xi1> to vector<2x8x1xi1>
    %759 = vector.broadcast %758 : vector<2x8x1xi1> to vector<2x8x32xi1>
    %760 = vector.broadcast %cst_156 : f32 to vector<2x8x32xf32>
    %761 = arith.select %759, %760, %583 : vector<2x8x32xi1>, vector<2x8x32xf32>
    %cst_157 = arith.constant dense<0xFF800000> : vector<2x32xf32>
    %762 = vector.multi_reduction <maximumf>, %761, %cst_157 [1] : vector<2x8x32xf32> to vector<2x32xf32>
    %c0_158 = arith.constant 0 : index
    %c0_159 = arith.constant 0 : index
    %c0_160 = arith.constant 0 : index
    %763 = vector.load %arg8[%c0_158, %c0_159, %c0_160] : memref<2x8x1xf32, #tpu.memory_space<vmem>>, vector<2x8x1xf32>
    %cst_161 = arith.constant 5.000000e-01 : f32
    %764 = vector.broadcast %cst_161 : f32 to vector<2x8x1xf32>
    %765 = arith.cmpf ogt, %763, %764 : vector<2x8x1xf32>
    %cst_162 = arith.constant -1.000000e+30 : f32
    %766 = vector.shape_cast %765 : vector<2x8x1xi1> to vector<2x8x1xi1>
    %767 = vector.broadcast %766 : vector<2x8x1xi1> to vector<2x8x32xi1>
    %768 = vector.broadcast %cst_162 : f32 to vector<2x8x32xf32>
    %769 = arith.select %767, %768, %754 : vector<2x8x32xi1>, vector<2x8x32xf32>
    %cst_163 = arith.constant dense<0xFF800000> : vector<2x32xf32>
    %770 = vector.multi_reduction <maximumf>, %769, %cst_163 [1] : vector<2x8x32xf32> to vector<2x32xf32>
    %c0_164 = arith.constant 0 : index
    %c0_165 = arith.constant 0 : index
    %771 = vector.load %arg28[%c0_164, %c0_165] : memref<32x32xf32, #tpu.memory_space<vmem>>, vector<32x32xf32>
    %cst_166 = arith.constant dense<0.000000e+00> : vector<2x32xf32>
    %772 = tpu.matmul %762, %771, %cst_166 {dimension_numbers = #tpu.dot_dimension_numbers<[1], [0], [0], [1], [0, 0, 1, 1], [], []>} : vector<2x32xf32>, vector<32x32xf32>, vector<2x32xf32> -> vector<2x32xf32>
    %c0_167 = arith.constant 0 : index
    %c0_168 = arith.constant 0 : index
    %773 = vector.load %arg29[%c0_167, %c0_168] : memref<32x32xf32, #tpu.memory_space<vmem>>, vector<32x32xf32>
    %cst_169 = arith.constant dense<0.000000e+00> : vector<2x32xf32>
    %774 = tpu.matmul %770, %773, %cst_169 {dimension_numbers = #tpu.dot_dimension_numbers<[1], [0], [0], [1], [0, 0, 1, 1], [], []>} : vector<2x32xf32>, vector<32x32xf32>, vector<2x32xf32> -> vector<2x32xf32>
    %775 = arith.addf %772, %774 : vector<2x32xf32>
    %c0_170 = arith.constant 0 : index
    %c0_171 = arith.constant 0 : index
    %776 = vector.load %arg30[%c0_170, %c0_171] : memref<1x32xf32, #tpu.memory_space<vmem>>, vector<1x32xf32>
    %777 = vector.broadcast %776 : vector<1x32xf32> to vector<2x32xf32>
    %778 = arith.addf %775, %777 : vector<2x32xf32>
    %779 = math.tanh %778 : vector<2x32xf32>
    %c0_172 = arith.constant 0 : index
    %c0_173 = arith.constant 0 : index
    %780 = vector.load %arg31[%c0_172, %c0_173] : memref<1x32xf32, #tpu.memory_space<vmem>>, vector<1x32xf32>
    %781 = vector.broadcast %780 : vector<1x32xf32> to vector<2x32xf32>
    %782 = arith.mulf %779, %781 : vector<2x32xf32>
    %cst_174 = arith.constant dense<0.000000e+00> : vector<2xf32>
    %783 = vector.multi_reduction <add>, %782, %cst_174 [1] : vector<2x32xf32> to vector<2xf32>
    %784 = vector.shape_cast %783 : vector<2xf32> to vector<2x1xf32>
    %c0_175 = arith.constant 0 : index
    %c0_176 = arith.constant 0 : index
    %785 = vector.load %arg32[%c0_175, %c0_176] : memref<1x1xf32, #tpu.memory_space<vmem>>, vector<1x1xf32>
    %786 = vector.broadcast %785 : vector<1x1xf32> to vector<2x1xf32>
    %787 = arith.addf %784, %786 : vector<2x1xf32>
    %c0_177 = arith.constant 0 : index
    %c0_178 = arith.constant 0 : index
    %788 = vector.load %arg33[%c0_177, %c0_178] : memref<2x1xf32, #tpu.memory_space<vmem>>, vector<2x1xf32>
    tpu.vector_store %arg33[%c0_177, %c0_178], %787 {strides = array<i32>} : memref<2x1xf32, #tpu.memory_space<vmem>>, vector<2x1xf32>,
    return
  }
  func.func @transform_0(%arg0: i32) -> (i32, i32, i32) {
    %c0_i32 = arith.constant 0 : i32
    %c0_i32_0 = arith.constant 0 : i32
    %c0_i32_1 = arith.constant 0 : i32
    return %arg0, %c0_i32, %c0_i32_0 : i32, i32, i32
  }
  func.func @transform_1(%arg0: i32) -> (i32, i32, i32) {
    %c0_i32 = arith.constant 0 : i32
    %c0_i32_0 = arith.constant 0 : i32
    %c0_i32_1 = arith.constant 0 : i32
    return %arg0, %c0_i32, %c0_i32_0 : i32, i32, i32
  }
  func.func @transform_2(%arg0: i32) -> (i32, i32, i32) {
    %c0_i32 = arith.constant 0 : i32
    %c0_i32_0 = arith.constant 0 : i32
    %c0_i32_1 = arith.constant 0 : i32
    return %arg0, %c0_i32, %c0_i32_0 : i32, i32, i32
  }
  func.func @transform_3(%arg0: i32) -> (i32, i32) {
    %c0_i32 = arith.constant 0 : i32
    %c0_i32_0 = arith.constant 0 : i32
    %c0_i32_1 = arith.constant 0 : i32
    return %c0_i32, %c0_i32_0 : i32, i32
  }
  func.func @transform_4(%arg0: i32) -> (i32, i32, i32) {
    %c0_i32 = arith.constant 0 : i32
    %c0_i32_0 = arith.constant 0 : i32
    %c0_i32_1 = arith.constant 0 : i32
    return %arg0, %c0_i32, %c0_i32_0 : i32, i32, i32
  }
  func.func @transform_5(%arg0: i32) -> (i32, i32, i32) {
    %c0_i32 = arith.constant 0 : i32
    %c0_i32_0 = arith.constant 0 : i32
    %c0_i32_1 = arith.constant 0 : i32
    return %arg0, %c0_i32, %c0_i32_0 : i32, i32, i32
  }
  func.func @transform_6(%arg0: i32) -> (i32, i32, i32) {
    %c0_i32 = arith.constant 0 : i32
    %c0_i32_0 = arith.constant 0 : i32
    %c0_i32_1 = arith.constant 0 : i32
    return %arg0, %c0_i32, %c0_i32_0 : i32, i32, i32
  }
  func.func @transform_7(%arg0: i32) -> (i32, i32, i32) {
    %c0_i32 = arith.constant 0 : i32
    %c0_i32_0 = arith.constant 0 : i32
    %c0_i32_1 = arith.constant 0 : i32
    return %arg0, %c0_i32, %c0_i32_0 : i32, i32, i32
  }
  func.func @transform_8(%arg0: i32) -> (i32, i32) {
    %c0_i32 = arith.constant 0 : i32
    %c0_i32_0 = arith.constant 0 : i32
    %c0_i32_1 = arith.constant 0 : i32
    return %c0_i32, %c0_i32_0 : i32, i32
  }
  func.func @transform_9(%arg0: i32) -> (i32, i32) {
    %c0_i32 = arith.constant 0 : i32
    %c0_i32_0 = arith.constant 0 : i32
    %c0_i32_1 = arith.constant 0 : i32
    return %c0_i32, %c0_i32_0 : i32, i32
  }
  func.func @transform_10(%arg0: i32) -> (i32, i32) {
    %c0_i32 = arith.constant 0 : i32
    %c0_i32_0 = arith.constant 0 : i32
    %c0_i32_1 = arith.constant 0 : i32
    return %c0_i32, %c0_i32_0 : i32, i32
  }
  func.func @transform_11(%arg0: i32) -> (i32, i32) {
    %c0_i32 = arith.constant 0 : i32
    %c0_i32_0 = arith.constant 0 : i32
    %c0_i32_1 = arith.constant 0 : i32
    return %c0_i32, %c0_i32_0 : i32, i32
  }
  func.func @transform_12(%arg0: i32) -> (i32, i32) {
    %c0_i32 = arith.constant 0 : i32
    %c0_i32_0 = arith.constant 0 : i32
    %c0_i32_1 = arith.constant 0 : i32
    return %c0_i32, %c0_i32_0 : i32, i32
  }
  func.func @transform_13(%arg0: i32) -> (i32, i32) {
    %c0_i32 = arith.constant 0 : i32
    %c0_i32_0 = arith.constant 0 : i32
    %c0_i32_1 = arith.constant 0 : i32
    return %c0_i32, %c0_i32_0 : i32, i32
  }
  func.func @transform_14(%arg0: i32) -> (i32, i32) {
    %c0_i32 = arith.constant 0 : i32
    %c0_i32_0 = arith.constant 0 : i32
    %c0_i32_1 = arith.constant 0 : i32
    return %c0_i32, %c0_i32_0 : i32, i32
  }
  func.func @transform_15(%arg0: i32) -> (i32, i32) {
    %c0_i32 = arith.constant 0 : i32
    %c0_i32_0 = arith.constant 0 : i32
    %c0_i32_1 = arith.constant 0 : i32
    return %c0_i32, %c0_i32_0 : i32, i32
  }
  func.func @transform_16(%arg0: i32) -> (i32, i32) {
    %c0_i32 = arith.constant 0 : i32
    %c0_i32_0 = arith.constant 0 : i32
    %c0_i32_1 = arith.constant 0 : i32
    return %c0_i32, %c0_i32_0 : i32, i32
  }
  func.func @transform_17(%arg0: i32) -> (i32, i32) {
    %c0_i32 = arith.constant 0 : i32
    %c0_i32_0 = arith.constant 0 : i32
    %c0_i32_1 = arith.constant 0 : i32
    return %c0_i32, %c0_i32_0 : i32, i32
  }
  func.func @transform_18(%arg0: i32) -> (i32, i32) {
    %c0_i32 = arith.constant 0 : i32
    %c0_i32_0 = arith.constant 0 : i32
    %c0_i32_1 = arith.constant 0 : i32
    return %c0_i32, %c0_i32_0 : i32, i32
  }
  func.func @transform_19(%arg0: i32) -> (i32, i32) {
    %c0_i32 = arith.constant 0 : i32
    %c0_i32_0 = arith.constant 0 : i32
    %c0_i32_1 = arith.constant 0 : i32
    return %c0_i32, %c0_i32_0 : i32, i32
  }
  func.func @transform_20(%arg0: i32) -> (i32, i32) {
    %c0_i32 = arith.constant 0 : i32
    %c0_i32_0 = arith.constant 0 : i32
    %c0_i32_1 = arith.constant 0 : i32
    return %c0_i32, %c0_i32_0 : i32, i32
  }
  func.func @transform_21(%arg0: i32) -> (i32, i32) {
    %c0_i32 = arith.constant 0 : i32
    %c0_i32_0 = arith.constant 0 : i32
    %c0_i32_1 = arith.constant 0 : i32
    return %c0_i32, %c0_i32_0 : i32, i32
  }
  func.func @transform_22(%arg0: i32) -> (i32, i32) {
    %c0_i32 = arith.constant 0 : i32
    %c0_i32_0 = arith.constant 0 : i32
    %c0_i32_1 = arith.constant 0 : i32
    return %c0_i32, %c0_i32_0 : i32, i32
  }
  func.func @transform_23(%arg0: i32) -> (i32, i32) {
    %c0_i32 = arith.constant 0 : i32
    %c0_i32_0 = arith.constant 0 : i32
    %c0_i32_1 = arith.constant 0 : i32
    return %c0_i32, %c0_i32_0 : i32, i32
  }
  func.func @transform_24(%arg0: i32) -> (i32, i32) {
    %c0_i32 = arith.constant 0 : i32
    %c0_i32_0 = arith.constant 0 : i32
    %c0_i32_1 = arith.constant 0 : i32
    return %c0_i32, %c0_i32_0 : i32, i32
  }
  func.func @transform_25(%arg0: i32) -> (i32, i32) {
    %c0_i32 = arith.constant 0 : i32
    %c0_i32_0 = arith.constant 0 : i32
    %c0_i32_1 = arith.constant 0 : i32
    return %c0_i32, %c0_i32_0 : i32, i32
  }
  func.func @transform_26(%arg0: i32) -> (i32, i32) {
    %c0_i32 = arith.constant 0 : i32
    %c0_i32_0 = arith.constant 0 : i32
    %c0_i32_1 = arith.constant 0 : i32
    return %c0_i32, %c0_i32_0 : i32, i32
  }
  func.func @transform_27(%arg0: i32) -> (i32, i32) {
    %c0_i32 = arith.constant 0 : i32
    %c0_i32_0 = arith.constant 0 : i32
    %c0_i32_1 = arith.constant 0 : i32
    return %c0_i32, %c0_i32_0 : i32, i32
  }
  func.func @transform_28(%arg0: i32) -> (i32, i32) {
    %c0_i32 = arith.constant 0 : i32
    %c0_i32_0 = arith.constant 0 : i32
    %c0_i32_1 = arith.constant 0 : i32
    return %c0_i32, %c0_i32_0 : i32, i32
  }
  func.func @transform_29(%arg0: i32) -> (i32, i32) {
    %c0_i32 = arith.constant 0 : i32
    %c0_i32_0 = arith.constant 0 : i32
    %c0_i32_1 = arith.constant 0 : i32
    return %c0_i32, %c0_i32_0 : i32, i32
  }
  func.func @transform_30(%arg0: i32) -> (i32, i32) {
    %c0_i32 = arith.constant 0 : i32
    %c0_i32_0 = arith.constant 0 : i32
    %c0_i32_1 = arith.constant 0 : i32
    return %c0_i32, %c0_i32_0 : i32, i32
  }
  func.func @transform_31(%arg0: i32) -> (i32, i32) {
    %c0_i32 = arith.constant 0 : i32
    %c0_i32_0 = arith.constant 0 : i32
    %c0_i32_1 = arith.constant 0 : i32
    return %c0_i32, %c0_i32_0 : i32, i32
  }
  func.func @transform_32(%arg0: i32) -> (i32, i32) {
    %c0_i32 = arith.constant 0 : i32
    %c0_i32_0 = arith.constant 0 : i32
    return %arg0, %c0_i32 : i32, i32
  }
}

</mosaic_0001>

<bundles_post_ra>
// kernel: tpu_custom_call.1
= control target key start
LH: loop header
LB: loop body
LE: loop exit
PB: predicated region body
PF: predicated region fallthrough
CT: control target
= control target key end

     0   :  { %s8721_s3 = smov 8   ;;  %v8722_v0 = vmov 0.0|0.0   ;;  %s8723_s7 = smov 9   ;;  %vm8724_vm0 = vmmov 0   ;;  %v8725_v1 = vmov 0.0   ;;  %vm153_vm1 = vcmask 523264   ;;  %s9896_s0 = inlined_call_operand.smem [shape: u32[33], index: -1, kind: input, shape index: {}] }
   0x1   :  { %s8766_s6 = sld [smem:[%s9896_s0 + %s8721_s3]]   ;;  %7742 = vmatprep.subr.bf16.mxu1 %v8722_v0  ;;  %7184 = vmatprep.mubr.msk.f32.mxu1 %vm8724_vm0, %v8725_v1  ;;  %s8726_s14 = smov 10   ;;  %vm370_vm2 = vcmask 1041409   ;;  %vm239_vm3 = vcmask 261120   ;;  %vm1345_vm4 = vcmask 1040384   ;;  %vm1348_vm5 = vcmask 1041408  }
   0x2   :  { %s6616_s10 = sld [smem:[%s9896_s0 + %s8723_s7]]   ;;  %s8727_s18 = smov 32   ;;  %vm1351_vm6 = vcmask 1042432   ;;  %vm1354_vm7 = vcmask 1043456   ;;  %vm1357_vm8 = vcmask 1044480   ;;  %vm1360_vm9 = vcmask 1045504   ;;  %vm9342_vm11 = vmpackc.low %vm239_vm3, %vm239_vm3 }
   0x3   :  { %s8777_s13 = sld [smem:[%s9896_s0]]   ;;  %s8728_s19 = smov 64   ;;  %vm1363_vm10 = vcmask 1046528   ;;  %vm3227_vm13 = vcmask 130048  }
   0x4   :  { %s6617_s17 = sld [smem:[%s9896_s0 + %s8726_s14]]   ;;  %s8729_s20 = smov 2  }
   0x5   :  { %s8976_s23 = sld [smem:[%s9896_s0 + %s8729_s20]]   ;;  %s8730_s24 = smov 3  }
   0x6   :  { %s9011_s27 = sld [smem:[%s9896_s0 + %s8730_s24]]   ;;  %s8731_s28 = smov 12  }
   0x7   :  { %v138_v2 = vld [vmem:[%s8766_s6] sm:$0xff]  ;;  %v139_v3 = vld [vmem:[%s8766_s6 + $0x8] sm:$0xff]  ;;  %v140_v4 = vld [vmem:[%s8766_s6 + $0x10] sm:$0xff]  ;;  %s6619_s1 = sld [smem:[%s9896_s0 + %s8731_s28]]   ;;  %s8732_s2 = smov 11  }
   0x8   :  { %v7726_v5 = vpack.c.bf16 %v139_v3, %v138_v2  ;;  %v141_v6 = vld [vmem:[%s8766_s6 + $0x18] sm:$0xff]  ;;  %v142_v7 = vld [vmem:[%s8766_s6 + $0x20] sm:$0xff]  ;;  %v143_v9 = vld [vmem:[%s8766_s6 + $0x28] sm:$0xff]  ;;  %s9095_s5 = sld [smem:[%s9896_s0 + %s8732_s2]]   ;;  %s8735_s14 = smov 14  }
   0x9   :  { %v7730_v8 = vpack.c.bf16 %v141_v6, %v140_v4  ;;  %v235_v10 = vld [vmem:[%s6616_s10] sm:$0xff]  ;;  %v236_v11 = vld [vmem:[%s6616_s10 + $0x8] sm:$0xff]  ;;  %v237_v13 = vld [vmem:[%s6616_s10 + $0x10] sm:$0xff]  ;;  %v7734_v16 = vpack.c.bf16 %v143_v9, %v142_v7  ;;  %s8736_s20 = smov 15   ;;  %s8737_s24 = smov 17  }
   0xa   :  { %7727 = vmatprep.subr.bf16.mxu0 %v7726_v5  ;;  %v8785_v12 = vpack.c.bf16 %v236_v11, %v235_v10  ;;  %v238_v14 = vld [vmem:[%s6616_s10 + $0x18] sm:$0xff]  ;;  %v136_v15 = vld [vmem:[%s8777_s13] sm:$0xff]  ;;  %v144_v18 = vld [vmem:[%s8766_s6 + $0x30] sm:$0xff]  ;;  %s8734_s10 = smov 1   ;;  %s8738_s28 = smov 16  }
   0xb   :  { %7729 = vmatpush3.bf16.msra.mxu0 %v7726_v5  ;;  %v8789_v17 = vpack.c.bf16 %v238_v14, %v237_v13  ;;  %v145_v19 = vld [vmem:[%s8766_s6 + $0x38] sm:$0xff]  ;;  %7173 = vmatprep.mubr.msk.f32.mxu0 %vm153_vm1, %v136_v15  ;;  %v137_v21 = vld [vmem:[%s8777_s13 + $0x8] sm:$0xff]  ;;  %v6640_v24 = vld [vmem:[%s6617_s17] ss:$0 sm:$0xff]  ;;  %s8733_s6 = smov 13   ;;  %s6608_s13 = sld [smem:[%s9896_s0 + %s8734_s10]]  }
   0xc   :  { %7731 = vmatprep.subr.bf16.mxu0 %v7730_v8  ;;  %7744 = vmatpush3.bf16.msra.mxu1 %v8785_v12  ;;  %v7738_v20 = vpack.c.bf16 %v145_v19, %v144_v18  ;;  %s6620_s9 = sld [smem:[%s9896_s0 + %s8733_s6]]   ;;  %s8739_s2 = smov 4  }
   0xd   :  { %7745 = vmatprep.subr.bf16.mxu1 %v8722_v0  ;;  %s6621_s17 = sld [smem:[%s9896_s0 + %s8735_s14]]   ;;  %s8740_s6 = smov 18  }
   0xe   :  { %s8741_s10 = smov 20   ;;  %s8742_s14 = smov 5  }
   0xf   :  { %7733 = vmatpush3.bf16.msra.mxu0 %v7730_v8  ;;  %s6639_s21 = sld [smem:[%s9896_s0 + %s8727_s18]]  }
  0x10   :  { %7735 = vmatprep.subr.bf16.mxu0 %v7734_v16  ;;  %7747 = vmatpush3.bf16.msra.mxu1 %v8789_v17 }
  0x11   :  { %7748 = vmatprep.subr.bf16.mxu1 %v8722_v0 }
  0x13   :  { %7737 = vmatpush3.bf16.msra.mxu0 %v7734_v16  ;;  %7185 = vmatmul.mubr.f32.vlgmr.msra.gmra.mrb[0].mxu1 %v8725_v1 }
  0x14   :  { %7739 = vmatprep.subr.bf16.mxu0 %v7738_v20  ;;  %7750 = vmatpush3.bf16.msra.mxu1 %v8785_v12 }
  0x15   :  { %7751 = vmatprep.subr.bf16.mxu1 %v8722_v0  ;;  %7195 = vmatprep.mubr.msk.f32.mxu1 %vm8724_vm0, %v8725_v1 }
  0x17   :  { %7741 = vmatpush3.bf16.msra.mxu0 %v7738_v20 }
  0x18   :  { %7753 = vmatpush3.bf16.msra.mxu1 %v8789_v17  ;;  %7754 = vmatprep.subr.bf16.mxu0 %v8722_v0 }
  0x19   :  { %7760 = vmatprep.subr.bf16.mxu1 %v8722_v0 }
  0x1a   :  { %7174 = vmatmul.mubr.msk.f32.vlgmr.msra.gmra.mrb[0].mxu0 %vm153_vm1, %v137_v21 }
  0x1b   :  { %7756 = vmatpush3.bf16.msra.mxu0 %v8785_v12  ;;  %7206 = vmatprep.mubr.msk.f32.mxu0 %vm8724_vm0, %v8725_v1 }
  0x1c   :  { %7757 = vmatprep.subr.bf16.mxu0 %v8722_v0 }
  0x1f   :  { %7759 = vmatpush3.bf16.msra.mxu0 %v8789_v17 }
  0x20   :  { %7766 = vmatprep.subr.bf16.mxu0 %v8722_v0 }
  0xe6   :  { %v309_v22 = vpop.f32.mrb[0].mxu1 }
  0xe7   :  { %v7186_v23 = vpop.f32.mrb[1].mxu1  ;;  %v314_v25 = vrot.slane %v309_v22, 1 }
  0xed   :  { %v7175_v26 = vpop.f32.mrb[0].mxu0 }
  0xee   :  { %v8816_v27 = vadd.f32 %v7175_v26, %v6640_v24  ;;  %v226_v28 = vpop.f32.mrb[1].mxu0 }
  0xef   :  { %v8818_v29 = vadd.f32 %v6640_v24, %v226_v28 }
  0xf0   :  { %v318_v30 = vadd.f32 %v314_v25, %v8816_v27 }
  0xf1   :  { %v317_v31 = vadd.f32 %v309_v22, %v8818_v29 }
  0xf2   :  { %8183 = vtanh.f32 %v318_v30  ;;  %v6644_v34 = vmul.f32 -1.442695, %v318_v30 }
  0xf3   :  { %8185 = vtanh.f32 %v317_v31  ;;  %v6643_v35 = vmul.f32 -1.442695, %v317_v31 }
  0xf4   :  { %8187 = vpow2.f32 %v6644_v34 }
  0xf5   :  { %8189 = vpow2.f32 %v6643_v35 }
  0xfc   :  { %v8184_v32 = vpop.eup %8183 }
  0xfd   :  { %339 = vrot.lane.b32.xlu0 %v8184_v32, %s8727_s18  ;;  %v8186_v33 = vpop.eup %8185 }
  0xfe   :  { %v8188_v36 = vpop.eup %8187 }
  0xff   :  { %v326_v37 = vadd.f32 1.0, %v8188_v36  ;;  %v8190_v38 = vpop.eup %8189 }
 0x100   :  { %v325_v39 = vadd.f32 1.0, %v8190_v38 }
 0x101   :  { %337 = vrot.lane.b32.xlu0 %v8186_v33, %s8727_s18  ;;  %8191 = vrcp.f32 %v326_v37 }
 0x102   :  { %8193 = vrcp.f32 %v325_v39 }
 0x10b   :  { %v8192_v40 = vpop.eup %8191 }
 0x10c   :  { %v8194_v43 = vpop.eup %8193  ;;  %v334_v46 = vmul.f32 0.0, %v8192_v40 }
 0x10d   :  { %v333_v49 = vmul.f32 0.0, %v8194_v43 }
 0x16f   :  { %v340_v41 = vpop.permute.xlu0 %339 }
 0x170   :  { %v344_v42 = vmul.f32 %v8192_v40, %v340_v41 }
 0x172   :  { %349 = vrot.lane.b32.xlu1 %v344_v42, %s8727_s18 }
 0x173   :  { %v338_v44 = vpop.permute.xlu0 %337 }
 0x174   :  { %v343_v45 = vmul.f32 %v8194_v43, %v338_v44 }
 0x176   :  { %347 = vrot.lane.b32.xlu1 %v343_v45, %s8727_s18 }
 0x1e4   :  { %v350_v47 = vpop.permute.xlu1 %349 }
 0x1e5   :  { %v354_v48 = vadd.f32 %v350_v47, %v334_v46 }
 0x1e7   :  { %8195 = vtanh.f32 %v354_v48  ;;  %v469_v20 = vrot.slane %v354_v48, 7 }
 0x1e8   :  { %v348_v50 = vpop.permute.xlu1 %347 }
 0x1e9   :  { %v353_v51 = vadd.f32 %v348_v50, %v333_v49 }
 0x1eb   :  { %8197 = vtanh.f32 %v353_v51  ;;  %v468_v22 = vrot.slane %v353_v51, 7 }
 0x1f1   :  { %v8196_v52 = vpop.eup %8195 }
 0x1f2   :  { %361 = vrot.lane.b32.xlu0 %v8196_v52, %s8727_s18 }
 0x1f5   :  { %v8198_v53 = vpop.eup %8197 }
 0x1f6   :  { %359 = vrot.lane.b32.xlu1 %v8198_v53, %s8727_s18 }
 0x264   :  { %v362_v54 = vpop.permute.xlu0 %361 }
 0x265   :  { %v8828_v55 = vmul.f32 %v8192_v40, %v362_v54 }
 0x267   :  { %v369_v57 = vrot.slane %v8828_v55, 7 }
 0x268   :  { %v360_v56 = vpop.permute.xlu1 %359 }
 0x269   :  { %v8831_v58 = vmul.f32 %v8194_v43, %v360_v56 }
 0x26b   :  { %v371_v59 = vsel %vm370_vm2, %v369_v57, %v8831_v58 }
 0x26c   :  { %372 = vrot.lane.b32.xlu0 %v371_v59, %s8728_s19 }
 0x2de   :  { %v373_v60 = vpop.permute.xlu0 %372 }
 0x2df   :  { %7196 = vmatmul.mubr.msk.f32.vlgmr.msra.gmra.mrb[2].mxu1 %vm239_vm3, %v373_v60 }
 0x2e0   :  { %7762 = vmatpush3.bf16.msra.mxu1 %v8785_v12  ;;  %7217 = vmatprep.mubr.msk.f32.mxu1 %vm8724_vm0, %v8725_v1 }
 0x2e1   :  { %7763 = vmatprep.subr.bf16.mxu1 %v8722_v0 }
 0x2e4   :  { %7765 = vmatpush3.bf16.msra.mxu1 %v8789_v17 }
 0x2e5   :  { %7772 = vmatprep.subr.bf16.mxu1 %v8722_v0 }
 0x3b2   :  { %v442_v61 = vpop.f32.mrb[2].mxu1 }
 0x3b3   :  { %v447_v62 = vrot.slane %v442_v61, 7  ;;  %v451_v63 = vadd.f32 %v442_v61, %v8816_v27  ;;  %v7197_v2 = vpop.f32.mrb[3].mxu1 }
 0x3b5   :  { %v450_v3 = vadd.f32 %v447_v62, %v8818_v29  ;;  %8199 = vtanh.f32 %v451_v63  ;;  %v6647_v6 = vmul.f32 -1.442695, %v451_v63 }
 0x3b7   :  { %8201 = vtanh.f32 %v450_v3  ;;  %v6646_v7 = vmul.f32 -1.442695, %v450_v3 }
 0x3b8   :  { %8203 = vpow2.f32 %v6647_v6 }
 0x3b9   :  { %8205 = vpow2.f32 %v6646_v7 }
 0x3bf   :  { %v8200_v4 = vpop.eup %8199 }
 0x3c0   :  { %478 = vrot.lane.b32.xlu0 %v8200_v4, %s8727_s18 }
 0x3c1   :  { %v8202_v5 = vpop.eup %8201 }
 0x3c2   :  { %476 = vrot.lane.b32.xlu1 %v8202_v5, %s8727_s18  ;;  %v8204_v8 = vpop.eup %8203 }
 0x3c3   :  { %v8206_v9 = vpop.eup %8205  ;;  %v459_v10 = vadd.f32 1.0, %v8204_v8 }
 0x3c4   :  { %v458_v11 = vadd.f32 1.0, %v8206_v9 }
 0x3c5   :  { %8207 = vrcp.f32 %v459_v10 }
 0x3c6   :  { %8209 = vrcp.f32 %v458_v11 }
 0x3cf   :  { %v8208_v13 = vpop.eup %8207 }
 0x3d0   :  { %v8210_v16 = vpop.eup %8209  ;;  %v473_v21 = vmul.f32 %v8208_v13, %v469_v20 }
 0x3d1   :  { %v472_v25 = vmul.f32 %v8210_v16, %v468_v22 }
 0x432   :  { %v479_v14 = vpop.permute.xlu0 %478 }
 0x433   :  { %v483_v15 = vmul.f32 %v8208_v13, %v479_v14 }
 0x434   :  { %v477_v18 = vpop.permute.xlu1 %476 }
 0x435   :  { %488 = vrot.lane.b32.xlu0 %v483_v15, %s8727_s18  ;;  %v482_v19 = vmul.f32 %v8210_v16, %v477_v18 }
 0x437   :  { %486 = vrot.lane.b32.xlu1 %v482_v19, %s8727_s18 }
 0x4a7   :  { %v489_v23 = vpop.permute.xlu0 %488 }
 0x4a8   :  { %v493_v24 = vadd.f32 %v489_v23, %v473_v21 }
 0x4a9   :  { %v487_v26 = vpop.permute.xlu1 %486 }
 0x4aa   :  { %8211 = vtanh.f32 %v493_v24  ;;  %v492_v28 = vadd.f32 %v487_v26, %v472_v25  ;;  %v608_v62 = vrot.slane %v493_v24, 7 }
 0x4ac   :  { %8213 = vtanh.f32 %v492_v28  ;;  %v607_v61 = vrot.slane %v492_v28, 7 }
 0x4b4   :  { %v8212_v30 = vpop.eup %8211 }
 0x4b5   :  { %500 = vrot.lane.b32.xlu0 %v8212_v30, %s8727_s18 }
 0x4b6   :  { %v8214_v31 = vpop.eup %8213 }
 0x4b7   :  { %498 = vrot.lane.b32.xlu1 %v8214_v31, %s8727_s18 }
 0x527   :  { %v501_v32 = vpop.permute.xlu0 %500 }
 0x528   :  { %v8851_v35 = vmul.f32 %v8208_v13, %v501_v32 }
 0x529   :  { %v499_v33 = vpop.permute.xlu1 %498 }
 0x52a   :  { %v504_v34 = vmul.f32 %v8210_v16, %v499_v33  ;;  %v1347_v15 = vsel %vm1345_vm4, %v8828_v55, %v8851_v35 }
 0x52c   :  { %v508_v36 = vrot.slane %v504_v34, 1  ;;  %v1346_v13 = vsel %vm1345_vm4, %v8831_v58, %v504_v34 }
 0x52e   :  { %v509_v37 = vsel %vm370_vm2, %v8851_v35, %v508_v36 }
 0x52f   :  { %510 = vrot.lane.b32.xlu1 %v509_v37, %s8728_s19 }
 0x5a1   :  { %v511_v38 = vpop.permute.xlu1 %510 }
 0x5a2   :  { %7207 = vmatmul.mubr.msk.f32.vlgmr.msra.gmra.mrb[2].mxu0 %vm239_vm3, %v511_v38 }
 0x5a3   :  { %7768 = vmatpush3.bf16.msra.mxu0 %v8785_v12  ;;  %7228 = vmatprep.mubr.msk.f32.mxu0 %vm8724_vm0, %v8725_v1 }
 0x5a4   :  { %7769 = vmatprep.subr.bf16.mxu0 %v8722_v0 }
 0x5a7   :  { %7771 = vmatpush3.bf16.msra.mxu0 %v8789_v17 }
 0x5a8   :  { %7778 = vmatprep.subr.bf16.mxu0 %v8722_v0 }
 0x675   :  { %v580_v39 = vpop.f32.mrb[2].mxu0 }
 0x676   :  { %v585_v40 = vrot.slane %v580_v39, 6  ;;  %v586_v41 = vrot.slane %v580_v39, 7  ;;  %v7208_v42 = vpop.f32.mrb[3].mxu0 }
 0x678   :  { %v589_v43 = vadd.f32 %v585_v40, %v8818_v29  ;;  %v590_v44 = vadd.f32 %v586_v41, %v8816_v27 }
 0x67a   :  { %8215 = vtanh.f32 %v589_v43  ;;  %v6649_v47 = vmul.f32 -1.442695, %v589_v43  ;;  %v6650_v48 = vmul.f32 -1.442695, %v590_v44 }
 0x67b   :  { %8217 = vtanh.f32 %v590_v44 }
 0x67c   :  { %8219 = vpow2.f32 %v6649_v47 }
 0x67d   :  { %8221 = vpow2.f32 %v6650_v48 }
 0x684   :  { %v8216_v45 = vpop.eup %8215 }
 0x685   :  { %v8218_v46 = vpop.eup %8217  ;;  %615 = vrot.lane.b32.xlu0 %v8216_v45, %s8727_s18 }
 0x686   :  { %617 = vrot.lane.b32.xlu1 %v8218_v46, %s8727_s18  ;;  %v8220_v49 = vpop.eup %8219 }
 0x687   :  { %v8222_v50 = vpop.eup %8221  ;;  %v597_v51 = vadd.f32 1.0, %v8220_v49 }
 0x688   :  { %v598_v52 = vadd.f32 1.0, %v8222_v50 }
 0x689   :  { %8223 = vrcp.f32 %v597_v51 }
 0x68a   :  { %8225 = vrcp.f32 %v598_v52 }
 0x693   :  { %v8224_v53 = vpop.eup %8223 }
 0x694   :  { %v8226_v56 = vpop.eup %8225  ;;  %v611_v63 = vmul.f32 %v8224_v53, %v607_v61 }
 0x695   :  { %v612_v2 = vmul.f32 %v8226_v56, %v608_v62 }
 0x6f7   :  { %v616_v54 = vpop.permute.xlu0 %615 }
 0x6f8   :  { %v618_v57 = vpop.permute.xlu1 %617  ;;  %v621_v59 = vmul.f32 %v8224_v53, %v616_v54 }
 0x6f9   :  { %v622_v60 = vmul.f32 %v8226_v56, %v618_v57 }
 0x6fa   :  { %625 = vrot.lane.b32.xlu0 %v621_v59, %s8727_s18 }
 0x6fb   :  { %627 = vrot.lane.b32.xlu1 %v622_v60, %s8727_s18 }
 0x76c   :  { %v626_v3 = vpop.permute.xlu0 %625 }
 0x76d   :  { %v628_v4 = vpop.permute.xlu1 %627  ;;  %v631_v5 = vadd.f32 %v626_v3, %v611_v63 }
 0x76e   :  { %v632_v6 = vadd.f32 %v628_v4, %v612_v2 }
 0x76f   :  { %8227 = vtanh.f32 %v631_v5  ;;  %v747_v43 = vrot.slane %v631_v5, 7 }
 0x770   :  { %8229 = vtanh.f32 %v632_v6  ;;  %v748_v44 = vrot.slane %v632_v6, 7 }
 0x779   :  { %v8228_v7 = vpop.eup %8227 }
 0x77a   :  { %v8230_v8 = vpop.eup %8229  ;;  %637 = vrot.lane.b32.xlu0 %v8228_v7, %s8727_s18 }
 0x77b   :  { %639 = vrot.lane.b32.xlu1 %v8230_v8, %s8727_s18 }
 0x7ec   :  { %v638_v9 = vpop.permute.xlu0 %637 }
 0x7ed   :  { %v640_v10 = vpop.permute.xlu1 %639  ;;  %v643_v11 = vmul.f32 %v8224_v53, %v638_v9 }
 0x7ee   :  { %v644_v14 = vmul.f32 %v8226_v56, %v640_v10 }
 0x7ef   :  { %v647_v16 = vrot.slane %v643_v11, 2  ;;  %v8877_v18 = vsel %vm1348_vm5, %v1346_v13, %v643_v11 }
 0x7f0   :  { %v648_v19 = vrot.slane %v644_v14, 1  ;;  %v8880_v20 = vsel %vm1348_vm5, %v1347_v15, %v644_v14 }
 0x7f2   :  { %v649_v21 = vsel %vm370_vm2, %v648_v19, %v647_v16 }
 0x7f3   :  { %650 = vrot.lane.b32.xlu0 %v649_v21, %s8728_s19 }
 0x865   :  { %v651_v22 = vpop.permute.xlu0 %650 }
 0x866   :  { %7218 = vmatmul.mubr.msk.f32.vlgmr.msra.gmra.mrb[4].mxu1 %vm239_vm3, %v651_v22 }
 0x867   :  { %7774 = vmatpush3.bf16.msra.mxu1 %v8785_v12  ;;  %7239 = vmatprep.mubr.msk.f32.mxu1 %vm8724_vm0, %v8725_v1 }
 0x868   :  { %7775 = vmatprep.subr.bf16.mxu1 %v8722_v0 }
 0x86b   :  { %7777 = vmatpush3.bf16.msra.mxu1 %v8789_v17 }
 0x86c   :  { %7784 = vmatprep.subr.bf16.mxu1 %v8722_v0 }
 0x939   :  { %v720_v55 = vpop.f32.mrb[4].mxu1 }
 0x93a   :  { %v725_v58 = vrot.slane %v720_v55, 5  ;;  %v726_v23 = vrot.slane %v720_v55, 6  ;;  %v7219_v24 = vpop.f32.mrb[5].mxu1 }
 0x93c   :  { %v729_v25 = vadd.f32 %v725_v58, %v8818_v29  ;;  %v730_v26 = vadd.f32 %v726_v23, %v8816_v27 }
 0x93e   :  { %8231 = vtanh.f32 %v729_v25  ;;  %v6652_v31 = vmul.f32 -1.442695, %v729_v25  ;;  %v6653_v32 = vmul.f32 -1.442695, %v730_v26 }
 0x93f   :  { %8233 = vtanh.f32 %v730_v26 }
 0x940   :  { %8235 = vpow2.f32 %v6652_v31 }
 0x941   :  { %8237 = vpow2.f32 %v6653_v32 }
 0x948   :  { %v8232_v28 = vpop.eup %8231 }
 0x949   :  { %v8234_v30 = vpop.eup %8233  ;;  %755 = vrot.lane.b32.xlu1 %v8232_v28, %s8727_s18 }
 0x94a   :  { %757 = vrot.lane.b32.xlu0 %v8234_v30, %s8727_s18  ;;  %v8236_v33 = vpop.eup %8235 }
 0x94b   :  { %v8238_v34 = vpop.eup %8237  ;;  %v737_v35 = vadd.f32 1.0, %v8236_v33 }
 0x94c   :  { %v738_v36 = vadd.f32 1.0, %v8238_v34 }
 0x94d   :  { %8239 = vrcp.f32 %v737_v35 }
 0x94e   :  { %8241 = vrcp.f32 %v738_v36 }
 0x957   :  { %v8240_v37 = vpop.eup %8239 }
 0x958   :  { %v8242_v39 = vpop.eup %8241  ;;  %v751_v45 = vmul.f32 %v8240_v37, %v747_v43 }
 0x959   :  { %v752_v46 = vmul.f32 %v8242_v39, %v748_v44 }
 0x9bb   :  { %v756_v38 = vpop.permute.xlu1 %755 }
 0x9bc   :  { %v758_v40 = vpop.permute.xlu0 %757  ;;  %v761_v41 = vmul.f32 %v8240_v37, %v756_v38 }
 0x9bd   :  { %v762_v42 = vmul.f32 %v8242_v39, %v758_v40 }
 0x9be   :  { %765 = vrot.lane.b32.xlu1 %v761_v41, %s8727_s18 }
 0x9bf   :  { %767 = vrot.lane.b32.xlu0 %v762_v42, %s8727_s18 }
 0xa30   :  { %v766_v47 = vpop.permute.xlu1 %765 }
 0xa31   :  { %v768_v48 = vpop.permute.xlu0 %767  ;;  %v771_v49 = vadd.f32 %v766_v47, %v751_v45 }
 0xa32   :  { %v772_v50 = vadd.f32 %v768_v48, %v752_v46 }
 0xa33   :  { %8243 = vtanh.f32 %v771_v49  ;;  %v887_v23 = vrot.slane %v771_v49, 7 }
 0xa34   :  { %8245 = vtanh.f32 %v772_v50  ;;  %v888_v24 = vrot.slane %v772_v50, 7 }
 0xa3d   :  { %v8244_v51 = vpop.eup %8243 }
 0xa3e   :  { %v8246_v52 = vpop.eup %8245  ;;  %777 = vrot.lane.b32.xlu1 %v8244_v51, %s8727_s18 }
 0xa3f   :  { %779 = vrot.lane.b32.xlu0 %v8246_v52, %s8727_s18 }
 0xab0   :  { %v778_v53 = vpop.permute.xlu1 %777 }
 0xab1   :  { %v780_v54 = vpop.permute.xlu0 %779  ;;  %v783_v56 = vmul.f32 %v8240_v37, %v778_v53 }
 0xab2   :  { %v784_v57 = vmul.f32 %v8242_v39, %v780_v54 }
 0xab3   :  { %v787_v59 = vrot.slane %v783_v56, 3  ;;  %v1352_v60 = vsel %vm1351_vm6, %v8877_v18, %v783_v56 }
 0xab4   :  { %v788_v61 = vrot.slane %v784_v57, 2  ;;  %v1353_v62 = vsel %vm1351_vm6, %v8880_v20, %v784_v57 }
 0xab6   :  { %v789_v63 = vsel %vm370_vm2, %v788_v61, %v787_v59 }
 0xab7   :  { %790 = vrot.lane.b32.xlu1 %v789_v63, %s8728_s19 }
 0xb29   :  { %v791_v2 = vpop.permute.xlu1 %790 }
 0xb2a   :  { %7229 = vmatmul.mubr.msk.f32.vlgmr.msra.gmra.mrb[4].mxu0 %vm239_vm3, %v791_v2 }
 0xb2b   :  { %7780 = vmatpush3.bf16.msra.mxu0 %v8785_v12  ;;  %7250 = vmatprep.mubr.msk.f32.mxu0 %vm8724_vm0, %v8725_v1 }
 0xb2c   :  { %7781 = vmatprep.subr.bf16.mxu0 %v8722_v0 }
 0xb2f   :  { %7783 = vmatpush3.bf16.msra.mxu0 %v8789_v17 }
 0xbfd   :  { %v860_v3 = vpop.f32.mrb[4].mxu0 }
 0xbfe   :  { %v865_v4 = vrot.slane %v860_v3, 4  ;;  %v866_v5 = vrot.slane %v860_v3, 5  ;;  %v7230_v6 = vpop.f32.mrb[5].mxu0 }
 0xc00   :  { %v869_v7 = vadd.f32 %v865_v4, %v8818_v29  ;;  %v870_v8 = vadd.f32 %v866_v5, %v8816_v27 }
 0xc02   :  { %8247 = vtanh.f32 %v869_v7  ;;  %v6655_v11 = vmul.f32 -1.442695, %v869_v7  ;;  %v6656_v13 = vmul.f32 -1.442695, %v870_v8 }
 0xc03   :  { %8249 = vtanh.f32 %v870_v8 }
 0xc04   :  { %8251 = vpow2.f32 %v6655_v11 }
 0xc05   :  { %8253 = vpow2.f32 %v6656_v13 }
 0xc0c   :  { %v8248_v9 = vpop.eup %8247 }
 0xc0d   :  { %v8250_v10 = vpop.eup %8249  ;;  %895 = vrot.lane.b32.xlu0 %v8248_v9, %s8727_s18 }
 0xc0e   :  { %897 = vrot.lane.b32.xlu1 %v8250_v10, %s8727_s18  ;;  %v8252_v14 = vpop.eup %8251 }
 0xc0f   :  { %v8254_v15 = vpop.eup %8253  ;;  %v877_v16 = vadd.f32 1.0, %v8252_v14 }
 0xc10   :  { %v878_v18 = vadd.f32 1.0, %v8254_v15 }
 0xc11   :  { %8255 = vrcp.f32 %v877_v16 }
 0xc12   :  { %8257 = vrcp.f32 %v878_v18 }
 0xc1b   :  { %v8256_v19 = vpop.eup %8255 }
 0xc1c   :  { %v8258_v21 = vpop.eup %8257  ;;  %v891_v25 = vmul.f32 %v8256_v19, %v887_v23 }
 0xc1d   :  { %v892_v26 = vmul.f32 %v8258_v21, %v888_v24 }
 0xc7f   :  { %v896_v20 = vpop.permute.xlu0 %895 }
 0xc80   :  { %v898_v22 = vpop.permute.xlu1 %897  ;;  %v901_v55 = vmul.f32 %v8256_v19, %v896_v20 }
 0xc81   :  { %v902_v58 = vmul.f32 %v8258_v21, %v898_v22 }
 0xc82   :  { %905 = vrot.lane.b32.xlu0 %v901_v55, %s8727_s18 }
 0xc83   :  { %907 = vrot.lane.b32.xlu1 %v902_v58, %s8727_s18 }
 0xcf4   :  { %v906_v28 = vpop.permute.xlu0 %905 }
 0xcf5   :  { %v908_v30 = vpop.permute.xlu1 %907  ;;  %v911_v31 = vadd.f32 %v906_v28, %v891_v25 }
 0xcf6   :  { %v912_v32 = vadd.f32 %v908_v30, %v892_v26 }
 0xcf7   :  { %8259 = vtanh.f32 %v911_v31  ;;  %v1027_v3 = vrot.slane %v911_v31, 7 }
 0xcf8   :  { %8261 = vtanh.f32 %v912_v32  ;;  %v1028_v4 = vrot.slane %v912_v32, 7 }
 0xd01   :  { %v8260_v33 = vpop.eup %8259 }
 0xd02   :  { %v8262_v34 = vpop.eup %8261  ;;  %917 = vrot.lane.b32.xlu0 %v8260_v33, %s8727_s18 }
 0xd03   :  { %919 = vrot.lane.b32.xlu1 %v8262_v34, %s8727_s18 }
 0xd74   :  { %v918_v35 = vpop.permute.xlu0 %917 }
 0xd75   :  { %v920_v36 = vpop.permute.xlu1 %919  ;;  %v923_v37 = vmul.f32 %v8256_v19, %v918_v35 }
 0xd76   :  { %v924_v38 = vmul.f32 %v8258_v21, %v920_v36 }
 0xd77   :  { %v927_v39 = vrot.slane %v923_v37, 4  ;;  %v8920_v40 = vsel %vm1354_vm7, %v1352_v60, %v923_v37 }
 0xd78   :  { %v928_v41 = vrot.slane %v924_v38, 3  ;;  %v8923_v42 = vsel %vm1354_vm7, %v1353_v62, %v924_v38 }
 0xd7a   :  { %v929_v43 = vsel %vm370_vm2, %v928_v41, %v927_v39 }
 0xd7b   :  { %930 = vrot.lane.b32.xlu0 %v929_v43, %s8728_s19 }
 0xded   :  { %v931_v44 = vpop.permute.xlu0 %930 }
 0xdee   :  { %7240 = vmatmul.mubr.msk.f32.vlgmr.msra.gmra.mrb[6].mxu1 %vm239_vm3, %v931_v44 }
 0xdef   :  { %7786 = vmatpush3.bf16.msra.mxu1 %v8785_v12  ;;  %7261 = vmatprep.mubr.msk.f32.mxu1 %vm8724_vm0, %v8725_v1 }
 0xdf0   :  { %7787 = vmatprep.subr.bf16.mxu1 %v8722_v0 }
 0xdf3   :  { %7789 = vmatpush3.bf16.msra.mxu1 %v8789_v17 }
 0xdf4   :  { %7822 = vmatprep.subr.bf16.mxu1 %v8722_v0 }
 0xec1   :  { %v1000_v45 = vpop.f32.mrb[6].mxu1 }
 0xec2   :  { %v1005_v46 = vrot.slane %v1000_v45, 3  ;;  %v1006_v47 = vrot.slane %v1000_v45, 4  ;;  %v7241_v48 = vpop.f32.mrb[7].mxu1 }
 0xec4   :  { %v1009_v49 = vadd.f32 %v1005_v46, %v8818_v29  ;;  %v1010_v50 = vadd.f32 %v1006_v47, %v8816_v27 }
 0xec6   :  { %8263 = vtanh.f32 %v1009_v49  ;;  %v6658_v52 = vmul.f32 -1.442695, %v1009_v49  ;;  %v6659_v17 = vmul.f32 -1.442695, %v1010_v50 }
 0xec7   :  { %8265 = vtanh.f32 %v1010_v50 }
 0xec8   :  { %8267 = vpow2.f32 %v6658_v52 }
 0xec9   :  { %8269 = vpow2.f32 %v6659_v17 }
 0xed0   :  { %v8264_v12 = vpop.eup %8263 }
 0xed1   :  { %v8266_v51 = vpop.eup %8265  ;;  %1035 = vrot.lane.b32.xlu1 %v8264_v12, %s8727_s18 }
 0xed2   :  { %1037 = vrot.lane.b32.xlu0 %v8266_v51, %s8727_s18  ;;  %v8268_v53 = vpop.eup %8267 }
 0xed3   :  { %v8270_v54 = vpop.eup %8269  ;;  %v1017_v56 = vadd.f32 1.0, %v8268_v53  ;;  %v1385_v53 = vld [vmem:[%s8976_s23 + $0x80] sm:$0xff] }
 0xed4   :  { %v1018_v57 = vadd.f32 1.0, %v8270_v54  ;;  %v1386_v54 = vld [vmem:[%s8976_s23 + $0x88] sm:$0xff] }
 0xed5   :  { %8271 = vrcp.f32 %v1017_v56  ;;  %v1369_v56 = vld [vmem:[%s8976_s23] sm:$0xff] }
 0xed6   :  { %8273 = vrcp.f32 %v1018_v57  ;;  %v7790_v57 = vpack.c.bf16 %v1386_v54, %v1385_v53 }
 0xed8   :  { %7791 = vmatprep.subr.bf16.mxu0 %v7790_v57 }
 0xedf   :  { %v8272_v59 = vpop.eup %8271 }
 0xee0   :  { %v8274_v61 = vpop.eup %8273  ;;  %v1031_v5 = vmul.f32 %v8272_v59, %v1027_v3  ;;  %v1372_v3 = vld [vmem:[%s8976_s23 + $0x18] sm:$0xff] }
 0xee1   :  { %v1032_v6 = vmul.f32 %v8274_v61, %v1028_v4  ;;  %v1389_v4 = vld [vmem:[%s8976_s23 + $0xa0] sm:$0xff] }
 0xf43   :  { %v1036_v60 = vpop.permute.xlu1 %1035 }
 0xf44   :  { %v1038_v62 = vpop.permute.xlu0 %1037  ;;  %v1041_v63 = vmul.f32 %v8272_v59, %v1036_v60  ;;  %v1387_v60 = vld [vmem:[%s8976_s23 + $0x90] sm:$0xff] }
 0xf45   :  { %v1042_v2 = vmul.f32 %v8274_v61, %v1038_v62 }
 0xf46   :  { %1045 = vrot.lane.b32.xlu1 %v1041_v63, %s8727_s18 }
 0xf47   :  { %1047 = vrot.lane.b32.xlu0 %v1042_v2, %s8727_s18  ;;  %v1371_v2 = vld [vmem:[%s8976_s23 + $0x10] sm:$0xff] }
 0xfb8   :  { %v1046_v7 = vpop.permute.xlu1 %1045 }
 0xfb9   :  { %v1048_v8 = vpop.permute.xlu0 %1047  ;;  %v1051_v9 = vadd.f32 %v1046_v7, %v1031_v5  ;;  %v1390_v5 = vld [vmem:[%s8976_s23 + $0xa8] sm:$0xff] }
 0xfba   :  { %v1052_v10 = vadd.f32 %v1048_v8, %v1032_v6  ;;  %v7796_v6 = vpack.c.bf16 %v1372_v3, %v1371_v2  ;;  %v7798_v7 = vpack.c.bf16 %v1390_v5, %v1389_v4  ;;  %v1373_v8 = vld [vmem:[%s8976_s23 + $0x20] sm:$0xff]  ;;  %v1402_v2 = vld [vmem:[%s8976_s23 + $0x108] sm:$0xff]  ;;  %v1403_v4 = vld [vmem:[%s8976_s23 + $0x110] sm:$0xff] }
 0xfbb   :  { %8275 = vtanh.f32 %v1051_v9  ;;  %v1167_v45 = vrot.slane %v1051_v9, 7  ;;  %v1374_v9 = vld [vmem:[%s8976_s23 + $0x28] sm:$0xff]  ;;  %v1404_v5 = vld [vmem:[%s8976_s23 + $0x118] sm:$0xff] }
 0xfbc   :  { %8277 = vtanh.f32 %v1052_v10  ;;  %v1168_v46 = vrot.slane %v1052_v10, 7  ;;  %v1391_v10 = vld [vmem:[%s8976_s23 + $0xb0] sm:$0xff] }
 0xfc5   :  { %v8276_v11 = vpop.eup %8275 }
 0xfc6   :  { %v8278_v13 = vpop.eup %8277  ;;  %1057 = vrot.lane.b32.xlu1 %v8276_v11, %s8727_s18  ;;  %v1392_v11 = vld [vmem:[%s8976_s23 + $0xb8] sm:$0xff] }
 0xfc7   :  { %1059 = vrot.lane.b32.xlu0 %v8278_v13, %s8727_s18  ;;  %v7800_v13 = vpack.c.bf16 %v1374_v9, %v1373_v8  ;;  %v6684_v8 = vld [vmem:[%s8976_s23 + $0x1a8] sm:$0xff]  ;;  %v7826_v9 = vpack.c.bf16 %v1404_v5, %v1403_v4  ;;  %v1735_v4 = vld [vmem:[%s6619_s1] sm:$0xff] }
 0xfc8   :  { %v1736_v5 = vld [vmem:[%s6619_s1 + $0x8] sm:$0xff] }
0x1038   :  { %v1058_v14 = vpop.permute.xlu1 %1057 }
0x1039   :  { %v1060_v15 = vpop.permute.xlu0 %1059  ;;  %v1063_v16 = vmul.f32 %v8272_v59, %v1058_v14  ;;  %v1370_v59 = vld [vmem:[%s8976_s23 + $0x8] sm:$0xff]  ;;  %v7802_v14 = vpack.c.bf16 %v1392_v11, %v1391_v10  ;;  %v6667_v11 = vld [vmem:[%s8976_s23 + $0x120] sm:$0xff] }
0x103a   :  { %v1064_v18 = vmul.f32 %v8274_v61, %v1060_v15  ;;  %v1388_v61 = vld [vmem:[%s8976_s23 + $0x98] sm:$0xff]  ;;  %v7792_v62 = vpack.c.bf16 %v1370_v59, %v1369_v56  ;;  %v1375_v15 = vld [vmem:[%s8976_s23 + $0x30] sm:$0xff]  ;;  %v6700_v59 = vld [vmem:[%s8976_s23 + $0x228] sm:$0xff] }
0x103b   :  { %v1067_v19 = vrot.slane %v1063_v16, 5  ;;  %v8944_v20 = vsel %vm1357_vm8, %v8920_v40, %v1063_v16  ;;  %v7794_v63 = vpack.c.bf16 %v1388_v61, %v1387_v60  ;;  %v1376_v16 = vld [vmem:[%s8976_s23 + $0x38] sm:$0xff] }
0x103c   :  { %v1068_v21 = vrot.slane %v1064_v18, 4  ;;  %v8948_v22 = vsel %vm1357_vm8, %v8923_v42, %v1064_v18  ;;  %v1393_v18 = vld [vmem:[%s8976_s23 + $0xc0] sm:$0xff]  ;;  %v6702_v61 = vld [vmem:[%s8976_s23 + $0x238] sm:$0xff] }
0x103e   :  { %v1069_v55 = vsel %vm370_vm2, %v1068_v21, %v1067_v19  ;;  %v1394_v19 = vld [vmem:[%s8976_s23 + $0xc8] sm:$0xff]  ;;  %v7804_v21 = vpack.c.bf16 %v1376_v16, %v1375_v15  ;;  %v6686_v15 = vld [vmem:[%s8976_s23 + $0x1b8] sm:$0xff] }
0x103f   :  { %1070 = vrot.lane.b32.xlu1 %v1069_v55, %s8728_s19  ;;  %v7806_v55 = vpack.c.bf16 %v1394_v19, %v1393_v18  ;;  %v6669_v19 = vld [vmem:[%s8976_s23 + $0x130] sm:$0xff] }
0x10b1   :  { %v1071_v58 = vpop.permute.xlu1 %1070 }
0x10b2   :  { %7251 = vmatmul.mubr.msk.f32.vlgmr.msra.gmra.mrb[6].mxu0 %vm239_vm3, %v1071_v58  ;;  %v1377_v58 = vld [vmem:[%s8976_s23 + $0x40] sm:$0xff] }
0x10b3   :  { %7793 = vmatpush3.bf16.msra.mxu0 %v7792_v62 }
0x10b4   :  { %7795 = vmatprep.subr.bf16.mxu0 %v7794_v63  ;;  %v1401_v63 = vld [vmem:[%s8976_s23 + $0x100] sm:$0xff] }
0x10b5   :  { %v7823_v3 = vpack.c.bf16 %v1402_v2, %v1401_v63 }
0x10b7   :  { %7797 = vmatpush3.bf16.msra.mxu0 %v7796_v6 }
0x10b8   :  { %7799 = vmatprep.subr.bf16.mxu0 %v7798_v7  ;;  %v6683_v7 = vld [vmem:[%s8976_s23 + $0x1a0] sm:$0xff] }
0x10b9   :  { %v7828_v10 = vpack.c.bf16 %v6684_v8, %v6683_v7  ;;  %v7866_v7 = vpack.c.bf16 %v1736_v5, %v1735_v4  ;;  %v1738_v8 = vld [vmem:[%s6619_s1 + $0x18] sm:$0xff] }
0x10bb   :  { %7801 = vmatpush3.bf16.msra.mxu0 %v7800_v13  ;;  %v6668_v13 = vld [vmem:[%s8976_s23 + $0x128] sm:$0xff] }
0x10bc   :  { %7803 = vmatprep.subr.bf16.mxu0 %v7802_v14  ;;  %v6685_v14 = vld [vmem:[%s8976_s23 + $0x1b0] sm:$0xff]  ;;  %v7830_v16 = vpack.c.bf16 %v6668_v13, %v6667_v11  ;;  %v1740_v11 = vld [vmem:[%s6619_s1 + $0x28] sm:$0xff] }
0x10bd   :  { %v7832_v18 = vpack.c.bf16 %v6686_v15, %v6685_v14  ;;  %v1741_v13 = vld [vmem:[%s6619_s1 + $0x30] sm:$0xff]  ;;  %v1742_v14 = vld [vmem:[%s6619_s1 + $0x38] sm:$0xff] }
0x10be   :  { %v7878_v15 = vpack.c.bf16 %v1742_v14, %v1741_v13 }
0x10bf   :  { %7805 = vmatpush3.bf16.msra.mxu0 %v7804_v21  ;;  %v6670_v21 = vld [vmem:[%s8976_s23 + $0x138] sm:$0xff] }
0x10c0   :  { %7807 = vmatprep.subr.bf16.mxu0 %v7806_v55  ;;  %v6687_v55 = vld [vmem:[%s8976_s23 + $0x1c0] sm:$0xff] }
0x1185   :  { %v1140_v23 = vpop.f32.mrb[6].mxu0 }
0x1186   :  { %v1145_v24 = vrot.slane %v1140_v23, 2  ;;  %v1146_v25 = vrot.slane %v1140_v23, 3  ;;  %v7252_v26 = vpop.f32.mrb[7].mxu0  ;;  %v1378_v23 = vld [vmem:[%s8976_s23 + $0x48] sm:$0xff] }
0x1187   :  { %v7808_v26 = vpack.c.bf16 %v1378_v23, %v1377_v58  ;;  %v6688_v58 = vld [vmem:[%s8976_s23 + $0x1c8] sm:$0xff]  ;;  %v7834_v23 = vpack.c.bf16 %v6670_v21, %v6669_v19 }
0x1188   :  { %v1149_v28 = vadd.f32 %v1145_v24, %v8818_v29  ;;  %v1150_v30 = vadd.f32 %v1146_v25, %v8816_v27  ;;  %v1395_v24 = vld [vmem:[%s8976_s23 + $0xd0] sm:$0xff]  ;;  %v1396_v25 = vld [vmem:[%s8976_s23 + $0xd8] sm:$0xff]  ;;  %v1728_v19 = vld [vmem:[%s9095_s5 + $0x8] sm:$0xff] }
0x1189   :  { %7809 = vmatpush3.bf16.msra.mxu0 %v7808_v26  ;;  %v6672_v26 = vld [vmem:[%s8976_s23 + $0x148] sm:$0xff] }
0x118a   :  { %8279 = vtanh.f32 %v1149_v28  ;;  %v6661_v33 = vmul.f32 -1.442695, %v1149_v28  ;;  %v6662_v34 = vmul.f32 -1.442695, %v1150_v30  ;;  %v7810_v28 = vpack.c.bf16 %v1396_v25, %v1395_v24  ;;  %v6671_v25 = vld [vmem:[%s8976_s23 + $0x140] sm:$0xff] }
0x118b   :  { %8281 = vtanh.f32 %v1150_v30  ;;  %v1379_v30 = vld [vmem:[%s8976_s23 + $0x50] sm:$0xff]  ;;  %v7836_v24 = vpack.c.bf16 %v6688_v58, %v6687_v55  ;;  %v1914_v58 = vld [vmem:[%s6620_s9] sm:$0xff] }
0x118c   :  { %8283 = vpow2.f32 %v6661_v33  ;;  %v1398_v33 = vld [vmem:[%s8976_s23 + $0xe8] sm:$0xff]  ;;  %7811 = vmatprep.subr.bf16.mxu0 %v7810_v28  ;;  %v6689_v28 = vld [vmem:[%s8976_s23 + $0x1d0] sm:$0xff] }
0x118d   :  { %8285 = vpow2.f32 %v6662_v34 }
0x1194   :  { %v8280_v31 = vpop.eup %8279 }
0x1195   :  { %v8282_v32 = vpop.eup %8281  ;;  %1175 = vrot.lane.b32.xlu0 %v8280_v31, %s8727_s18  ;;  %v1380_v31 = vld [vmem:[%s8976_s23 + $0x58] sm:$0xff] }
0x1196   :  { %1177 = vrot.lane.b32.xlu1 %v8282_v32, %s8727_s18  ;;  %v8284_v35 = vpop.eup %8283  ;;  %v1397_v32 = vld [vmem:[%s8976_s23 + $0xe0] sm:$0xff]  ;;  %v7812_v34 = vpack.c.bf16 %v1380_v31, %v1379_v30  ;;  %v6690_v30 = vld [vmem:[%s8976_s23 + $0x1d8] sm:$0xff]  ;;  %v7838_v31 = vpack.c.bf16 %v6672_v26, %v6671_v25  ;;  %v1916_v25 = vld [vmem:[%s6620_s9 + $0x10] sm:$0xff] }
0x1197   :  { %v8286_v36 = vpop.eup %8285  ;;  %v1157_v37 = vadd.f32 1.0, %v8284_v35  ;;  %v7814_v35 = vpack.c.bf16 %v1398_v33, %v1397_v32  ;;  %v7840_v32 = vpack.c.bf16 %v6690_v30, %v6689_v28  ;;  %v6673_v33 = vld [vmem:[%s8976_s23 + $0x150] sm:$0xff]  ;;  %v1917_v26 = vld [vmem:[%s6620_s9 + $0x18] sm:$0xff] }
0x1198   :  { %v1158_v38 = vadd.f32 1.0, %v8286_v36  ;;  %v1381_v36 = vld [vmem:[%s8976_s23 + $0x60] sm:$0xff]  ;;  %7813 = vmatpush3.bf16.msra.mxu0 %v7812_v34  ;;  %v6674_v34 = vld [vmem:[%s8976_s23 + $0x158] sm:$0xff]  ;;  %v9106_v28 = vpack.c.bf16 %v1917_v26, %v1916_v25 }
0x1199   :  { %8287 = vrcp.f32 %v1157_v37  ;;  %v1382_v37 = vld [vmem:[%s8976_s23 + $0x68] sm:$0xff]  ;;  %7815 = vmatprep.subr.bf16.mxu0 %v7814_v35  ;;  %v6691_v35 = vld [vmem:[%s8976_s23 + $0x1e0] sm:$0xff] }
0x119a   :  { %8289 = vrcp.f32 %v1158_v38  ;;  %v7816_v38 = vpack.c.bf16 %v1382_v37, %v1381_v36  ;;  %v6692_v36 = vld [vmem:[%s8976_s23 + $0x1e8] sm:$0xff]  ;;  %v7842_v37 = vpack.c.bf16 %v6674_v34, %v6673_v33 }
0x119c   :  { %7817 = vmatpush3.bf16.msra.mxu0 %v7816_v38  ;;  %v7844_v38 = vpack.c.bf16 %v6692_v36, %v6691_v35 }
0x11a3   :  { %v8957_v39 = vpop.eup %8287 }
0x11a4   :  { %v8959_v41 = vpop.eup %8289  ;;  %v1171_v47 = vmul.f32 %v8957_v39, %v1167_v45  ;;  %v1384_v45 = vld [vmem:[%s8976_s23 + $0x78] sm:$0xff] }
0x11a5   :  { %v1172_v48 = vmul.f32 %v8959_v41, %v1168_v46 }
0x1207   :  { %v1176_v40 = vpop.permute.xlu0 %1175 }
0x1208   :  { %v1178_v42 = vpop.permute.xlu1 %1177  ;;  %v1181_v43 = vmul.f32 %v8957_v39, %v1176_v40  ;;  %v1399_v40 = vld [vmem:[%s8976_s23 + $0xf0] sm:$0xff] }
0x1209   :  { %v1182_v44 = vmul.f32 %v8959_v41, %v1178_v42  ;;  %v1400_v42 = vld [vmem:[%s8976_s23 + $0xf8] sm:$0xff] }
0x120a   :  { %1185 = vrot.lane.b32.xlu0 %v1181_v43, %s8727_s18  ;;  %v7818_v43 = vpack.c.bf16 %v1400_v42, %v1399_v40  ;;  %v6675_v40 = vld [vmem:[%s8976_s23 + $0x160] sm:$0xff]  ;;  %v6676_v42 = vld [vmem:[%s8976_s23 + $0x168] sm:$0xff] }
0x120b   :  { %1187 = vrot.lane.b32.xlu1 %v1182_v44, %s8727_s18  ;;  %v1383_v44 = vld [vmem:[%s8976_s23 + $0x70] sm:$0xff] }
0x120c   :  { %v7820_v46 = vpack.c.bf16 %v1384_v45, %v1383_v44  ;;  %7819 = vmatprep.subr.bf16.mxu0 %v7818_v43  ;;  %v6693_v43 = vld [vmem:[%s8976_s23 + $0x1f0] sm:$0xff]  ;;  %v6694_v44 = vld [vmem:[%s8976_s23 + $0x1f8] sm:$0xff]  ;;  %v7846_v45 = vpack.c.bf16 %v6676_v42, %v6675_v40 }
0x120e   :  { %7821 = vmatpush3.bf16.msra.mxu0 %v7820_v46  ;;  %v7848_v46 = vpack.c.bf16 %v6694_v44, %v6693_v43  ;;  %v1725_v44 = vld [vmem:[%s6608_s13] sm:$0xff] }
0x120f   :  { %7860 = vmatprep.subr.bf16.mxu0 %v8722_v0 }
0x127c   :  { %v1186_v49 = vpop.permute.xlu0 %1185 }
0x127d   :  { %v1188_v50 = vpop.permute.xlu1 %1187  ;;  %v8967_v12 = vadd.f32 %v1186_v49, %v1171_v47  ;;  %v1367_v47 = vld [vmem:[%s9011_s27 + $0x8] sm:$0xff] }
0x127e   :  { %v8969_v51 = vadd.f32 %v1188_v50, %v1172_v48  ;;  %1472 = vmatprep.mubr.f32.mxu0 %v1367_v47  ;;  %v9020_v48 = vld [vmem:[%s9011_s27] sm:$0xff] }
0x127f   :  { %8291 = vtanh.f32 %v8967_v12  ;;  %1473 = vmatmul.mubr.f32.vlgmr.msra.gmra.mrb[8].mxu0 %v9020_v48 }
0x1280   :  { %8293 = vtanh.f32 %v8969_v51  ;;  %7283 = vmatprep.mubr.msk.f32.mxu0 %vm8724_vm0, %v8725_v1 }
0x1289   :  { %v8292_v52 = vpop.eup %8291 }
0x128a   :  { %v8294_v17 = vpop.eup %8293  ;;  %1197 = vrot.lane.b32.xlu0 %v8292_v52, %s8727_s18 }
0x128b   :  { %1199 = vrot.lane.b32.xlu1 %v8294_v17, %s8727_s18 }
0x12fc   :  { %v1198_v49 = vpop.permute.xlu0 %1197 }
0x12fd   :  { %v1200_v50 = vpop.permute.xlu1 %1199  ;;  %v1203_v52 = vmul.f32 %v8957_v39, %v1198_v49  ;;  %v6678_v49 = vld [vmem:[%s8976_s23 + $0x178] sm:$0xff] }
0x12fe   :  { %v1204_v17 = vmul.f32 %v8959_v41, %v1200_v50  ;;  %v6699_v41 = vld [vmem:[%s8976_s23 + $0x220] sm:$0xff] }
0x12ff   :  { %v1207_v53 = vrot.slane %v1203_v52, 6  ;;  %v9029_v54 = vsel %vm1360_vm9, %v8944_v20, %v1203_v52  ;;  %v7861_v60 = vpack.c.bf16 %v6700_v59, %v6699_v41  ;;  %v6701_v20 = vld [vmem:[%s8976_s23 + $0x230] sm:$0xff]  ;;  %v6695_v50 = vld [vmem:[%s8976_s23 + $0x200] sm:$0xff]  ;;  %v6696_v52 = vld [vmem:[%s8976_s23 + $0x208] sm:$0xff] }
0x1300   :  { %v1208_v56 = vrot.slane %v1204_v17, 5  ;;  %v9033_v57 = vsel %vm1360_vm9, %v8948_v22, %v1204_v17  ;;  %v7864_v62 = vpack.c.bf16 %v6702_v61, %v6701_v20  ;;  %v1368_v22 = vld [vmem:[%s9011_s27 + $0x10] sm:$0xff]  ;;  %v6698_v59 = vld [vmem:[%s8976_s23 + $0x218] sm:$0xff]  ;;  %s6624_s27 = sld [smem:[%s9896_s0 + %s8737_s24]]   ;;  %s8744_s24 = smov 19  }
0x1301   :  { %7862 = vmatpush3.bf16.msra.mxu0 %v7861_v60  ;;  %v6697_v41 = vld [vmem:[%s8976_s23 + $0x210] sm:$0xff] }
0x1302   :  { %v1209_v39 = vsel %vm370_vm2, %v1208_v56, %v1207_v53  ;;  %7863 = vmatprep.subr.bf16.mxu0 %v8722_v0  ;;  %v7852_v53 = vpack.c.bf16 %v6696_v52, %v6695_v50  ;;  %v6679_v56 = vld [vmem:[%s8976_s23 + $0x180] sm:$0xff]  ;;  %v7856_v20 = vpack.c.bf16 %v6698_v59, %v6697_v41  ;;  %v6681_v61 = vld [vmem:[%s8976_s23 + $0x190] sm:$0xff]  ;;  %v1734_v50 = vld [vmem:[%s9095_s5 + $0x38] sm:$0xff] }
0x1303   :  { %1210 = vrot.lane.b32.xlu0 %v1209_v39, %s8728_s19  ;;  %v6680_v39 = vld [vmem:[%s8976_s23 + $0x188] sm:$0xff] }
0x1304   :  { %v7854_v60 = vpack.c.bf16 %v6680_v39, %v6679_v56  ;;  %v6708_v39 = vld [vmem:[%s6621_s17] ss:$0 sm:$0xff]  ;;  %s6612_s17 = sld [smem:[%s9896_s0 + %s8742_s14]]   ;;  %s8749_s14 = smov 26  }
0x1305   :  { %7865 = vmatpush3.bf16.msra.mxu0 %v7864_v62  ;;  %v6682_v62 = vld [vmem:[%s8976_s23 + $0x198] sm:$0xff] }
0x1306   :  { %7867 = vmatprep.subr.bf16.mxu0 %v7866_v7 }
0x1308   :  { %7284 = vmatmul.mubr.msk.f32.vlgmr.msra.gmra.mrb[10].mxu0 %vm239_vm3, %v1368_v22 }
0x1309   :  { %7869 = vmatpush3.bf16.msra.mxu0 %v7866_v7 }
0x1352   :  { %v6895_v63 = vpop.f32.mrb[8].mxu0 }
0x1353   :  { %v6896_v2 = vpop.f32.mrb[9].mxu0 }
0x1375   :  { %v1211_v6 = vpop.permute.xlu0 %1210 }
0x1376   :  { %7262 = vmatmul.mubr.msk.f32.vlgmr.msra.gmra.mrb[8].mxu1 %vm239_vm3, %v1211_v6  ;;  %v1737_v6 = vld [vmem:[%s6619_s1 + $0x10] sm:$0xff] }
0x1377   :  { %7824 = vmatpush3.bf16.msra.mxu1 %v7823_v3  ;;  %7272 = vmatprep.mubr.msk.f32.mxu1 %vm8724_vm0, %v8725_v1  ;;  %v6897_v3 = vadd.f32 %v6896_v2, %v6895_v63 }
0x1378   :  { %7825 = vmatprep.subr.bf16.mxu1 %v8722_v0 }
0x137b   :  { %7827 = vmatpush3.bf16.msra.mxu1 %v7826_v9  ;;  %v7870_v9 = vpack.c.bf16 %v1738_v8, %v1737_v6 }
0x137c   :  { %7829 = vmatprep.subr.bf16.mxu1 %v7828_v10  ;;  %v1739_v10 = vld [vmem:[%s6619_s1 + $0x20] sm:$0xff]  ;;  %s6623_s1 = sld [smem:[%s9896_s0 + %s8738_s28]]   ;;  %s8745_s28 = smov 22  }
0x137d   :  { %7871 = vmatprep.subr.bf16.mxu0 %v7870_v9 }
0x137e   :  { %7273 = vmatmul.mubr.msk.f32.vlgmr.msra.gmra.mrb[10].mxu1 %vm239_vm3, %v1368_v22  ;;  %v7858_v22 = vpack.c.bf16 %v6682_v62, %v6681_v61  ;;  %7873 = vmatpush3.bf16.msra.mxu0 %v7870_v9 }
0x137f   :  { %7831 = vmatpush3.bf16.msra.mxu1 %v7830_v16  ;;  %1649 = vmatprep.mubr.f32.mxu1 %v1367_v47  ;;  %v6677_v47 = vld [vmem:[%s8976_s23 + $0x170] sm:$0xff]  ;;  %s6622_s23 = sld [smem:[%s9896_s0 + %s8736_s20]]   ;;  %s8743_s20 = smov 21  }
0x1380   :  { %7833 = vmatprep.subr.bf16.mxu1 %v7832_v18  ;;  %v7850_v17 = vpack.c.bf16 %v6678_v49, %v6677_v47  ;;  %v1727_v18 = vld [vmem:[%s9095_s5] sm:$0xff]  ;;  %v1733_v49 = vld [vmem:[%s9095_s5 + $0x30] sm:$0xff] }
0x1381   :  { %v7882_v55 = vpack.c.bf16 %v1728_v19, %v1727_v18  ;;  %v7894_v52 = vpack.c.bf16 %v1734_v50, %v1733_v49 }
0x1383   :  { %7835 = vmatpush3.bf16.msra.mxu1 %v7834_v23  ;;  %v1915_v23 = vld [vmem:[%s6620_s9 + $0x8] sm:$0xff]  ;;  %s6625_s9 = sld [smem:[%s9896_s0 + %s8740_s6]]   ;;  %s8747_s6 = smov 24  }
0x1384   :  { %7837 = vmatprep.subr.bf16.mxu1 %v7836_v24  ;;  %v9102_v24 = vpack.c.bf16 %v1915_v23, %v1914_v58 }
0x1387   :  { %7839 = vmatpush3.bf16.msra.mxu1 %v7838_v31 }
0x1388   :  { %7841 = vmatprep.subr.bf16.mxu1 %v7840_v32 }
0x138b   :  { %7843 = vmatpush3.bf16.msra.mxu1 %v7842_v37  ;;  %v1729_v37 = vld [vmem:[%s9095_s5 + $0x10] sm:$0xff] }
0x138c   :  { %7845 = vmatprep.subr.bf16.mxu1 %v7844_v38  ;;  %v1730_v38 = vld [vmem:[%s9095_s5 + $0x18] sm:$0xff] }
0x138d   :  { %v7886_v43 = vpack.c.bf16 %v1730_v38, %v1729_v37 }
0x138f   :  { %7847 = vmatpush3.bf16.msra.mxu1 %v7846_v45  ;;  %v1731_v45 = vld [vmem:[%s9095_s5 + $0x20] sm:$0xff] }
0x1390   :  { %7849 = vmatprep.subr.bf16.mxu1 %v7848_v46  ;;  %v1732_v46 = vld [vmem:[%s9095_s5 + $0x28] sm:$0xff]  ;;  %s6611_s5 = sld [smem:[%s9896_s0 + %s8739_s2]]   ;;  %s8746_s2 = smov 23  }
0x1391   :  { %v7890_v47 = vpack.c.bf16 %v1732_v46, %v1731_v45 }
0x1393   :  { %7851 = vmatpush3.bf16.msra.mxu1 %v7850_v17  ;;  %v1726_v17 = vld [vmem:[%s6608_s13 + $0x8] sm:$0xff]  ;;  %s6627_s13 = sld [smem:[%s9896_s0 + %s8741_s10]]   ;;  %s8748_s10 = smov 25  }
0x1394   :  { %7853 = vmatprep.subr.bf16.mxu1 %v7852_v53 }
0x1397   :  { %7855 = vmatpush3.bf16.msra.mxu1 %v7854_v60 }
0x1398   :  { %7857 = vmatprep.subr.bf16.mxu1 %v7856_v20 }
0x139b   :  { %7859 = vmatpush3.bf16.msra.mxu1 %v7858_v22 }
0x139c   :  { %7898 = vmatprep.subr.bf16.mxu1 %v8722_v0 }
0x139e   :  { %1650 = vmatmul.mubr.f32.vlgmr.msra.gmra.mrb[12].mxu1 %v9020_v48  ;;  %v7874_v48 = vpack.c.bf16 %v1740_v11, %v1739_v10 }
0x139f   :  { %7332 = vmatprep.mubr.msk.f32.mxu1 %vm8724_vm0, %v8725_v1  ;;  %7900 = vmatpush3.bf16.msra.mxu1 %v9102_v24 }
0x13a0   :  { %7875 = vmatprep.subr.bf16.mxu0 %v7874_v48  ;;  %7901 = vmatprep.subr.bf16.mxu1 %v8722_v0 }
0x13a1   :  { %7877 = vmatpush3.bf16.msra.mxu0 %v7874_v48 }
0x13a2   :  { %7879 = vmatprep.subr.bf16.mxu0 %v7878_v15 }
0x13a3   :  { %7903 = vmatpush3.bf16.msra.mxu1 %v9106_v28 }
0x13a4   :  { %7904 = vmatprep.subr.bf16.mxu1 %v8722_v0 }
0x13a5   :  { %7881 = vmatpush3.bf16.msra.mxu0 %v7878_v15 }
0x13a6   :  { %7883 = vmatprep.subr.bf16.mxu0 %v7882_v55  ;;  %7333 = vmatmul.mubr.f32.vlgmr.msra.gmra.mrb[14].mxu1 %v8725_v1 }
0x13a7   :  { %7906 = vmatpush3.bf16.msra.mxu1 %v9102_v24  ;;  %7343 = vmatprep.mubr.msk.f32.mxu1 %vm8724_vm0, %v8725_v1 }
0x13a8   :  { %7907 = vmatprep.subr.bf16.mxu1 %v8722_v0 }
0x13ab   :  { %7909 = vmatpush3.bf16.msra.mxu1 %v9106_v28 }
0x13ac   :  { %7910 = vmatprep.subr.bf16.mxu1 %v8722_v0 }
0x13db   :  { %v1721_v16 = vpop.f32.mrb[10].mxu0 }
0x13dc   :  { %v7285_v21 = vpop.f32.mrb[11].mxu0 }
0x1449   :  { %v9117_v30 = vpop.f32.mrb[8].mxu1 }
0x144a   :  { %v7263_v31 = vpop.f32.mrb[9].mxu1 }
0x1451   :  { %v1544_v32 = vpop.f32.mrb[10].mxu1 }
0x1452   :  { %v1545_v33 = vadd.f32 %v6897_v3, %v1544_v32  ;;  %v7274_v34 = vpop.f32.mrb[11].mxu1 }
0x1454   :  { %7302 = vmatprep.mubr.msk.f32.mxu0 %vm153_vm1, %v1545_v33 }
0x1471   :  { %v6935_v35 = vpop.f32.mrb[12].mxu1 }
0x1472   :  { %v6936_v36 = vpop.f32.mrb[13].mxu1 }
0x1473   :  { %v6937_v40 = vadd.f32 %v6936_v36, %v6935_v35 }
0x1475   :  { %v1722_v42 = vadd.f32 %v6937_v40, %v1721_v16 }
0x1477   :  { %7303 = vmatmul.mubr.msk.f32.vlgmr.msra.gmra.mrb[12].mxu0 %vm153_vm1, %v1722_v42 }
0x1478   :  { %7885 = vmatpush3.bf16.msra.mxu0 %v7882_v55  ;;  %7321 = vmatprep.mubr.msk.f32.mxu0 %vm153_vm1, %v1725_v44 }
0x1479   :  { %7887 = vmatprep.subr.bf16.mxu0 %v7886_v43  ;;  %v1984_v53 = vpop.f32.mrb[14].mxu1 }
0x147a   :  { %v7334_v56 = vpop.f32.mrb[15].mxu1  ;;  %v1989_v41 = vrot.slane %v1984_v53, 1 }
0x147c   :  { %7889 = vmatpush3.bf16.msra.mxu0 %v7886_v43 }
0x147d   :  { %7891 = vmatprep.subr.bf16.mxu0 %v7890_v47 }
0x1480   :  { %7893 = vmatpush3.bf16.msra.mxu0 %v7890_v47 }
0x1481   :  { %7895 = vmatprep.subr.bf16.mxu0 %v7894_v52 }
0x1484   :  { %7897 = vmatpush3.bf16.msra.mxu0 %v7894_v52 }
0x1485   :  { %7922 = vmatprep.subr.bf16.mxu0 %v8722_v0 }
0x1487   :  { %7322 = vmatmul.mubr.msk.f32.vlgmr.msra.gmra.mrb[12].mxu0 %vm153_vm1, %v1726_v17 }
0x1488   :  { %7924 = vmatpush3.bf16.msra.mxu0 %v9102_v24  ;;  %7376 = vmatprep.mubr.msk.f32.mxu0 %vm8724_vm0, %v8725_v1 }
0x1489   :  { %7925 = vmatprep.subr.bf16.mxu0 %v8722_v0 }
0x148c   :  { %7927 = vmatpush3.bf16.msra.mxu0 %v9106_v28 }
0x148d   :  { %7934 = vmatprep.subr.bf16.mxu0 %v8722_v0 }
0x155a   :  { %v7323_v59 = vpop.f32.mrb[12].mxu0 }
0x155b   :  { %v9142_v60 = vadd.f32 %v7323_v59, %v6708_v39  ;;  %v1896_v20 = vpop.f32.mrb[13].mxu0 }
0x155c   :  { %v9144_v61 = vadd.f32 %v6708_v39, %v1896_v20 }
0x155d   :  { %v1993_v62 = vadd.f32 %v1989_v41, %v9142_v60 }
0x155e   :  { %v1992_v22 = vadd.f32 %v1984_v53, %v9144_v61 }
0x155f   :  { %8295 = vtanh.f32 %v1993_v62  ;;  %v6710_v3 = vmul.f32 -1.442695, %v1993_v62 }
0x1560   :  { %8297 = vtanh.f32 %v1992_v22  ;;  %v6709_v4 = vmul.f32 -1.442695, %v1992_v22 }
0x1561   :  { %8299 = vpow2.f32 %v6710_v3 }
0x1562   :  { %8301 = vpow2.f32 %v6709_v4 }
0x1569   :  { %v8296_v63 = vpop.eup %8295 }
0x156a   :  { %v8298_v2 = vpop.eup %8297  ;;  %2014 = vrot.lane.b32.xlu1 %v8296_v63, %s8727_s18 }
0x156b   :  { %2012 = vrot.lane.b32.xlu0 %v8298_v2, %s8727_s18  ;;  %v8300_v5 = vpop.eup %8299 }
0x156c   :  { %v8302_v6 = vpop.eup %8301  ;;  %v2001_v7 = vadd.f32 1.0, %v8300_v5 }
0x156d   :  { %v2000_v8 = vadd.f32 1.0, %v8302_v6 }
0x156e   :  { %8303 = vrcp.f32 %v2001_v7 }
0x156f   :  { %8305 = vrcp.f32 %v2000_v8 }
0x1578   :  { %v8304_v9 = vpop.eup %8303 }
0x1579   :  { %v8306_v11 = vpop.eup %8305  ;;  %v2009_v15 = vmul.f32 0.0, %v8304_v9 }
0x157a   :  { %v2008_v18 = vmul.f32 0.0, %v8306_v11 }
0x15dc   :  { %v2015_v10 = vpop.permute.xlu1 %2014 }
0x15dd   :  { %v2019_v48 = vmul.f32 %v8304_v9, %v2015_v10  ;;  %v2013_v13 = vpop.permute.xlu0 %2012 }
0x15de   :  { %v2018_v14 = vmul.f32 %v8306_v11, %v2013_v13 }
0x15df   :  { %2024 = vrot.lane.b32.xlu1 %v2019_v48, %s8727_s18 }
0x15e0   :  { %2022 = vrot.lane.b32.xlu0 %v2018_v14, %s8727_s18 }
0x1651   :  { %v2025_v16 = vpop.permute.xlu1 %2024 }
0x1652   :  { %v2029_v19 = vadd.f32 %v2025_v16, %v2009_v15  ;;  %v2023_v21 = vpop.permute.xlu0 %2022 }
0x1653   :  { %v2028_v55 = vadd.f32 %v2023_v21, %v2008_v18 }
0x1654   :  { %8307 = vtanh.f32 %v2029_v19  ;;  %v2143_v20 = vrot.slane %v2029_v19, 7 }
0x1655   :  { %8309 = vtanh.f32 %v2028_v55  ;;  %v2142_v22 = vrot.slane %v2028_v55, 7 }
0x165e   :  { %v8308_v58 = vpop.eup %8307 }
0x165f   :  { %v8310_v23 = vpop.eup %8309  ;;  %2036 = vrot.lane.b32.xlu1 %v8308_v58, %s8727_s18 }
0x1660   :  { %2034 = vrot.lane.b32.xlu0 %v8310_v23, %s8727_s18 }
0x16d1   :  { %v2037_v25 = vpop.permute.xlu1 %2036 }
0x16d2   :  { %v9154_v26 = vmul.f32 %v8304_v9, %v2037_v25  ;;  %v2035_v31 = vpop.permute.xlu0 %2034 }
0x16d3   :  { %v9156_v32 = vmul.f32 %v8306_v11, %v2035_v31 }
0x16d4   :  { %v2044_v33 = vrot.slane %v9154_v26, 7 }
0x16d6   :  { %v2045_v34 = vsel %vm370_vm2, %v2044_v33, %v9156_v32 }
0x16d7   :  { %2046 = vrot.lane.b32.xlu1 %v2045_v34, %s8728_s19 }
0x1749   :  { %v2047_v35 = vpop.permute.xlu1 %2046 }
0x174a   :  { %7344 = vmatmul.mubr.msk.f32.vlgmr.msra.gmra.mrb[16].mxu1 %vm239_vm3, %v2047_v35 }
0x174b   :  { %7912 = vmatpush3.bf16.msra.mxu1 %v9102_v24  ;;  %7354 = vmatprep.mubr.msk.f32.mxu1 %vm8724_vm0, %v8725_v1 }
0x174c   :  { %7913 = vmatprep.subr.bf16.mxu1 %v8722_v0 }
0x174f   :  { %7915 = vmatpush3.bf16.msra.mxu1 %v9106_v28 }
0x1750   :  { %7916 = vmatprep.subr.bf16.mxu1 %v8722_v0 }
0x181d   :  { %v2116_v36 = vpop.f32.mrb[16].mxu1 }
0x181e   :  { %v2121_v37 = vrot.slane %v2116_v36, 7  ;;  %v2125_v38 = vadd.f32 %v2116_v36, %v9142_v60  ;;  %v7345_v40 = vpop.f32.mrb[17].mxu1 }
0x1820   :  { %v2124_v42 = vadd.f32 %v2121_v37, %v9144_v61  ;;  %8311 = vtanh.f32 %v2125_v38  ;;  %v6713_v45 = vmul.f32 -1.442695, %v2125_v38 }
0x1822   :  { %8313 = vtanh.f32 %v2124_v42  ;;  %v6712_v46 = vmul.f32 -1.442695, %v2124_v42 }
0x1823   :  { %8315 = vpow2.f32 %v6713_v45 }
0x1824   :  { %8317 = vpow2.f32 %v6712_v46 }
0x182a   :  { %v8312_v43 = vpop.eup %8311 }
0x182b   :  { %2152 = vrot.lane.b32.xlu1 %v8312_v43, %s8727_s18 }
0x182c   :  { %v8314_v44 = vpop.eup %8313 }
0x182d   :  { %2150 = vrot.lane.b32.xlu0 %v8314_v44, %s8727_s18  ;;  %v8316_v47 = vpop.eup %8315 }
0x182e   :  { %v8318_v49 = vpop.eup %8317  ;;  %v2133_v50 = vadd.f32 1.0, %v8316_v47 }
0x182f   :  { %v2132_v52 = vadd.f32 1.0, %v8318_v49 }
0x1830   :  { %8319 = vrcp.f32 %v2133_v50 }
0x1831   :  { %8321 = vrcp.f32 %v2132_v52 }
0x183a   :  { %v8320_v17 = vpop.eup %8319 }
0x183b   :  { %v8322_v39 = vpop.eup %8321  ;;  %v2147_v62 = vmul.f32 %v8320_v17, %v2143_v20 }
0x183c   :  { %v2146_v3 = vmul.f32 %v8322_v39, %v2142_v22 }
0x189d   :  { %v2153_v53 = vpop.permute.xlu1 %2152 }
0x189e   :  { %v2157_v56 = vmul.f32 %v8320_v17, %v2153_v53 }
0x189f   :  { %v2151_v41 = vpop.permute.xlu0 %2150 }
0x18a0   :  { %2162 = vrot.lane.b32.xlu1 %v2157_v56, %s8727_s18  ;;  %v2156_v59 = vmul.f32 %v8322_v39, %v2151_v41 }
0x18a2   :  { %2160 = vrot.lane.b32.xlu0 %v2156_v59, %s8727_s18 }
0x1912   :  { %v2163_v63 = vpop.permute.xlu1 %2162 }
0x1913   :  { %v2167_v2 = vadd.f32 %v2163_v63, %v2147_v62 }
0x1914   :  { %v2161_v4 = vpop.permute.xlu0 %2160 }
0x1915   :  { %8323 = vtanh.f32 %v2167_v2  ;;  %v2166_v5 = vadd.f32 %v2161_v4, %v2146_v3  ;;  %v2282_v46 = vrot.slane %v2167_v2, 7 }
0x1917   :  { %8325 = vtanh.f32 %v2166_v5  ;;  %v2281_v45 = vrot.slane %v2166_v5, 7 }
0x191f   :  { %v8324_v6 = vpop.eup %8323 }
0x1920   :  { %2174 = vrot.lane.b32.xlu1 %v8324_v6, %s8727_s18 }
0x1921   :  { %v8326_v7 = vpop.eup %8325 }
0x1922   :  { %2172 = vrot.lane.b32.xlu0 %v8326_v7, %s8727_s18 }
0x1992   :  { %v2175_v8 = vpop.permute.xlu1 %2174 }
0x1993   :  { %v2179_v11 = vmul.f32 %v8320_v17, %v2175_v8 }
0x1994   :  { %v2173_v9 = vpop.permute.xlu0 %2172 }
0x1995   :  { %v2178_v10 = vmul.f32 %v8322_v39, %v2173_v9  ;;  %v3020_v63 = vsel %vm1345_vm4, %v9154_v26, %v2179_v11 }
0x1997   :  { %v2182_v48 = vrot.slane %v2178_v10, 1  ;;  %v3019_v62 = vsel %vm1345_vm4, %v9156_v32, %v2178_v10 }
0x1999   :  { %v2183_v13 = vsel %vm370_vm2, %v2179_v11, %v2182_v48 }
0x199a   :  { %2184 = vrot.lane.b32.xlu0 %v2183_v13, %s8728_s19 }
0x1a0c   :  { %v2185_v14 = vpop.permute.xlu0 %2184 }
0x1a0d   :  { %7355 = vmatmul.mubr.msk.f32.vlgmr.msra.gmra.mrb[18].mxu1 %vm239_vm3, %v2185_v14 }
0x1a0e   :  { %7918 = vmatpush3.bf16.msra.mxu1 %v9102_v24  ;;  %7365 = vmatprep.mubr.msk.f32.mxu1 %vm8724_vm0, %v8725_v1 }
0x1a0f   :  { %7919 = vmatprep.subr.bf16.mxu1 %v8722_v0 }
0x1a12   :  { %7921 = vmatpush3.bf16.msra.mxu1 %v9106_v28 }
0x1a13   :  { %7928 = vmatprep.subr.bf16.mxu1 %v8722_v0 }
0x1ae0   :  { %v2254_v15 = vpop.f32.mrb[18].mxu1 }
0x1ae1   :  { %v2259_v16 = vrot.slane %v2254_v15, 6  ;;  %v2260_v18 = vrot.slane %v2254_v15, 7  ;;  %v7356_v19 = vpop.f32.mrb[19].mxu1 }
0x1ae3   :  { %v2263_v21 = vadd.f32 %v2259_v16, %v9144_v61  ;;  %v2264_v55 = vadd.f32 %v2260_v18, %v9142_v60 }
0x1ae5   :  { %8327 = vtanh.f32 %v2263_v21  ;;  %v6715_v25 = vmul.f32 -1.442695, %v2263_v21  ;;  %v6716_v31 = vmul.f32 -1.442695, %v2264_v55 }
0x1ae6   :  { %8329 = vtanh.f32 %v2264_v55 }
0x1ae7   :  { %8331 = vpow2.f32 %v6715_v25 }
0x1ae8   :  { %8333 = vpow2.f32 %v6716_v31 }
0x1aef   :  { %v8328_v58 = vpop.eup %8327 }
0x1af0   :  { %v8330_v23 = vpop.eup %8329  ;;  %2289 = vrot.lane.b32.xlu1 %v8328_v58, %s8727_s18 }
0x1af1   :  { %2291 = vrot.lane.b32.xlu0 %v8330_v23, %s8727_s18  ;;  %v8332_v33 = vpop.eup %8331 }
0x1af2   :  { %v8334_v34 = vpop.eup %8333  ;;  %v2271_v35 = vadd.f32 1.0, %v8332_v33 }
0x1af3   :  { %v2272_v36 = vadd.f32 1.0, %v8334_v34 }
0x1af4   :  { %8335 = vrcp.f32 %v2271_v35 }
0x1af5   :  { %8337 = vrcp.f32 %v2272_v36 }
0x1afe   :  { %v8336_v37 = vpop.eup %8335 }
0x1aff   :  { %v8338_v40 = vpop.eup %8337  ;;  %v2285_v47 = vmul.f32 %v8336_v37, %v2281_v45 }
0x1b00   :  { %v2286_v49 = vmul.f32 %v8338_v40, %v2282_v46 }
0x1b62   :  { %v2290_v38 = vpop.permute.xlu1 %2289 }
0x1b63   :  { %v2292_v42 = vpop.permute.xlu0 %2291  ;;  %v2295_v43 = vmul.f32 %v8336_v37, %v2290_v38 }
0x1b64   :  { %v2296_v44 = vmul.f32 %v8338_v40, %v2292_v42 }
0x1b65   :  { %2299 = vrot.lane.b32.xlu1 %v2295_v43, %s8727_s18 }
0x1b66   :  { %2301 = vrot.lane.b32.xlu0 %v2296_v44, %s8727_s18 }
0x1bd7   :  { %v2300_v50 = vpop.permute.xlu1 %2299 }
0x1bd8   :  { %v2302_v52 = vpop.permute.xlu0 %2301  ;;  %v2305_v17 = vadd.f32 %v2300_v50, %v2285_v47 }
0x1bd9   :  { %v2306_v53 = vadd.f32 %v2302_v52, %v2286_v49 }
0x1bda   :  { %8339 = vtanh.f32 %v2305_v17  ;;  %v2421_v34 = vrot.slane %v2305_v17, 7 }
0x1bdb   :  { %8341 = vtanh.f32 %v2306_v53  ;;  %v2422_v35 = vrot.slane %v2306_v53, 7 }
0x1be4   :  { %v8340_v56 = vpop.eup %8339 }
0x1be5   :  { %v8342_v39 = vpop.eup %8341  ;;  %2311 = vrot.lane.b32.xlu1 %v8340_v56, %s8727_s18 }
0x1be6   :  { %2313 = vrot.lane.b32.xlu0 %v8342_v39, %s8727_s18 }
0x1c57   :  { %v2312_v41 = vpop.permute.xlu1 %2311 }
0x1c58   :  { %v2314_v59 = vpop.permute.xlu0 %2313  ;;  %v2317_v20 = vmul.f32 %v8336_v37, %v2312_v41 }
0x1c59   :  { %v2318_v22 = vmul.f32 %v8338_v40, %v2314_v59 }
0x1c5a   :  { %v2321_v2 = vrot.slane %v2317_v20, 2  ;;  %v3021_v3 = vsel %vm1348_vm5, %v3019_v62, %v2317_v20 }
0x1c5b   :  { %v2322_v4 = vrot.slane %v2318_v22, 1  ;;  %v3022_v5 = vsel %vm1348_vm5, %v3020_v63, %v2318_v22 }
0x1c5d   :  { %v2323_v6 = vsel %vm370_vm2, %v2322_v4, %v2321_v2 }
0x1c5e   :  { %2324 = vrot.lane.b32.xlu1 %v2323_v6, %s8728_s19 }
0x1cd0   :  { %v2325_v7 = vpop.permute.xlu1 %2324 }
0x1cd1   :  { %7366 = vmatmul.mubr.msk.f32.vlgmr.msra.gmra.mrb[20].mxu1 %vm239_vm3, %v2325_v7 }
0x1cd2   :  { %7930 = vmatpush3.bf16.msra.mxu1 %v9102_v24  ;;  %7387 = vmatprep.mubr.msk.f32.mxu1 %vm8724_vm0, %v8725_v1 }
0x1cd3   :  { %7931 = vmatprep.subr.bf16.mxu1 %v8722_v0 }
0x1cd6   :  { %7933 = vmatpush3.bf16.msra.mxu1 %v9106_v28 }
0x1cd7   :  { %7940 = vmatprep.subr.bf16.mxu1 %v8722_v0 }
0x1da4   :  { %v2394_v26 = vpop.f32.mrb[20].mxu1 }
0x1da5   :  { %v2399_v32 = vrot.slane %v2394_v26, 5  ;;  %v2400_v8 = vrot.slane %v2394_v26, 6  ;;  %v7367_v9 = vpop.f32.mrb[21].mxu1 }
0x1da7   :  { %v2403_v10 = vadd.f32 %v2399_v32, %v9144_v61  ;;  %v2404_v11 = vadd.f32 %v2400_v8, %v9142_v60 }
0x1da9   :  { %8343 = vtanh.f32 %v2403_v10  ;;  %v6718_v14 = vmul.f32 -1.442695, %v2403_v10  ;;  %v6719_v15 = vmul.f32 -1.442695, %v2404_v11 }
0x1daa   :  { %8345 = vtanh.f32 %v2404_v11 }
0x1dab   :  { %8347 = vpow2.f32 %v6718_v14 }
0x1dac   :  { %8349 = vpow2.f32 %v6719_v15 }
0x1db3   :  { %v8344_v48 = vpop.eup %8343 }
0x1db4   :  { %v8346_v13 = vpop.eup %8345  ;;  %2429 = vrot.lane.b32.xlu0 %v8344_v48, %s8727_s18 }
0x1db5   :  { %2431 = vrot.lane.b32.xlu1 %v8346_v13, %s8727_s18  ;;  %v8348_v16 = vpop.eup %8347 }
0x1db6   :  { %v8350_v18 = vpop.eup %8349  ;;  %v2411_v19 = vadd.f32 1.0, %v8348_v16 }
0x1db7   :  { %v2412_v21 = vadd.f32 1.0, %v8350_v18 }
0x1db8   :  { %8351 = vrcp.f32 %v2411_v19 }
0x1db9   :  { %8353 = vrcp.f32 %v2412_v21 }
0x1dc2   :  { %v8352_v55 = vpop.eup %8351 }
0x1dc3   :  { %v8354_v23 = vpop.eup %8353  ;;  %v2425_v36 = vmul.f32 %v8352_v55, %v2421_v34 }
0x1dc4   :  { %v2426_v37 = vmul.f32 %v8354_v23, %v2422_v35 }
0x1e26   :  { %v2430_v58 = vpop.permute.xlu0 %2429 }
0x1e27   :  { %v2432_v25 = vpop.permute.xlu1 %2431  ;;  %v2435_v31 = vmul.f32 %v8352_v55, %v2430_v58 }
0x1e28   :  { %v2436_v33 = vmul.f32 %v8354_v23, %v2432_v25 }
0x1e29   :  { %2439 = vrot.lane.b32.xlu0 %v2435_v31, %s8727_s18 }
0x1e2a   :  { %2441 = vrot.lane.b32.xlu1 %v2436_v33, %s8727_s18 }
0x1e9b   :  { %v2440_v38 = vpop.permute.xlu0 %2439 }
0x1e9c   :  { %v2442_v40 = vpop.permute.xlu1 %2441  ;;  %v2445_v42 = vadd.f32 %v2440_v38, %v2425_v36 }
0x1e9d   :  { %v2446_v43 = vadd.f32 %v2442_v40, %v2426_v37 }
0x1e9e   :  { %8355 = vtanh.f32 %v2445_v42  ;;  %v2561_v15 = vrot.slane %v2445_v42, 7 }
0x1e9f   :  { %8357 = vtanh.f32 %v2446_v43  ;;  %v2562_v16 = vrot.slane %v2446_v43, 7 }
0x1ea8   :  { %v8356_v44 = vpop.eup %8355 }
0x1ea9   :  { %v8358_v45 = vpop.eup %8357  ;;  %2451 = vrot.lane.b32.xlu0 %v8356_v44, %s8727_s18 }
0x1eaa   :  { %2453 = vrot.lane.b32.xlu1 %v8358_v45, %s8727_s18 }
0x1f1b   :  { %v2452_v46 = vpop.permute.xlu0 %2451 }
0x1f1c   :  { %v2454_v47 = vpop.permute.xlu1 %2453  ;;  %v2457_v49 = vmul.f32 %v8352_v55, %v2452_v46 }
0x1f1d   :  { %v2458_v50 = vmul.f32 %v8354_v23, %v2454_v47 }
0x1f1e   :  { %v2461_v52 = vrot.slane %v2457_v49, 3  ;;  %v3023_v17 = vsel %vm1351_vm6, %v3021_v3, %v2457_v49 }
0x1f1f   :  { %v2462_v53 = vrot.slane %v2458_v50, 2  ;;  %v3024_v56 = vsel %vm1351_vm6, %v3022_v5, %v2458_v50 }
0x1f21   :  { %v2463_v39 = vsel %vm370_vm2, %v2462_v53, %v2461_v52 }
0x1f22   :  { %2464 = vrot.lane.b32.xlu0 %v2463_v39, %s8728_s19 }
0x1f94   :  { %v2465_v41 = vpop.permute.xlu0 %2464 }
0x1f95   :  { %7377 = vmatmul.mubr.msk.f32.vlgmr.msra.gmra.mrb[14].mxu0 %vm239_vm3, %v2465_v41 }
0x1f96   :  { %7936 = vmatpush3.bf16.msra.mxu0 %v9102_v24  ;;  %7398 = vmatprep.mubr.msk.f32.mxu0 %vm8724_vm0, %v8725_v1 }
0x1f97   :  { %7937 = vmatprep.subr.bf16.mxu0 %v8722_v0 }
0x1f9a   :  { %7939 = vmatpush3.bf16.msra.mxu0 %v9106_v28 }
0x2068   :  { %v2534_v59 = vpop.f32.mrb[14].mxu0 }
0x2069   :  { %v2539_v20 = vrot.slane %v2534_v59, 4  ;;  %v2540_v62 = vrot.slane %v2534_v59, 5  ;;  %v7378_v22 = vpop.f32.mrb[15].mxu0 }
0x206b   :  { %v2543_v63 = vadd.f32 %v2539_v20, %v9144_v61  ;;  %v2544_v2 = vadd.f32 %v2540_v62, %v9142_v60 }
0x206d   :  { %8359 = vtanh.f32 %v2543_v63  ;;  %v6721_v5 = vmul.f32 -1.442695, %v2543_v63  ;;  %v6722_v6 = vmul.f32 -1.442695, %v2544_v2 }
0x206e   :  { %8361 = vtanh.f32 %v2544_v2 }
0x206f   :  { %8363 = vpow2.f32 %v6721_v5 }
0x2070   :  { %8365 = vpow2.f32 %v6722_v6 }
0x2077   :  { %v8360_v3 = vpop.eup %8359 }
0x2078   :  { %v8362_v4 = vpop.eup %8361  ;;  %2569 = vrot.lane.b32.xlu1 %v8360_v3, %s8727_s18 }
0x2079   :  { %2571 = vrot.lane.b32.xlu0 %v8362_v4, %s8727_s18  ;;  %v8364_v7 = vpop.eup %8363 }
0x207a   :  { %v8366_v26 = vpop.eup %8365  ;;  %v2551_v32 = vadd.f32 1.0, %v8364_v7 }
0x207b   :  { %v2552_v8 = vadd.f32 1.0, %v8366_v26 }
0x207c   :  { %8367 = vrcp.f32 %v2551_v32 }
0x207d   :  { %8369 = vrcp.f32 %v2552_v8 }
0x2086   :  { %v8368_v9 = vpop.eup %8367 }
0x2087   :  { %v8370_v11 = vpop.eup %8369  ;;  %v2565_v18 = vmul.f32 %v8368_v9, %v2561_v15 }
0x2088   :  { %v2566_v19 = vmul.f32 %v8370_v11, %v2562_v16 }
0x20ea   :  { %v2570_v10 = vpop.permute.xlu1 %2569 }
0x20eb   :  { %v2572_v48 = vpop.permute.xlu0 %2571  ;;  %v2575_v13 = vmul.f32 %v8368_v9, %v2570_v10 }
0x20ec   :  { %v2576_v14 = vmul.f32 %v8370_v11, %v2572_v48 }
0x20ed   :  { %2579 = vrot.lane.b32.xlu1 %v2575_v13, %s8727_s18 }
0x20ee   :  { %2581 = vrot.lane.b32.xlu0 %v2576_v14, %s8727_s18 }
0x215f   :  { %v2580_v21 = vpop.permute.xlu1 %2579 }
0x2160   :  { %v2582_v55 = vpop.permute.xlu0 %2581  ;;  %v2585_v58 = vadd.f32 %v2580_v21, %v2565_v18 }
0x2161   :  { %v2586_v23 = vadd.f32 %v2582_v55, %v2566_v19 }
0x2162   :  { %8371 = vtanh.f32 %v2585_v58  ;;  %v2701_v4 = vrot.slane %v2585_v58, 7 }
0x2163   :  { %8373 = vtanh.f32 %v2586_v23  ;;  %v2702_v5 = vrot.slane %v2586_v23, 7 }
0x216c   :  { %v8372_v25 = vpop.eup %8371 }
0x216d   :  { %v8374_v31 = vpop.eup %8373  ;;  %2591 = vrot.lane.b32.xlu1 %v8372_v25, %s8727_s18 }
0x216e   :  { %2593 = vrot.lane.b32.xlu0 %v8374_v31, %s8727_s18 }
0x21df   :  { %v2592_v33 = vpop.permute.xlu1 %2591 }
0x21e0   :  { %v2594_v34 = vpop.permute.xlu0 %2593  ;;  %v2597_v35 = vmul.f32 %v8368_v9, %v2592_v33 }
0x21e1   :  { %v2598_v36 = vmul.f32 %v8370_v11, %v2594_v34 }
0x21e2   :  { %v2601_v37 = vrot.slane %v2597_v35, 4  ;;  %v3025_v38 = vsel %vm1354_vm7, %v3023_v17, %v2597_v35 }
0x21e3   :  { %v2602_v40 = vrot.slane %v2598_v36, 3  ;;  %v3026_v42 = vsel %vm1354_vm7, %v3024_v56, %v2598_v36 }
0x21e5   :  { %v2603_v43 = vsel %vm370_vm2, %v2602_v40, %v2601_v37 }
0x21e6   :  { %2604 = vrot.lane.b32.xlu1 %v2603_v43, %s8728_s19 }
0x2258   :  { %v2605_v44 = vpop.permute.xlu1 %2604 }
0x2259   :  { %7388 = vmatmul.mubr.msk.f32.vlgmr.msra.gmra.mrb[22].mxu1 %vm239_vm3, %v2605_v44 }
0x225a   :  { %7942 = vmatpush3.bf16.msra.mxu1 %v9102_v24  ;;  %7409 = vmatprep.mubr.msk.f32.mxu1 %vm8724_vm0, %v8725_v1 }
0x225b   :  { %7943 = vmatprep.subr.bf16.mxu1 %v8722_v0 }
0x225e   :  { %7945 = vmatpush3.bf16.msra.mxu1 %v9106_v28 }
0x232c   :  { %v2674_v45 = vpop.f32.mrb[22].mxu1 }
0x232d   :  { %v2679_v46 = vrot.slane %v2674_v45, 3  ;;  %v2680_v47 = vrot.slane %v2674_v45, 4  ;;  %v7389_v49 = vpop.f32.mrb[23].mxu1 }
0x232f   :  { %v2683_v50 = vadd.f32 %v2679_v46, %v9144_v61  ;;  %v2684_v52 = vadd.f32 %v2680_v47, %v9142_v60 }
0x2331   :  { %8375 = vtanh.f32 %v2683_v50  ;;  %v6724_v24 = vmul.f32 -1.442695, %v2683_v50  ;;  %v6725_v56 = vmul.f32 -1.442695, %v2684_v52 }
0x2332   :  { %8377 = vtanh.f32 %v2684_v52 }
0x2333   :  { %8379 = vpow2.f32 %v6724_v24 }
0x2334   :  { %8381 = vpow2.f32 %v6725_v56 }
0x233b   :  { %v8376_v17 = vpop.eup %8375 }
0x233c   :  { %v8378_v53 = vpop.eup %8377  ;;  %2709 = vrot.lane.b32.xlu0 %v8376_v17, %s8727_s18 }
0x233d   :  { %2711 = vrot.lane.b32.xlu1 %v8378_v53, %s8727_s18  ;;  %v8380_v28 = vpop.eup %8379 }
0x233e   :  { %v8382_v39 = vpop.eup %8381  ;;  %v2691_v41 = vadd.f32 1.0, %v8380_v28  ;;  %v1285_v28 = vrot.slane %v9117_v30, 1 }
0x233f   :  { %v2692_v59 = vadd.f32 1.0, %v8382_v39 }
0x2340   :  { %8383 = vrcp.f32 %v2691_v41 }
0x2341   :  { %8385 = vrcp.f32 %v2692_v59 }
0x234a   :  { %v8384_v20 = vpop.eup %8383 }
0x234b   :  { %v8386_v22 = vpop.eup %8385  ;;  %v2705_v6 = vmul.f32 %v8384_v20, %v2701_v4 }
0x234c   :  { %v2706_v7 = vmul.f32 %v8386_v22, %v2702_v5 }
0x23ae   :  { %v2710_v62 = vpop.permute.xlu0 %2709 }
0x23af   :  { %v2712_v63 = vpop.permute.xlu1 %2711  ;;  %v2715_v2 = vmul.f32 %v8384_v20, %v2710_v62 }
0x23b0   :  { %v2716_v3 = vmul.f32 %v8386_v22, %v2712_v63 }
0x23b1   :  { %2719 = vrot.lane.b32.xlu0 %v2715_v2, %s8727_s18 }
0x23b2   :  { %2721 = vrot.lane.b32.xlu1 %v2716_v3, %s8727_s18 }
0x2423   :  { %v2720_v26 = vpop.permute.xlu0 %2719 }
0x2424   :  { %v2722_v32 = vpop.permute.xlu1 %2721  ;;  %v2725_v8 = vadd.f32 %v2720_v26, %v2705_v6 }
0x2425   :  { %v2726_v9 = vadd.f32 %v2722_v32, %v2706_v7  ;;  %v1286_v7 = vrot.slane %v9117_v30, 2 }
0x2426   :  { %8387 = vtanh.f32 %v2725_v8  ;;  %v2841_v53 = vrot.slane %v2725_v8, 7 }
0x2427   :  { %8389 = vtanh.f32 %v2726_v9  ;;  %v2842_v24 = vrot.slane %v2726_v9, 7 }
0x2430   :  { %v8388_v10 = vpop.eup %8387 }
0x2431   :  { %v8390_v11 = vpop.eup %8389  ;;  %2731 = vrot.lane.b32.xlu0 %v8388_v10, %s8727_s18 }
0x2432   :  { %2733 = vrot.lane.b32.xlu1 %v8390_v11, %s8727_s18 }
0x24a3   :  { %v2732_v48 = vpop.permute.xlu0 %2731 }
0x24a4   :  { %v2734_v13 = vpop.permute.xlu1 %2733  ;;  %v2737_v14 = vmul.f32 %v8384_v20, %v2732_v48 }
0x24a5   :  { %v2738_v15 = vmul.f32 %v8386_v22, %v2734_v13  ;;  %v1289_v22 = vadd.f32 %v1285_v28, %v8818_v29  ;;  %v1290_v29 = vadd.f32 %v1286_v7, %v8816_v27 }
0x24a6   :  { %v2741_v16 = vrot.slane %v2737_v14, 5  ;;  %v9254_v18 = vsel %vm1357_vm8, %v3025_v38, %v2737_v14 }
0x24a7   :  { %v2742_v19 = vrot.slane %v2738_v15, 4  ;;  %v9257_v21 = vsel %vm1357_vm8, %v3026_v42, %v2738_v15  ;;  %v6664_v4 = vmul.f32 -1.442695, %v1289_v22 }
0x24a9   :  { %v2743_v55 = vsel %vm370_vm2, %v2742_v19, %v2741_v16  ;;  %v6665_v19 = vmul.f32 -1.442695, %v1290_v29 }
0x24aa   :  { %2744 = vrot.lane.b32.xlu0 %v2743_v55, %s8728_s19 }
0x251c   :  { %v2745_v58 = vpop.permute.xlu0 %2744 }
0x251d   :  { %7399 = vmatmul.mubr.msk.f32.vlgmr.msra.gmra.mrb[16].mxu0 %vm239_vm3, %v2745_v58 }
0x25f0   :  { %v2814_v23 = vpop.f32.mrb[16].mxu0 }
0x25f1   :  { %v2819_v25 = vrot.slane %v2814_v23, 2  ;;  %v2820_v31 = vrot.slane %v2814_v23, 3  ;;  %v7400_v33 = vpop.f32.mrb[17].mxu0 }
0x25f3   :  { %v2823_v34 = vadd.f32 %v2819_v25, %v9144_v61  ;;  %v2824_v35 = vadd.f32 %v2820_v31, %v9142_v60 }
0x25f5   :  { %8391 = vtanh.f32 %v2823_v34  ;;  %v6727_v38 = vmul.f32 -1.442695, %v2823_v34  ;;  %v6728_v40 = vmul.f32 -1.442695, %v2824_v35 }
0x25f6   :  { %8393 = vtanh.f32 %v2824_v35 }
0x25f7   :  { %8395 = vpow2.f32 %v6727_v38 }
0x25f8   :  { %8397 = vpow2.f32 %v6728_v40 }
0x25ff   :  { %v8392_v36 = vpop.eup %8391 }
0x2600   :  { %v8394_v37 = vpop.eup %8393  ;;  %2849 = vrot.lane.b32.xlu1 %v8392_v36, %s8727_s18 }
0x2601   :  { %2851 = vrot.lane.b32.xlu0 %v8394_v37, %s8727_s18  ;;  %v8396_v42 = vpop.eup %8395  ;;  %v1308_v37 = vrot.slane %v8969_v51, 7 }
0x2602   :  { %v8398_v43 = vpop.eup %8397  ;;  %v2831_v44 = vadd.f32 1.0, %v8396_v42 }
0x2603   :  { %v2832_v45 = vadd.f32 1.0, %v8398_v43 }
0x2604   :  { %8399 = vrcp.f32 %v2831_v44 }
0x2605   :  { %8401 = vrcp.f32 %v2832_v45 }
0x260e   :  { %v8400_v46 = vpop.eup %8399 }
0x260f   :  { %v8402_v49 = vpop.eup %8401  ;;  %v2845_v56 = vmul.f32 %v8400_v46, %v2841_v53  ;;  %v3038_v53 = vld [vmem:[%s6622_s23 + $0x18] sm:$0xff] }
0x2610   :  { %v2846_v39 = vmul.f32 %v8402_v49, %v2842_v24 }
0x2672   :  { %v2850_v47 = vpop.permute.xlu1 %2849 }
0x2673   :  { %v2852_v50 = vpop.permute.xlu0 %2851  ;;  %v2855_v52 = vmul.f32 %v8400_v46, %v2850_v47 }
0x2674   :  { %v2856_v17 = vmul.f32 %v8402_v49, %v2852_v50  ;;  %v3035_v50 = vld [vmem:[%s6622_s23] sm:$0xff] }
0x2675   :  { %2859 = vrot.lane.b32.xlu1 %v2855_v52, %s8727_s18  ;;  %v3036_v52 = vld [vmem:[%s6622_s23 + $0x8] sm:$0xff] }
0x2676   :  { %2861 = vrot.lane.b32.xlu0 %v2856_v17, %s8727_s18  ;;  %v3037_v17 = vld [vmem:[%s6622_s23 + $0x10] sm:$0xff]  ;;  %s6628_s23 = sld [smem:[%s9896_s0 + %s8743_s20]]   ;;  %s8751_s20 = smov 6  }
0x2677   :  { %v7950_v24 = vpack.c.bf16 %v3038_v53, %v3037_v17 }
0x26e7   :  { %v2860_v41 = vpop.permute.xlu1 %2859 }
0x26e8   :  { %v2862_v59 = vpop.permute.xlu0 %2861  ;;  %v9269_v20 = vadd.f32 %v2860_v41, %v2845_v56 }
0x26e9   :  { %v9271_v62 = vadd.f32 %v2862_v59, %v2846_v39 }
0x26ea   :  { %8403 = vtanh.f32 %v9269_v20 }
0x26eb   :  { %8405 = vtanh.f32 %v9271_v62 }
0x26ec   :  { %8407 = vtanh.f32 %v1289_v22 }
0x26ed   :  { %8409 = vpow2.f32 %v6664_v4 }
0x26f4   :  { %v8404_v63 = vpop.eup %8403 }
0x26f5   :  { %v8406_v2 = vpop.eup %8405  ;;  %2871 = vrot.lane.b32.xlu1 %v8404_v63, %s8727_s18 }
0x26f6   :  { %2873 = vrot.lane.b32.xlu0 %v8406_v2, %s8727_s18  ;;  %v8408_v3 = vpop.eup %8407 }
0x26f7   :  { %v8410_v5 = vpop.eup %8409 }
0x26f8   :  { %v1297_v6 = vadd.f32 1.0, %v8410_v5 }
0x26fa   :  { %1315 = vrot.lane.b32.xlu0 %v8408_v3, %s8727_s18  ;;  %8411 = vrcp.f32 %v1297_v6 }
0x26fb   :  { %8413 = vtanh.f32 %v1290_v29 }
0x26fc   :  { %8415 = vpow2.f32 %v6665_v19 }
0x2704   :  { %v8412_v14 = vpop.eup %8411 }
0x2705   :  { %v8414_v16 = vpop.eup %8413 }
0x2767   :  { %v2872_v26 = vpop.permute.xlu1 %2871 }
0x2768   :  { %v2874_v32 = vpop.permute.xlu0 %2873  ;;  %v2877_v8 = vmul.f32 %v8400_v46, %v2872_v26 }
0x2769   :  { %v2878_v9 = vmul.f32 %v8402_v49, %v2874_v32 }
0x276a   :  { %v2881_v10 = vrot.slane %v2877_v8, 6  ;;  %v9283_v11 = vsel %vm1360_vm9, %v9254_v18, %v2877_v8  ;;  %v8416_v18 = vpop.eup %8415 }
0x276b   :  { %v2882_v48 = vrot.slane %v2878_v9, 5  ;;  %v9287_v13 = vsel %vm1360_vm9, %v9257_v21, %v2878_v9  ;;  %v1298_v55 = vadd.f32 1.0, %v8416_v18  ;;  %v1307_v21 = vrot.slane %v8967_v12, 7 }
0x276c   :  { %v1316_v30 = vpop.permute.xlu0 %1315 }
0x276d   :  { %v1321_v15 = vmul.f32 %v8412_v14, %v1316_v30  ;;  %v2883_v27 = vsel %vm370_vm2, %v2882_v48, %v2881_v10  ;;  %8417 = vrcp.f32 %v1298_v55  ;;  %v1311_v23 = vmul.f32 %v8412_v14, %v1307_v21 }
0x276e   :  { %2884 = vrot.lane.b32.xlu1 %v2883_v27, %s8728_s19  ;;  %v2981_v10 = vrot.slane %v9269_v20, 7  ;;  %v2982_v27 = vrot.slane %v9271_v62, 7 }
0x276f   :  { %1325 = vrot.lane.b32.xlu0 %v1321_v15, %s8727_s18 }
0x2772   :  { %1317 = vrot.lane.b32.xlu1 %v8414_v16, %s8727_s18 }
0x2777   :  { %v8418_v33 = vpop.eup %8417 }
0x2778   :  { %v1312_v38 = vmul.f32 %v8418_v33, %v1308_v37 }
0x27e0   :  { %v2885_v58 = vpop.permute.xlu1 %2884 }
0x27e1   :  { %v1326_v25 = vpop.permute.xlu0 %1325  ;;  %7410 = vmatmul.mubr.msk.f32.vlgmr.msra.gmra.mrb[24].mxu1 %vm239_vm3, %v2885_v58 }
0x27e2   :  { %v1331_v31 = vadd.f32 %v1326_v25, %v1311_v23 }
0x27e4   :  { %8419 = vtanh.f32 %v1331_v31  ;;  %v1318_v34 = vpop.permute.xlu1 %1317 }
0x27e5   :  { %v1322_v35 = vmul.f32 %v8418_v33, %v1318_v34  ;;  %v3043_v34 = vld [vmem:[%s6624_s27] sm:$0xff] }
0x27e7   :  { %1327 = vrot.lane.b32.xlu1 %v1322_v35, %s8727_s18  ;;  %v3044_v35 = vld [vmem:[%s6624_s27 + $0x8] sm:$0xff] }
0x27ee   :  { %v8420_v36 = vpop.eup %8419 }
0x27ef   :  { %1337 = vrot.lane.b32.xlu0 %v8420_v36, %s8727_s18 }
0x2859   :  { %v1328_v40 = vpop.permute.xlu1 %1327 }
0x285a   :  { %v1332_v12 = vadd.f32 %v1328_v40, %v1312_v38  ;;  %v7964_v38 = vpack.c.bf16 %v3044_v35, %v3043_v34  ;;  %v3045_v40 = vld [vmem:[%s6624_s27 + $0x10] sm:$0xff] }
0x285c   :  { %8421 = vtanh.f32 %v1332_v12  ;;  %v3046_v12 = vld [vmem:[%s6624_s27 + $0x18] sm:$0xff]  ;;  %s6626_s27 = sld [smem:[%s9896_s0 + %s8744_s24]]   ;;  %s8752_s24 = smov 7  }
0x2861   :  { %v1338_v42 = vpop.permute.xlu0 %1337 }
0x2862   :  { %v1343_v43 = vmul.f32 %v8412_v14, %v1338_v42  ;;  %v7968_v42 = vpack.c.bf16 %v3046_v12, %v3045_v40 }
0x2864   :  { %v1364_v44 = vsel %vm1363_vm10, %v9029_v54, %v1343_v43  ;;  %v7946_v54 = vpack.c.bf16 %v3036_v52, %v3035_v50  ;;  %v3039_v43 = vld [vmem:[%s6623_s1] sm:$0xff]  ;;  %v3034_v50 = vld [vmem:[%s6611_s5 + $0x8] sm:$0xff] }
0x2865   :  { %3049 = vrot.lane.b32.xlu0 %v1364_v44, %s8728_s19  ;;  %v3040_v44 = vld [vmem:[%s6623_s1 + $0x8] sm:$0xff]  ;;  %v3033_v52 = vld [vmem:[%s6611_s5] sm:$0xff]  ;;  %vm3224_vm12 = vcmp.gt.f32.partialorder %v3034_v50, 0.5  ;;  %s6630_s5 = sld [smem:[%s9896_s0 + %s8746_s2]]   ;;  %s8754_s2 = smov 28  }
0x2866   :  { %v8422_v45 = vpop.eup %8421  ;;  %7947 = vmatprep.subr.bf16.mxu0 %v7946_v54  ;;  %vm3223_vm14 = vcmp.gt.f32.partialorder %v3033_v52, 0.5  ;;  %v3497_v52 = vld [vmem:[%s6626_s27] sm:$0xff] }
0x2867   :  { %1339 = vrot.lane.b32.xlu1 %v8422_v45, %s8727_s18  ;;  %7949 = vmatpush3.bf16.msra.mxu0 %v7946_v54  ;;  %v7972_v45 = vpack.c.bf16 %v3040_v44, %v3039_v43 }
0x2868   :  { %7951 = vmatprep.subr.bf16.mxu0 %v7950_v24 }
0x286b   :  { %7953 = vmatpush3.bf16.msra.mxu0 %v7950_v24 }
0x28b4   :  { %v2954_v46 = vpop.f32.mrb[24].mxu1 }
0x28b5   :  { %v2959_v47 = vrot.slane %v2954_v46, 1  ;;  %v7411_v49 = vpop.f32.mrb[25].mxu1 }
0x28b7   :  { %v2963_v51 = vadd.f32 %v2959_v47, %v9144_v61  ;;  %v2960_v61 = vrot.slane %v2954_v46, 2  ;;  %v3041_v46 = vld [vmem:[%s6623_s1 + $0x10] sm:$0xff]  ;;  %v3042_v47 = vld [vmem:[%s6623_s1 + $0x18] sm:$0xff]  ;;  %s6629_s1 = sld [smem:[%s9896_s0 + %s8745_s28]]   ;;  %s8753_s28 = smov 27  }
0x28b8   :  { %v7976_v49 = vpack.c.bf16 %v3042_v47, %v3041_v46 }
0x28b9   :  { %8423 = vtanh.f32 %v2963_v51  ;;  %v2964_v28 = vadd.f32 %v2960_v61, %v9142_v60  ;;  %v6730_v2 = vmul.f32 -1.442695, %v2963_v51 }
0x28bb   :  { %8425 = vtanh.f32 %v2964_v28  ;;  %v6731_v4 = vmul.f32 -1.442695, %v2964_v28 }
0x28bc   :  { %8427 = vpow2.f32 %v6730_v2 }
0x28c3   :  { %v8424_v56 = vpop.eup %8423 }
0x28c4   :  { %2989 = vrot.lane.b32.xlu0 %v8424_v56, %s8727_s18 }
0x28c5   :  { %v8426_v63 = vpop.eup %8425 }
0x28c6   :  { %v8428_v3 = vpop.eup %8427 }
0x28c7   :  { %v2971_v60 = vadd.f32 1.0, %v8428_v3 }
0x28c9   :  { %8429 = vrcp.f32 %v2971_v60 }
0x28ca   :  { %8431 = vpow2.f32 %v6731_v4 }
0x28d3   :  { %v8430_v5 = vpop.eup %8429 }
0x28d4   :  { %v8432_v29 = vpop.eup %8431  ;;  %v2985_v48 = vmul.f32 %v8430_v5, %v2981_v10 }
0x28d5   :  { %v2972_v26 = vadd.f32 1.0, %v8432_v29 }
0x28d7   :  { %v9308_v39 = vpop.permute.xlu0 %3049  ;;  %8433 = vrcp.f32 %v2972_v26 }
0x28d8   :  { %7420 = vmatprep.mubr.msk.f32.mxu0 %vm239_vm3, %v9308_v39 }
0x28d9   :  { %v1340_v41 = vpop.permute.xlu1 %1339 }
0x28da   :  { %v1344_v59 = vmul.f32 %v8418_v33, %v1340_v41 }
0x28dc   :  { %v1365_v22 = vsel %vm1363_vm10, %v9033_v57, %v1344_v59 }
0x28dd   :  { %3051 = vrot.lane.b32.xlu1 %v1365_v22, %s8728_s19 }
0x28e1   :  { %2991 = vrot.lane.b32.xlu1 %v8426_v63, %s8727_s18  ;;  %v8434_v32 = vpop.eup %8433 }
0x28e2   :  { %v2986_v16 = vmul.f32 %v8434_v32, %v2982_v27 }
0x2936   :  { %v2990_v6 = vpop.permute.xlu0 %2989 }
0x2937   :  { %v2995_v7 = vmul.f32 %v8430_v5, %v2990_v6  ;;  %v3494_v6 = vld [vmem:[%s6625_s9 + $0x8] sm:$0xff] }
0x2939   :  { %2999 = vrot.lane.b32.xlu0 %v2995_v7, %s8727_s18 }
0x294f   :  { %v9317_v57 = vpop.permute.xlu1 %3051 }
0x2950   :  { %7421 = vmatmul.mubr.msk.f32.vlgmr.msra.gmra.mrb[18].mxu0 %vm239_vm3, %v9317_v57  ;;  %v9362_v51 = vpack.c.bf16 %v9317_v57, %v9308_v39 }
0x2953   :  { %v2992_v8 = vpop.permute.xlu1 %2991 }
0x2954   :  { %v2996_v9 = vmul.f32 %v8434_v32, %v2992_v8  ;;  %v3495_v8 = vld [vmem:[%s6625_s9 + $0x10] sm:$0xff] }
0x2956   :  { %3001 = vrot.lane.b32.xlu1 %v2996_v9, %s8727_s18  ;;  %v3496_v9 = vld [vmem:[%s6625_s9 + $0x18] sm:$0xff] }
0x29ab   :  { %v3000_v14 = vpop.permute.xlu0 %2999 }
0x29ac   :  { %v3005_v30 = vadd.f32 %v3000_v14, %v2985_v48  ;;  %v7984_v14 = vpack.c.bf16 %v3496_v9, %v3495_v8 }
0x29ae   :  { %8435 = vtanh.f32 %v3005_v30  ;;  %v3501_v30 = vld [vmem:[%s6627_s13] sm:$0xff] }
0x29b8   :  { %v8436_v15 = vpop.eup %8435 }
0x29b9   :  { %3011 = vrot.lane.b32.xlu0 %v8436_v15, %s8727_s18  ;;  %v3502_v15 = vld [vmem:[%s6627_s13 + $0x8] sm:$0xff] }
0x29ba   :  { %v7998_v27 = vpack.c.bf16 %v3502_v15, %v3501_v30 }
0x29c8   :  { %v3002_v19 = vpop.permute.xlu1 %3001 }
0x29c9   :  { %v3006_v18 = vadd.f32 %v3002_v19, %v2986_v16 }
0x29cb   :  { %8437 = vtanh.f32 %v3006_v18  ;;  %v3503_v18 = vld [vmem:[%s6627_s13 + $0x10] sm:$0xff] }
0x29d5   :  { %v8438_v55 = vpop.eup %8437 }
0x29d6   :  { %3013 = vrot.lane.b32.xlu1 %v8438_v55, %s8727_s18  ;;  %v3504_v55 = vld [vmem:[%s6627_s13 + $0x18] sm:$0xff]  ;;  %s6632_s13 = sld [smem:[%s9896_s0 + %s8748_s10]]   ;;  %s8756_s10 = smov 29  }
0x2a23   :  { %v7422_v21 = vpop.f32.mrb[18].mxu0 }
0x2a24   :  { %v3123_v58 = vpop.f32.mrb[19].mxu0 }
0x2a25   :  { %7427 = vmatprep.mubr.msk.f32.mxu1 %vm239_vm3, %v3123_v58 }
0x2a2b   :  { %v3012_v20 = vpop.permute.xlu0 %3011 }
0x2a2c   :  { %v3017_v23 = vmul.f32 %v8430_v5, %v3012_v20  ;;  %v3493_v5 = vld [vmem:[%s6625_s9] sm:$0xff]  ;;  %v8002_v20 = vpack.c.bf16 %v3504_v55, %v3503_v18  ;;  %s6631_s9 = sld [smem:[%s9896_s0 + %s8747_s6]]   ;;  %s8755_s6 = smov 31  }
0x2a2d   :  { %v7980_v7 = vpack.c.bf16 %v3494_v6, %v3493_v5  ;;  %v4021_v5 = vld [vmem:[%s6629_s1 + $0x8] sm:$0xff] }
0x2a2e   :  { %v3031_v25 = vsel %vm1363_vm10, %v9283_v11, %v3017_v23 }
0x2a2f   :  { %3134 = vrot.lane.b32.xlu0 %v3031_v25, %s8728_s19 }
0x2a48   :  { %v3014_v31 = vpop.permute.xlu1 %3013 }
0x2a49   :  { %v3018_v62 = vmul.f32 %v8434_v32, %v3014_v31  ;;  %v3492_v31 = vld [vmem:[%s6612_s17 + $0x8] sm:$0xff] }
0x2a4a   :  { %vm3662_vm15 = vcmp.gt.f32.partialorder %v3492_v31, 0.5 }
0x2a4b   :  { %v3032_v33 = vsel %vm1363_vm10, %v9287_v13, %v3018_v62  ;;  %v3491_v62 = vld [vmem:[%s6612_s17] sm:$0xff]  ;;  %s6633_s17 = sld [smem:[%s9896_s0 + %s8749_s14]]  }
0x2a4c   :  { %3136 = vrot.lane.b32.xlu1 %v3032_v33, %s8728_s19  ;;  %vm3661_vm1 = vcmp.gt.f32.partialorder %v3491_v62, 0.5 }
0x2aa1   :  { %v9336_v36 = vpop.permute.xlu0 %3134 }
0x2abe   :  { %v9338_v37 = vpop.permute.xlu1 %3136 }
0x2abf   :  { %v7954_v13 = vpack.c.bf16 %v9338_v37, %v9336_v36 }
0x2ac1   :  { %7956 = vmatprep.subr.msk.bf16.mxu1 %vm9342_vm11, %v7954_v13  ;;  %7961 = vmatprep.subr.bf16.mxu0 %v7954_v13 }
0x2ac2   :  { %7959 = vmatpush3.bf16.xpose.msk.msra.mxu1 %vm9342_vm11, %v7954_v13  ;;  %7963 = vmatpush3.bf16.msra.mxu0 %v7954_v13 }
0x2ac3   :  { %7965 = vmatprep.subr.bf16.mxu1 %v7964_v38  ;;  %7981 = vmatprep.subr.bf16.mxu0 %v7980_v7 }
0x2ac9   :  { %7428 = vmatmul.mubr.msk.f32.vlgmr.msra.gmra.mrb[26].mxu1 %vm239_vm3, %v7422_v21 }
0x2aca   :  { %7967 = vmatpush3.bf16.msra.mxu1 %v7964_v38  ;;  %7445 = vmatprep.mubr.msk.f32.mxu1 %vm239_vm3, %v9308_v39 }
0x2acb   :  { %7969 = vmatprep.subr.bf16.mxu1 %v7968_v42 }
0x2ace   :  { %7971 = vmatpush3.bf16.msra.mxu1 %v7968_v42 }
0x2acf   :  { %7973 = vmatprep.subr.bf16.mxu1 %v7972_v45 }
0x2ad1   :  { %7446 = vmatmul.mubr.msk.f32.vlgmr.msra.gmra.mrb[28].mxu1 %vm239_vm3, %v9317_v57 }
0x2ad2   :  { %7975 = vmatpush3.bf16.msra.mxu1 %v7972_v45 }
0x2ad3   :  { %7977 = vmatprep.subr.bf16.mxu1 %v7976_v49 }
0x2ad6   :  { %7979 = vmatpush3.bf16.msra.mxu1 %v7976_v49  ;;  %v3928_v49 = vld [vmem:[%s6628_s23] sm:$0xff] }
0x2ad7   :  { %7995 = vmatprep.subr.bf16.mxu1 %v9362_v51 }
0x2b9c   :  { %v7429_v17 = vpop.f32.mrb[26].mxu1 }
0x2b9d   :  { %v3226_v54 = vsel %vm3224_vm12, -1e+30, %v7429_v17  ;;  %v3214_v53 = vpop.f32.mrb[27].mxu1  ;;  %v3498_v17 = vld [vmem:[%s6626_s27 + $0x8] sm:$0xff] }
0x2b9e   :  { %v3231_v24 = vsel %vm3227_vm13, %v3226_v54, -inf  ;;  %v3225_v56 = vsel %vm3223_vm14, -1e+30, %v3214_v53  ;;  %v8006_v53 = vpack.c.bf16 %v3498_v17, %v3497_v52 }
0x2b9f   :  { %v3228_v61 = vsel %vm3227_vm13, %v3225_v56, -inf  ;;  %3232 = vmax.xlane.f32.xlu1 %v3231_v24  ;;  %v3500_v24 = vld [vmem:[%s6626_s27 + $0x18] sm:$0xff] }
0x2ba0   :  { %3229 = vmax.xlane.f32.xlu0 %v3228_v61 }
0x2c2c   :  { %v3233_v28 = vpop.xlane.xlu1 %3232 }
0x2c2d   :  { %v3235_v39 = vsub.f32 %v3226_v54, %v3233_v28  ;;  %v3230_v41 = vpop.xlane.xlu0 %3229  ;;  %v3499_v54 = vld [vmem:[%s6626_s27 + $0x10] sm:$0xff]  ;;  %s6614_s27 = sld [smem:[%s9896_s0 + %s8752_s24]]  }
0x2c2e   :  { %v3234_v59 = vsub.f32 %v3225_v56, %v3230_v41  ;;  %v8010_v56 = vpack.c.bf16 %v3500_v24, %v3499_v54  ;;  %v3930_v41 = vld [vmem:[%s6628_s23 + $0x10] sm:$0xff] }
0x2c2f   :  { %v3238_v22 = vmul.f32 1.442695, %v3235_v39 }
0x2c30   :  { %v3236_v63 = vmul.f32 1.442695, %v3234_v59  ;;  %v3931_v59 = vld [vmem:[%s6628_s23 + $0x18] sm:$0xff] }
0x2c32   :  { %8439 = vpow2.f32 %v3236_v63 }
0x2c33   :  { %8441 = vpow2.f32 %v3238_v22 }
0x2c3c   :  { %v8440_v2 = vpop.eup %8439 }
0x2c3d   :  { %v3240_v3 = vsel %vm3227_vm13, %v8440_v2, 0.0  ;;  %v8442_v60 = vpop.eup %8441 }
0x2c3e   :  { %3241 = vadd.xlane.f32.xlu0 %v3240_v3  ;;  %v3243_v4 = vsel %vm3227_vm13, %v8442_v60, 0.0  ;;  %v8018_v3 = vpack.c.bf16 %v3931_v59, %v3930_v41 }
0x2c42   :  { %3244 = vadd.xlane.f32.xlu0 %v3243_v4  ;;  %v4020_v4 = vld [vmem:[%s6629_s1] sm:$0xff] }
0x2c43   :  { %v9419_v6 = vpack.c.bf16 %v4021_v5, %v4020_v4 }
0x2ccb   :  { %v3242_v29 = vpop.xlane.xlu0 %3241 }
0x2ccc   :  { %8443 = vrcp.f32 %v3242_v29  ;;  %v4023_v29 = vld [vmem:[%s6629_s1 + $0x18] sm:$0xff] }
0x2ccf   :  { %v3245_v26 = vpop.xlane.xlu0 %3244 }
0x2cd0   :  { %8445 = vrcp.f32 %v3245_v26 }
0x2cd6   :  { %v8444_v57 = vpop.eup %8443 }
0x2cd7   :  { %v3248_v32 = vmul.f32 %v8444_v57, %v8440_v2 }
0x2cd9   :  { %7434 = vmatprep.mubr.msk.f32.mxu0 %vm3227_vm13, %v3248_v32 }
0x2cda   :  { %v8446_v10 = vpop.eup %8445 }
0x2cdb   :  { %v3249_v48 = vmul.f32 %v8446_v10, %v8442_v60 }
0x2cdd   :  { %7435 = vmatmul.mubr.msk.f32.vlgmr.msra.gmra.mrb[20].mxu0 %vm3227_vm13, %v3249_v48  ;;  %v6756_v48 = vld [vmem:[%s6630_s5] ss:$0 sm:$0xff]  ;;  %s6635_s5 = sld [smem:[%s9896_s0 + %s8754_s2]]  }
0x2cde   :  { %7983 = vmatpush3.bf16.msra.mxu0 %v7980_v7  ;;  %7467 = vmatprep.mubr.msk.f32.mxu0 %vm239_vm3, %v9336_v36  ;;  %v4022_v7 = vld [vmem:[%s6629_s1 + $0x10] sm:$0xff]  ;;  %s6634_s1 = sld [smem:[%s9896_s0 + %s8753_s28]]  }
0x2cdf   :  { %7985 = vmatprep.subr.bf16.mxu0 %v7984_v14  ;;  %v9424_v57 = vpack.c.bf16 %v4023_v29, %v4022_v7 }
0x2ce2   :  { %7987 = vmatpush3.bf16.msra.mxu0 %v7984_v14 }
0x2ce3   :  { %7990 = vmatprep.subr.msk.bf16.mxu0 %vm9342_vm11, %v9362_v51 }
0x2ce5   :  { %7468 = vmatmul.mubr.msk.f32.vlgmr.msra.gmra.mrb[22].mxu0 %vm239_vm3, %v9338_v37 }
0x2ceb   :  { %7993 = vmatpush3.bf16.xpose.msk.msra.mxu0 %vm9342_vm11, %v9362_v51 }
0x2cec   :  { %7999 = vmatprep.subr.bf16.mxu0 %v7998_v27 }
0x2db0   :  { %v7436_v16 = vpop.f32.mrb[20].mxu0 }
0x2db1   :  { %v3324_v19 = vpop.f32.mrb[21].mxu0 }
0x2db2   :  { %7456 = vmatprep.mubr.msk.f32.mxu1 %vm239_vm3, %v3324_v19 }
0x2db3   :  { %7457 = vmatmul.mubr.msk.f32.vlgmr.msra.gmra.mrb[28].mxu1 %vm239_vm3, %v7436_v16 }
0x2db4   :  { %7997 = vmatpush3.bf16.msra.mxu1 %v9362_v51  ;;  %v3929_v51 = vld [vmem:[%s6628_s23 + $0x8] sm:$0xff]  ;;  %s6613_s23 = sld [smem:[%s9896_s0 + %s8751_s20]]  }
0x2db5   :  { %v8014_v50 = vpack.c.bf16 %v3929_v51, %v3928_v49 }
0x2db7   :  { %8015 = vmatprep.subr.bf16.mxu1 %v8014_v50 }
0x2db8   :  { %v7469_v21 = vpop.f32.mrb[22].mxu0 }
0x2db9   :  { %v3571_v58 = vpop.f32.mrb[23].mxu0 }
0x2dba   :  { %7474 = vmatprep.mubr.msk.f32.mxu0 %vm239_vm3, %v3571_v58 }
0x2dbb   :  { %7475 = vmatmul.mubr.msk.f32.vlgmr.msra.gmra.mrb[24].mxu0 %vm239_vm3, %v7469_v21 }
0x2dbc   :  { %8001 = vmatpush3.bf16.msra.mxu0 %v7998_v27  ;;  %7492 = vmatprep.mubr.msk.f32.mxu0 %vm239_vm3, %v9336_v36 }
0x2dbd   :  { %8003 = vmatprep.subr.bf16.mxu0 %v8002_v20 }
0x2dc0   :  { %8005 = vmatpush3.bf16.msra.mxu0 %v8002_v20 }
0x2dc1   :  { %8007 = vmatprep.subr.bf16.mxu0 %v8006_v53 }
0x2dc3   :  { %7493 = vmatmul.mubr.msk.f32.vlgmr.msra.gmra.mrb[26].mxu0 %vm239_vm3, %v9338_v37 }
0x2dc4   :  { %8009 = vmatpush3.bf16.msra.mxu0 %v8006_v53 }
0x2dc5   :  { %8011 = vmatprep.subr.bf16.mxu0 %v8010_v56 }
0x2dc8   :  { %8013 = vmatpush3.bf16.msra.mxu0 %v8010_v56 }
0x2dc9   :  { %8028 = vmatprep.subr.bf16.mxu0 %v8722_v0 }
0x2e86   :  { %v7458_v23 = vpop.f32.mrb[28].mxu1 }
0x2e87   :  { %v3480_v25 = vpop.f32.mrb[29].mxu1 }
0x2e8e   :  { %v7476_v33 = vpop.f32.mrb[24].mxu0 }
0x2e8f   :  { %v3664_v34 = vsel %vm3662_vm15, -1e+30, %v7476_v33  ;;  %v3652_v35 = vpop.f32.mrb[25].mxu0 }
0x2e90   :  { %v3668_v36 = vsel %vm3227_vm13, %v3664_v34, -inf  ;;  %v3663_v11 = vsel %vm3661_vm1, -1e+30, %v3652_v35 }
0x2e91   :  { %v3665_v13 = vsel %vm3227_vm13, %v3663_v11, -inf  ;;  %3669 = vmax.xlane.f32.xlu0 %v3668_v36 }
0x2e92   :  { %3666 = vmax.xlane.f32.xlu1 %v3665_v13 }
0x2f1e   :  { %v3670_v37 = vpop.xlane.xlu0 %3669 }
0x2f1f   :  { %v3672_v38 = vsub.f32 %v3664_v34, %v3670_v37  ;;  %v3667_v40 = vpop.xlane.xlu1 %3666 }
0x2f20   :  { %v3671_v12 = vsub.f32 %v3663_v11, %v3667_v40 }
0x2f21   :  { %v3675_v42 = vmul.f32 1.442695, %v3672_v38 }
0x2f22   :  { %v3673_v43 = vmul.f32 1.442695, %v3671_v12 }
0x2f23   :  { %8447 = vpow2.f32 %v3675_v42 }
0x2f24   :  { %8449 = vpow2.f32 %v3673_v43 }
0x2f2d   :  { %v8448_v44 = vpop.eup %8447 }
0x2f2e   :  { %v8450_v45 = vpop.eup %8449  ;;  %v3680_v46 = vsel %vm3227_vm13, %v8448_v44, 0.0 }
0x2f2f   :  { %3681 = vadd.xlane.f32.xlu0 %v3680_v46  ;;  %v3677_v47 = vsel %vm3227_vm13, %v8450_v45, 0.0 }
0x2f30   :  { %3678 = vadd.xlane.f32.xlu1 %v3677_v47 }
0x2fbc   :  { %v3682_v61 = vpop.xlane.xlu0 %3681 }
0x2fbd   :  { %8451 = vrcp.f32 %v3682_v61  ;;  %v3679_v28 = vpop.xlane.xlu1 %3678 }
0x2fbe   :  { %8453 = vrcp.f32 %v3679_v28 }
0x2fbf   :  { %8455 = vtanh.f32 %v3480_v25 }
0x2fc0   :  { %8457 = vtanh.f32 %v7458_v23 }
0x2fc7   :  { %v8452_v39 = vpop.eup %8451 }
0x2fc8   :  { %v8454_v22 = vpop.eup %8453  ;;  %v3686_v2 = vmul.f32 %v8452_v39, %v8448_v44 }
0x2fc9   :  { %v3685_v63 = vmul.f32 %v8454_v22, %v8450_v45  ;;  %v8456_v60 = vpop.eup %8455 }
0x2fca   :  { %v8458_v26 = vpop.eup %8457 }
0x2fcb   :  { %7481 = vmatprep.mubr.msk.f32.mxu1 %vm3227_vm13, %v3685_v63 }
0x2fcc   :  { %7482 = vmatmul.mubr.msk.f32.vlgmr.msra.gmra.mrb[30].mxu1 %vm3227_vm13, %v3686_v2 }
0x2fcd   :  { %8017 = vmatpush3.bf16.msra.mxu1 %v8014_v50  ;;  %7514 = vmatprep.mubr.msk.f32.mxu1 %vm239_vm3, %v8456_v60 }
0x2fce   :  { %8019 = vmatprep.subr.bf16.mxu1 %v8018_v3 }
0x2fd1   :  { %8021 = vmatpush3.bf16.msra.mxu1 %v8018_v3 }
0x2fd2   :  { %8022 = vmatprep.subr.bf16.mxu1 %v8722_v0 }
0x2fd4   :  { %7515 = vmatmul.mubr.msk.f32.vlgmr.msra.gmra.mrb[32].mxu1 %vm239_vm3, %v8458_v26 }
0x2fd5   :  { %8024 = vmatpush3.bf16.msra.mxu1 %v9419_v6  ;;  %7525 = vmatprep.mubr.msk.f32.mxu1 %vm8724_vm0, %v8725_v1 }
0x2fd6   :  { %8025 = vmatprep.subr.bf16.mxu1 %v8722_v0 }
0x2fd9   :  { %8027 = vmatpush3.bf16.msra.mxu1 %v9424_v57 }
0x2fda   :  { %8034 = vmatprep.subr.bf16.mxu1 %v8722_v0 }
0x2fdc   :  { %7526 = vmatmul.mubr.f32.vlgmr.msra.gmra.mrb[34].mxu1 %v8725_v1 }
0x2fdd   :  { %8036 = vmatpush3.bf16.msra.mxu1 %v9419_v6  ;;  %7547 = vmatprep.mubr.msk.f32.mxu1 %vm8724_vm0, %v8725_v1 }
0x2fde   :  { %8037 = vmatprep.subr.bf16.mxu1 %v8722_v0 }
0x2fe1   :  { %8039 = vmatpush3.bf16.msra.mxu1 %v9424_v57 }
0x2fe2   :  { %8046 = vmatprep.subr.bf16.mxu1 %v8722_v0 }
0x309f   :  { %v7483_v32 = vpop.f32.mrb[30].mxu1 }
0x30a0   :  { %v3761_v8 = vpop.f32.mrb[31].mxu1 }
0x30a1   :  { %7503 = vmatprep.mubr.msk.f32.mxu0 %vm239_vm3, %v3761_v8 }
0x30a2   :  { %7504 = vmatmul.mubr.msk.f32.vlgmr.msra.gmra.mrb[26].mxu0 %vm239_vm3, %v7483_v32 }
0x30a3   :  { %8030 = vmatpush3.bf16.msra.mxu0 %v9419_v6  ;;  %7536 = vmatprep.mubr.msk.f32.mxu0 %vm8724_vm0, %v8725_v1 }
0x30a4   :  { %8031 = vmatprep.subr.bf16.mxu0 %v8722_v0 }
0x30a7   :  { %v7516_v9 = vpop.f32.mrb[32].mxu1  ;;  %8033 = vmatpush3.bf16.msra.mxu0 %v9424_v57 }
0x30a8   :  { %v4011_v10 = vpop.f32.mrb[33].mxu1  ;;  %8040 = vmatprep.subr.bf16.mxu0 %v8722_v0  ;;  %v9451_v15 = vadd.f32 %v7516_v9, %v6756_v48 }
0x30a9   :  { %v9449_v14 = vadd.f32 %v6756_v48, %v4011_v10 }
0x30af   :  { %v4090_v30 = vpop.f32.mrb[34].mxu1 }
0x30b0   :  { %v4095_v27 = vrot.slane %v4090_v30, 1  ;;  %v4098_v16 = vadd.f32 %v4090_v30, %v9449_v14  ;;  %v7527_v19 = vpop.f32.mrb[35].mxu1 }
0x30b2   :  { %v4099_v18 = vadd.f32 %v4095_v27, %v9451_v15  ;;  %8459 = vtanh.f32 %v4098_v16  ;;  %v6759_v20 = vmul.f32 -1.442695, %v4098_v16 }
0x30b4   :  { %8461 = vtanh.f32 %v4099_v18  ;;  %v6760_v58 = vmul.f32 -1.442695, %v4099_v18 }
0x30b6   :  { %8463 = vpow2.f32 %v6760_v58 }
0x30b7   :  { %8465 = vpow2.f32 %v6759_v20 }
0x30bc   :  { %v8460_v55 = vpop.eup %8459 }
0x30bd   :  { %4118 = vrot.lane.b32.xlu0 %v8460_v55, %s8727_s18 }
0x30be   :  { %v8462_v21 = vpop.eup %8461 }
0x30bf   :  { %4120 = vrot.lane.b32.xlu1 %v8462_v21, %s8727_s18 }
0x30c0   :  { %v8464_v23 = vpop.eup %8463 }
0x30c1   :  { %v4107_v25 = vadd.f32 1.0, %v8464_v23  ;;  %v8466_v31 = vpop.eup %8465 }
0x30c2   :  { %v4106_v62 = vadd.f32 1.0, %v8466_v31 }
0x30c3   :  { %8467 = vrcp.f32 %v4107_v25 }
0x30c4   :  { %8469 = vrcp.f32 %v4106_v62 }
0x30cd   :  { %v8468_v33 = vpop.eup %8467 }
0x30ce   :  { %v8470_v11 = vpop.eup %8469  ;;  %v4115_v40 = vmul.f32 0.0, %v8468_v33 }
0x30cf   :  { %v4114_v43 = vmul.f32 0.0, %v8470_v11 }
0x312f   :  { %v4119_v36 = vpop.permute.xlu0 %4118 }
0x3130   :  { %v4124_v13 = vmul.f32 %v8470_v11, %v4119_v36 }
0x3131   :  { %v4121_v34 = vpop.permute.xlu1 %4120 }
0x3132   :  { %v4125_v35 = vmul.f32 %v8468_v33, %v4121_v34 }
0x3134   :  { %4130 = vrot.lane.b32.xlu1 %v4125_v35, %s8727_s18 }
0x3138   :  { %4128 = vrot.lane.b32.xlu1 %v4124_v13, %s8727_s18 }
0x3175   :  { %v9459_v37 = vpop.f32.mrb[26].mxu0 }
0x3176   :  { %v9461_v38 = vpop.f32.mrb[27].mxu0 }
0x31a6   :  { %v4131_v12 = vpop.permute.xlu1 %4130 }
0x31a7   :  { %v4135_v42 = vadd.f32 %v4131_v12, %v4115_v40 }
0x31a9   :  { %8471 = vtanh.f32 %v4135_v42  ;;  %v4249_v9 = vrot.slane %v4135_v42, 7 }
0x31aa   :  { %v4129_v44 = vpop.permute.xlu1 %4128 }
0x31ab   :  { %v4134_v45 = vadd.f32 %v4129_v44, %v4114_v43 }
0x31ad   :  { %8473 = vtanh.f32 %v4134_v45  ;;  %v4248_v48 = vrot.slane %v4134_v45, 7 }
0x31b3   :  { %v8472_v46 = vpop.eup %8471 }
0x31b4   :  { %4142 = vrot.lane.b32.xlu0 %v8472_v46, %s8727_s18 }
0x31b7   :  { %v8474_v47 = vpop.eup %8473 }
0x31b8   :  { %4140 = vrot.lane.b32.xlu1 %v8474_v47, %s8727_s18 }
0x3226   :  { %v4143_v49 = vpop.permute.xlu0 %4142 }
0x3227   :  { %v9465_v51 = vmul.f32 %v8468_v33, %v4143_v49 }
0x3229   :  { %v4150_v52 = vrot.slane %v9465_v51, 7 }
0x322a   :  { %v4141_v50 = vpop.permute.xlu1 %4140 }
0x322b   :  { %v9468_v17 = vmul.f32 %v8470_v11, %v4141_v50 }
0x322d   :  { %v4151_v54 = vsel %vm370_vm2, %v4150_v52, %v9468_v17 }
0x322e   :  { %4152 = vrot.lane.b32.xlu0 %v4151_v54, %s8728_s19 }
0x32a0   :  { %v4153_v53 = vpop.permute.xlu0 %4152 }
0x32a1   :  { %7537 = vmatmul.mubr.msk.f32.vlgmr.msra.gmra.mrb[28].mxu0 %vm239_vm3, %v4153_v53 }
0x32a2   :  { %8042 = vmatpush3.bf16.msra.mxu0 %v9419_v6  ;;  %7558 = vmatprep.mubr.msk.f32.mxu0 %vm8724_vm0, %v8725_v1 }
0x32a3   :  { %8043 = vmatprep.subr.bf16.mxu0 %v8722_v0 }
0x32a6   :  { %8045 = vmatpush3.bf16.msra.mxu0 %v9424_v57 }
0x32a7   :  { %8052 = vmatprep.subr.bf16.mxu0 %v8722_v0 }
0x3374   :  { %v4222_v24 = vpop.f32.mrb[28].mxu0 }
0x3375   :  { %v4227_v56 = vrot.slane %v4222_v24, 7  ;;  %v4231_v61 = vadd.f32 %v4222_v24, %v9451_v15  ;;  %v7538_v28 = vpop.f32.mrb[29].mxu0 }
0x3377   :  { %v4230_v39 = vadd.f32 %v4227_v56, %v9449_v14  ;;  %8475 = vtanh.f32 %v4231_v61  ;;  %v6763_v22 = vmul.f32 -1.442695, %v4231_v61 }
0x3379   :  { %8477 = vtanh.f32 %v4230_v39  ;;  %v6762_v63 = vmul.f32 -1.442695, %v4230_v39 }
0x337a   :  { %8479 = vpow2.f32 %v6763_v22 }
0x337b   :  { %8481 = vpow2.f32 %v6762_v63 }
0x3381   :  { %v8476_v41 = vpop.eup %8475 }
0x3382   :  { %4258 = vrot.lane.b32.xlu0 %v8476_v41, %s8727_s18 }
0x3383   :  { %v8478_v59 = vpop.eup %8477 }
0x3384   :  { %4256 = vrot.lane.b32.xlu1 %v8478_v59, %s8727_s18  ;;  %v8480_v2 = vpop.eup %8479 }
0x3385   :  { %v8482_v3 = vpop.eup %8481  ;;  %v4239_v60 = vadd.f32 1.0, %v8480_v2 }
0x3386   :  { %v4238_v4 = vadd.f32 1.0, %v8482_v3 }
0x3387   :  { %8483 = vrcp.f32 %v4239_v60 }
0x3388   :  { %8485 = vrcp.f32 %v4238_v4 }
0x3391   :  { %v8484_v5 = vpop.eup %8483 }
0x3392   :  { %v8486_v26 = vpop.eup %8485  ;;  %v4253_v10 = vmul.f32 %v8484_v5, %v4249_v9 }
0x3393   :  { %v4252_v16 = vmul.f32 %v8486_v26, %v4248_v48 }
0x33f4   :  { %v4259_v7 = vpop.permute.xlu0 %4258 }
0x33f5   :  { %v4263_v29 = vmul.f32 %v8484_v5, %v4259_v7 }
0x33f6   :  { %v4257_v32 = vpop.permute.xlu1 %4256 }
0x33f7   :  { %4268 = vrot.lane.b32.xlu0 %v4263_v29, %s8727_s18  ;;  %v4262_v8 = vmul.f32 %v8486_v26, %v4257_v32 }
0x33f9   :  { %4266 = vrot.lane.b32.xlu1 %v4262_v8, %s8727_s18 }
0x3469   :  { %v4269_v30 = vpop.permute.xlu0 %4268 }
0x346a   :  { %v4273_v27 = vadd.f32 %v4269_v30, %v4253_v10 }
0x346b   :  { %v4267_v19 = vpop.permute.xlu1 %4266 }
0x346c   :  { %8487 = vtanh.f32 %v4273_v27  ;;  %v4272_v18 = vadd.f32 %v4267_v19, %v4252_v16  ;;  %v4388_v28 = vrot.slane %v4273_v27, 7 }
0x346e   :  { %8489 = vtanh.f32 %v4272_v18  ;;  %v4387_v61 = vrot.slane %v4272_v18, 7 }
0x3476   :  { %v8488_v55 = vpop.eup %8487 }
0x3477   :  { %4280 = vrot.lane.b32.xlu0 %v8488_v55, %s8727_s18 }
0x3478   :  { %v8490_v21 = vpop.eup %8489 }
0x3479   :  { %4278 = vrot.lane.b32.xlu1 %v8490_v21, %s8727_s18 }
0x34e9   :  { %v4281_v58 = vpop.permute.xlu0 %4280 }
0x34ea   :  { %v4285_v25 = vmul.f32 %v8484_v5, %v4281_v58 }
0x34eb   :  { %v4279_v20 = vpop.permute.xlu1 %4278 }
0x34ec   :  { %v4284_v23 = vmul.f32 %v8486_v26, %v4279_v20  ;;  %v5126_v32 = vsel %vm1345_vm4, %v9465_v51, %v4285_v25 }
0x34ee   :  { %v4288_v31 = vrot.slane %v4284_v23, 1  ;;  %v5125_v29 = vsel %vm1345_vm4, %v9468_v17, %v4284_v23 }
0x34f0   :  { %v4289_v62 = vsel %vm370_vm2, %v4285_v25, %v4288_v31 }
0x34f1   :  { %4290 = vrot.lane.b32.xlu1 %v4289_v62, %s8728_s19 }
0x3563   :  { %v4291_v33 = vpop.permute.xlu1 %4290 }
0x3564   :  { %7548 = vmatmul.mubr.msk.f32.vlgmr.msra.gmra.mrb[36].mxu1 %vm239_vm3, %v4291_v33 }
0x3565   :  { %8048 = vmatpush3.bf16.msra.mxu1 %v9419_v6  ;;  %7569 = vmatprep.mubr.msk.f32.mxu1 %vm8724_vm0, %v8725_v1 }
0x3566   :  { %8049 = vmatprep.subr.bf16.mxu1 %v8722_v0 }
0x3569   :  { %8051 = vmatpush3.bf16.msra.mxu1 %v9424_v57 }
0x356a   :  { %8058 = vmatprep.subr.bf16.mxu1 %v8722_v0 }
0x3637   :  { %v4360_v34 = vpop.f32.mrb[36].mxu1 }
0x3638   :  { %v4365_v35 = vrot.slane %v4360_v34, 6  ;;  %v4366_v36 = vrot.slane %v4360_v34, 7  ;;  %v7549_v11 = vpop.f32.mrb[37].mxu1 }
0x363a   :  { %v4369_v13 = vadd.f32 %v4365_v35, %v9449_v14  ;;  %v4370_v40 = vadd.f32 %v4366_v36, %v9451_v15 }
0x363c   :  { %8491 = vtanh.f32 %v4369_v13  ;;  %v6765_v43 = vmul.f32 -1.442695, %v4369_v13  ;;  %v6766_v44 = vmul.f32 -1.442695, %v4370_v40 }
0x363d   :  { %8493 = vtanh.f32 %v4370_v40 }
0x363e   :  { %8495 = vpow2.f32 %v6765_v43 }
0x363f   :  { %8497 = vpow2.f32 %v6766_v44 }
0x3646   :  { %v8492_v12 = vpop.eup %8491 }
0x3647   :  { %v8494_v42 = vpop.eup %8493  ;;  %4395 = vrot.lane.b32.xlu0 %v8492_v12, %s8727_s18 }
0x3648   :  { %4397 = vrot.lane.b32.xlu1 %v8494_v42, %s8727_s18  ;;  %v8496_v45 = vpop.eup %8495 }
0x3649   :  { %v8498_v46 = vpop.eup %8497  ;;  %v4377_v47 = vadd.f32 1.0, %v8496_v45 }
0x364a   :  { %v4378_v49 = vadd.f32 1.0, %v8498_v46 }
0x364b   :  { %8499 = vrcp.f32 %v4377_v47 }
0x364c   :  { %8501 = vrcp.f32 %v4378_v49 }
0x3655   :  { %v8500_v50 = vpop.eup %8499 }
0x3656   :  { %v8502_v54 = vpop.eup %8501  ;;  %v4391_v39 = vmul.f32 %v8500_v50, %v4387_v61 }
0x3657   :  { %v4392_v41 = vmul.f32 %v8502_v54, %v4388_v28 }
0x36b9   :  { %v4396_v52 = vpop.permute.xlu0 %4395 }
0x36ba   :  { %v4398_v53 = vpop.permute.xlu1 %4397  ;;  %v4401_v24 = vmul.f32 %v8500_v50, %v4396_v52 }
0x36bb   :  { %v4402_v56 = vmul.f32 %v8502_v54, %v4398_v53 }
0x36bc   :  { %4405 = vrot.lane.b32.xlu0 %v4401_v24, %s8727_s18 }
0x36bd   :  { %4407 = vrot.lane.b32.xlu1 %v4402_v56, %s8727_s18 }
0x372e   :  { %v4406_v59 = vpop.permute.xlu0 %4405 }
0x372f   :  { %v4408_v22 = vpop.permute.xlu1 %4407  ;;  %v4411_v63 = vadd.f32 %v4406_v59, %v4391_v39 }
0x3730   :  { %v4412_v2 = vadd.f32 %v4408_v22, %v4392_v41 }
0x3731   :  { %8503 = vtanh.f32 %v4411_v63  ;;  %v4527_v12 = vrot.slane %v4411_v63, 7 }
0x3732   :  { %8505 = vtanh.f32 %v4412_v2  ;;  %v4528_v42 = vrot.slane %v4412_v2, 7 }
0x373b   :  { %v8504_v3 = vpop.eup %8503 }
0x373c   :  { %v8506_v60 = vpop.eup %8505  ;;  %4417 = vrot.lane.b32.xlu0 %v8504_v3, %s8727_s18 }
0x373d   :  { %4419 = vrot.lane.b32.xlu1 %v8506_v60, %s8727_s18 }
0x37ae   :  { %v4418_v4 = vpop.permute.xlu0 %4417 }
0x37af   :  { %v4420_v5 = vpop.permute.xlu1 %4419  ;;  %v4423_v7 = vmul.f32 %v8500_v50, %v4418_v4 }
0x37b0   :  { %v4424_v26 = vmul.f32 %v8502_v54, %v4420_v5 }
0x37b1   :  { %v4427_v8 = vrot.slane %v4423_v7, 2  ;;  %v5127_v9 = vsel %vm1348_vm5, %v5125_v29, %v4423_v7 }
0x37b2   :  { %v4428_v10 = vrot.slane %v4424_v26, 1  ;;  %v5128_v48 = vsel %vm1348_vm5, %v5126_v32, %v4424_v26 }
0x37b4   :  { %v4429_v30 = vsel %vm370_vm2, %v4428_v10, %v4427_v8 }
0x37b5   :  { %4430 = vrot.lane.b32.xlu0 %v4429_v30, %s8728_s19 }
0x3827   :  { %v4431_v27 = vpop.permute.xlu0 %4430 }
0x3828   :  { %7559 = vmatmul.mubr.msk.f32.vlgmr.msra.gmra.mrb[30].mxu0 %vm239_vm3, %v4431_v27 }
0x3829   :  { %8054 = vmatpush3.bf16.msra.mxu0 %v9419_v6  ;;  %7580 = vmatprep.mubr.msk.f32.mxu0 %vm8724_vm0, %v8725_v1 }
0x382a   :  { %8055 = vmatprep.subr.bf16.mxu0 %v8722_v0 }
0x382d   :  { %8057 = vmatpush3.bf16.msra.mxu0 %v9424_v57 }
0x382e   :  { %8064 = vmatprep.subr.bf16.mxu0 %v8722_v0 }
0x38fb   :  { %v4500_v51 = vpop.f32.mrb[30].mxu0 }
0x38fc   :  { %v4505_v17 = vrot.slane %v4500_v51, 5  ;;  %v4506_v16 = vrot.slane %v4500_v51, 6  ;;  %v7560_v19 = vpop.f32.mrb[31].mxu0 }
0x38fe   :  { %v4509_v18 = vadd.f32 %v4505_v17, %v9449_v14  ;;  %v4510_v55 = vadd.f32 %v4506_v16, %v9451_v15 }
0x3900   :  { %8507 = vtanh.f32 %v4509_v18  ;;  %v6768_v20 = vmul.f32 -1.442695, %v4509_v18  ;;  %v6769_v23 = vmul.f32 -1.442695, %v4510_v55 }
0x3901   :  { %8509 = vtanh.f32 %v4510_v55 }
0x3902   :  { %8511 = vpow2.f32 %v6768_v20 }
0x3903   :  { %8513 = vpow2.f32 %v6769_v23 }
0x390a   :  { %v8508_v21 = vpop.eup %8507 }
0x390b   :  { %v8510_v58 = vpop.eup %8509  ;;  %4535 = vrot.lane.b32.xlu1 %v8508_v21, %s8727_s18 }
0x390c   :  { %4537 = vrot.lane.b32.xlu0 %v8510_v58, %s8727_s18  ;;  %v8512_v25 = vpop.eup %8511 }
0x390d   :  { %v8514_v31 = vpop.eup %8513  ;;  %v4517_v62 = vadd.f32 1.0, %v8512_v25 }
0x390e   :  { %v4518_v33 = vadd.f32 1.0, %v8514_v31 }
0x390f   :  { %8515 = vrcp.f32 %v4517_v62 }
0x3910   :  { %8517 = vrcp.f32 %v4518_v33 }
0x3919   :  { %v8516_v34 = vpop.eup %8515 }
0x391a   :  { %v8518_v36 = vpop.eup %8517  ;;  %v4531_v43 = vmul.f32 %v8516_v34, %v4527_v12 }
0x391b   :  { %v4532_v44 = vmul.f32 %v8518_v36, %v4528_v42 }
0x397d   :  { %v4536_v35 = vpop.permute.xlu1 %4535 }
0x397e   :  { %v4538_v11 = vpop.permute.xlu0 %4537  ;;  %v4541_v13 = vmul.f32 %v8516_v34, %v4536_v35 }
0x397f   :  { %v4542_v40 = vmul.f32 %v8518_v36, %v4538_v11 }
0x3980   :  { %4545 = vrot.lane.b32.xlu1 %v4541_v13, %s8727_s18 }
0x3981   :  { %4547 = vrot.lane.b32.xlu0 %v4542_v40, %s8727_s18 }
0x39f2   :  { %v4546_v45 = vpop.permute.xlu1 %4545 }
0x39f3   :  { %v4548_v46 = vpop.permute.xlu0 %4547  ;;  %v4551_v47 = vadd.f32 %v4546_v45, %v4531_v43 }
0x39f4   :  { %v4552_v49 = vadd.f32 %v4548_v46, %v4532_v44 }
0x39f5   :  { %8519 = vtanh.f32 %v4551_v47  ;;  %v4667_v18 = vrot.slane %v4551_v47, 7 }
0x39f6   :  { %8521 = vtanh.f32 %v4552_v49  ;;  %v4668_v55 = vrot.slane %v4552_v49, 7 }
0x39ff   :  { %v8520_v50 = vpop.eup %8519 }
0x3a00   :  { %v8522_v52 = vpop.eup %8521  ;;  %4557 = vrot.lane.b32.xlu1 %v8520_v50, %s8727_s18 }
0x3a01   :  { %4559 = vrot.lane.b32.xlu0 %v8522_v52, %s8727_s18 }
0x3a72   :  { %v4558_v54 = vpop.permute.xlu1 %4557 }
0x3a73   :  { %v4560_v53 = vpop.permute.xlu0 %4559  ;;  %v4563_v24 = vmul.f32 %v8516_v34, %v4558_v54 }
0x3a74   :  { %v4564_v56 = vmul.f32 %v8518_v36, %v4560_v53 }
0x3a75   :  { %v4567_v61 = vrot.slane %v4563_v24, 3  ;;  %v5129_v28 = vsel %vm1351_vm6, %v5127_v9, %v4563_v24 }
0x3a76   :  { %v4568_v39 = vrot.slane %v4564_v56, 2  ;;  %v5130_v41 = vsel %vm1351_vm6, %v5128_v48, %v4564_v56 }
0x3a78   :  { %v4569_v59 = vsel %vm370_vm2, %v4568_v39, %v4567_v61 }
0x3a79   :  { %4570 = vrot.lane.b32.xlu1 %v4569_v59, %s8728_s19 }
0x3aeb   :  { %v4571_v22 = vpop.permute.xlu1 %4570 }
0x3aec   :  { %7570 = vmatmul.mubr.msk.f32.vlgmr.msra.gmra.mrb[38].mxu1 %vm239_vm3, %v4571_v22 }
0x3aed   :  { %8060 = vmatpush3.bf16.msra.mxu1 %v9419_v6  ;;  %7591 = vmatprep.mubr.msk.f32.mxu1 %vm8724_vm0, %v8725_v1 }
0x3aee   :  { %8061 = vmatprep.subr.bf16.mxu1 %v8722_v0 }
0x3af1   :  { %8063 = vmatpush3.bf16.msra.mxu1 %v9424_v57 }
0x3bbf   :  { %v4640_v63 = vpop.f32.mrb[38].mxu1 }
0x3bc0   :  { %v4645_v2 = vrot.slane %v4640_v63, 4  ;;  %v4646_v3 = vrot.slane %v4640_v63, 5  ;;  %v7571_v60 = vpop.f32.mrb[39].mxu1 }
0x3bc2   :  { %v4649_v4 = vadd.f32 %v4645_v2, %v9449_v14  ;;  %v4650_v5 = vadd.f32 %v4646_v3, %v9451_v15 }
0x3bc4   :  { %8523 = vtanh.f32 %v4649_v4  ;;  %v6771_v26 = vmul.f32 -1.442695, %v4649_v4  ;;  %v6772_v32 = vmul.f32 -1.442695, %v4650_v5 }
0x3bc5   :  { %8525 = vtanh.f32 %v4650_v5 }
0x3bc6   :  { %8527 = vpow2.f32 %v6771_v26 }
0x3bc7   :  { %8529 = vpow2.f32 %v6772_v32 }
0x3bce   :  { %v8524_v7 = vpop.eup %8523 }
0x3bcf   :  { %v8526_v29 = vpop.eup %8525  ;;  %4675 = vrot.lane.b32.xlu0 %v8524_v7, %s8727_s18 }
0x3bd0   :  { %4677 = vrot.lane.b32.xlu1 %v8526_v29, %s8727_s18  ;;  %v8528_v8 = vpop.eup %8527 }
0x3bd1   :  { %v8530_v9 = vpop.eup %8529  ;;  %v4657_v10 = vadd.f32 1.0, %v8528_v8 }
0x3bd2   :  { %v4658_v48 = vadd.f32 1.0, %v8530_v9 }
0x3bd3   :  { %8531 = vrcp.f32 %v4657_v10  ;;  %v5139_v10 = vld [vmem:[%s6631_s9] sm:$0xff] }
0x3bd4   :  { %8533 = vrcp.f32 %v4658_v48  ;;  %v5140_v48 = vld [vmem:[%s6631_s9 + $0x8] sm:$0xff] }
0x3bdd   :  { %v8532_v30 = vpop.eup %8531 }
0x3bde   :  { %v8534_v51 = vpop.eup %8533  ;;  %v4671_v21 = vmul.f32 %v8532_v30, %v4667_v18 }
0x3bdf   :  { %v4672_v58 = vmul.f32 %v8534_v51, %v4668_v55 }
0x3c41   :  { %v4676_v27 = vpop.permute.xlu0 %4675 }
0x3c42   :  { %v4678_v17 = vpop.permute.xlu1 %4677  ;;  %v4681_v16 = vmul.f32 %v8532_v30, %v4676_v27 }
0x3c43   :  { %v4682_v19 = vmul.f32 %v8534_v51, %v4678_v17 }
0x3c44   :  { %4685 = vrot.lane.b32.xlu0 %v4681_v16, %s8727_s18 }
0x3c45   :  { %4687 = vrot.lane.b32.xlu1 %v4682_v19, %s8727_s18 }
0x3cb6   :  { %v4686_v20 = vpop.permute.xlu0 %4685 }
0x3cb7   :  { %v4688_v23 = vpop.permute.xlu1 %4687  ;;  %v4691_v25 = vadd.f32 %v4686_v20, %v4671_v21  ;;  %v5141_v20 = vld [vmem:[%s6631_s9 + $0x10] sm:$0xff] }
0x3cb8   :  { %v4692_v31 = vadd.f32 %v4688_v23, %v4672_v58  ;;  %v5142_v23 = vld [vmem:[%s6631_s9 + $0x18] sm:$0xff]  ;;  %s6638_s9 = sld [smem:[%s9896_s0 + %s8755_s6]]  }
0x3cb9   :  { %8535 = vtanh.f32 %v4691_v25  ;;  %v4807_v3 = vrot.slane %v4691_v25, 7  ;;  %v8074_v25 = vpack.c.bf16 %v5142_v23, %v5141_v20 }
0x3cba   :  { %8537 = vtanh.f32 %v4692_v31  ;;  %v4808_v60 = vrot.slane %v4692_v31, 7 }
0x3cc3   :  { %v8536_v62 = vpop.eup %8535 }
0x3cc4   :  { %v8538_v33 = vpop.eup %8537  ;;  %4697 = vrot.lane.b32.xlu0 %v8536_v62, %s8727_s18 }
0x3cc5   :  { %4699 = vrot.lane.b32.xlu1 %v8538_v33, %s8727_s18 }
0x3d36   :  { %v4698_v34 = vpop.permute.xlu0 %4697 }
0x3d37   :  { %v4700_v35 = vpop.permute.xlu1 %4699  ;;  %v4703_v36 = vmul.f32 %v8532_v30, %v4698_v34  ;;  %v8070_v30 = vpack.c.bf16 %v5140_v48, %v5139_v10 }
0x3d38   :  { %v4704_v11 = vmul.f32 %v8534_v51, %v4700_v35 }
0x3d39   :  { %v4707_v13 = vrot.slane %v4703_v36, 4  ;;  %v9547_v40 = vsel %vm1354_vm7, %v5129_v28, %v4703_v36  ;;  %8071 = vmatprep.subr.bf16.mxu1 %v8070_v30 }
0x3d3a   :  { %v4708_v12 = vrot.slane %v4704_v11, 3  ;;  %v9550_v42 = vsel %vm1354_vm7, %v5130_v41, %v4704_v11 }
0x3d3c   :  { %v4709_v43 = vsel %vm370_vm2, %v4708_v12, %v4707_v13 }
0x3d3d   :  { %4710 = vrot.lane.b32.xlu0 %v4709_v43, %s8728_s19 }
0x3daf   :  { %v4711_v44 = vpop.permute.xlu0 %4710 }
0x3db0   :  { %7581 = vmatmul.mubr.msk.f32.vlgmr.msra.gmra.mrb[32].mxu0 %vm239_vm3, %v4711_v44 }
0x3db1   :  { %8066 = vmatpush3.bf16.msra.mxu0 %v9419_v6  ;;  %7602 = vmatprep.mubr.msk.f32.mxu0 %vm8724_vm0, %v8725_v1 }
0x3db2   :  { %8067 = vmatprep.subr.bf16.mxu0 %v8722_v0 }
0x3db5   :  { %8069 = vmatpush3.bf16.msra.mxu0 %v9424_v57 }
0x3db6   :  { %8078 = vmatprep.subr.bf16.mxu0 %v8722_v0 }
0x3e83   :  { %v4780_v45 = vpop.f32.mrb[32].mxu0 }
0x3e84   :  { %v4785_v46 = vrot.slane %v4780_v45, 3  ;;  %v4786_v47 = vrot.slane %v4780_v45, 4  ;;  %v7582_v49 = vpop.f32.mrb[33].mxu0 }
0x3e86   :  { %v4789_v50 = vadd.f32 %v4785_v46, %v9449_v14  ;;  %v4790_v52 = vadd.f32 %v4786_v47, %v9451_v15 }
0x3e88   :  { %8539 = vtanh.f32 %v4789_v50  ;;  %v6774_v53 = vmul.f32 -1.442695, %v4789_v50  ;;  %v6775_v57 = vmul.f32 -1.442695, %v4790_v52 }
0x3e89   :  { %8541 = vtanh.f32 %v4790_v52 }
0x3e8a   :  { %8543 = vpow2.f32 %v6774_v53 }
0x3e8b   :  { %8545 = vpow2.f32 %v6775_v57 }
0x3e92   :  { %v8540_v6 = vpop.eup %8539 }
0x3e93   :  { %v8542_v54 = vpop.eup %8541  ;;  %4815 = vrot.lane.b32.xlu1 %v8540_v6, %s8727_s18 }
0x3e94   :  { %4817 = vrot.lane.b32.xlu0 %v8542_v54, %s8727_s18  ;;  %v8544_v24 = vpop.eup %8543 }
0x3e95   :  { %v8546_v56 = vpop.eup %8545  ;;  %v4797_v61 = vadd.f32 1.0, %v8544_v24 }
0x3e96   :  { %v4798_v28 = vadd.f32 1.0, %v8546_v56 }
0x3e97   :  { %8547 = vrcp.f32 %v4797_v61 }
0x3e98   :  { %8549 = vrcp.f32 %v4798_v28 }
0x3ea1   :  { %v8548_v39 = vpop.eup %8547 }
0x3ea2   :  { %v8550_v59 = vpop.eup %8549  ;;  %v4811_v4 = vmul.f32 %v8548_v39, %v4807_v3  ;;  %v5231_v3 = vld [vmem:[%s6632_s13] sm:$0xff] }
0x3ea3   :  { %v4812_v5 = vmul.f32 %v8550_v59, %v4808_v60  ;;  %v5232_v60 = vld [vmem:[%s6632_s13 + $0x8] sm:$0xff] }
0x3f05   :  { %v4816_v41 = vpop.permute.xlu1 %4815 }
0x3f06   :  { %v4818_v22 = vpop.permute.xlu0 %4817  ;;  %v4821_v63 = vmul.f32 %v8548_v39, %v4816_v41 }
0x3f07   :  { %v4822_v2 = vmul.f32 %v8550_v59, %v4818_v22 }
0x3f08   :  { %4825 = vrot.lane.b32.xlu1 %v4821_v63, %s8727_s18 }
0x3f09   :  { %4827 = vrot.lane.b32.xlu0 %v4822_v2, %s8727_s18 }
0x3f7a   :  { %v4826_v7 = vpop.permute.xlu1 %4825 }
0x3f7b   :  { %v4828_v29 = vpop.permute.xlu0 %4827  ;;  %v9567_v26 = vadd.f32 %v4826_v7, %v4811_v4  ;;  %v9619_v4 = vpack.c.bf16 %v5232_v60, %v5231_v3  ;;  %v5234_v7 = vld [vmem:[%s6632_s13 + $0x18] sm:$0xff] }
0x3f7c   :  { %v9569_v32 = vadd.f32 %v4828_v29, %v4812_v5  ;;  %v5233_v5 = vld [vmem:[%s6632_s13 + $0x10] sm:$0xff]  ;;  %s8757_s13 = smov 30  }
0x3f7d   :  { %8551 = vtanh.f32 %v9567_v26  ;;  %v4947_v24 = vrot.slane %v9567_v26, 7  ;;  %v9623_v29 = vpack.c.bf16 %v5234_v7, %v5233_v5  ;;  %s6637_s16 = sld [smem:[%s9896_s0 + %s8757_s13]]  }
0x3f7e   :  { %8553 = vtanh.f32 %v9569_v32  ;;  %v4948_v56 = vrot.slane %v9569_v32, 7 }
0x3f7f   :  { %8555 = vtanh.f32 %v9461_v38 }
0x3f80   :  { %8557 = vtanh.f32 %v9459_v37 }
0x3f87   :  { %v8552_v8 = vpop.eup %8551 }
0x3f88   :  { %v8554_v9 = vpop.eup %8553  ;;  %4837 = vrot.lane.b32.xlu1 %v8552_v8, %s8727_s18 }
0x3f89   :  { %4839 = vrot.lane.b32.xlu0 %v8554_v9, %s8727_s18  ;;  %v8556_v62 = vpop.eup %8555 }
0x3f8a   :  { %v8558_v33 = vpop.eup %8557 }
0x3ffa   :  { %v4838_v27 = vpop.permute.xlu1 %4837 }
0x3ffb   :  { %v4840_v51 = vpop.permute.xlu0 %4839  ;;  %v4843_v17 = vmul.f32 %v8548_v39, %v4838_v27 }
0x3ffc   :  { %v4844_v16 = vmul.f32 %v8550_v59, %v4840_v51 }
0x3ffd   :  { %v4847_v19 = vrot.slane %v4843_v17, 5  ;;  %v9580_v18 = vsel %vm1357_vm8, %v9547_v40, %v4843_v17 }
0x3ffe   :  { %v4848_v55 = vrot.slane %v4844_v16, 4  ;;  %v9584_v21 = vsel %vm1357_vm8, %v9550_v42, %v4844_v16 }
0x4000   :  { %v4849_v58 = vsel %vm370_vm2, %v4848_v55, %v4847_v19 }
0x4001   :  { %4850 = vrot.lane.b32.xlu1 %v4849_v58, %s8728_s19 }
0x4073   :  { %v4851_v31 = vpop.permute.xlu1 %4850 }
0x4074   :  { %7592 = vmatmul.mubr.msk.f32.vlgmr.msra.gmra.mrb[40].mxu1 %vm239_vm3, %v4851_v31 }
0x4075   :  { %8073 = vmatpush3.bf16.msra.mxu1 %v8070_v30  ;;  %7613 = vmatprep.mubr.msk.f32.mxu1 %vm239_vm3, %v8556_v62 }
0x4076   :  { %8075 = vmatprep.subr.bf16.mxu1 %v8074_v25 }
0x4079   :  { %8077 = vmatpush3.bf16.msra.mxu1 %v8074_v25 }
0x407a   :  { %8084 = vmatprep.subr.bf16.mxu1 %v8722_v0 }
0x407c   :  { %7614 = vmatmul.mubr.msk.f32.vlgmr.msra.gmra.mrb[42].mxu1 %vm239_vm3, %v8558_v33 }
0x407d   :  { %7635 = vmatprep.mubr.msk.f32.mxu1 %vm8724_vm0, %v8725_v1  ;;  %8086 = vmatpush3.bf16.msra.mxu1 %v9619_v4 }
0x407e   :  { %8087 = vmatprep.subr.bf16.mxu1 %v8722_v0 }
0x4081   :  { %8089 = vmatpush3.bf16.msra.mxu1 %v9623_v29 }
0x4082   :  { %8096 = vmatprep.subr.bf16.mxu1 %v8722_v0 }
0x4147   :  { %v4920_v38 = vpop.f32.mrb[40].mxu1 }
0x4148   :  { %v4925_v37 = vrot.slane %v4920_v38, 2  ;;  %v4926_v34 = vrot.slane %v4920_v38, 3  ;;  %v7593_v35 = vpop.f32.mrb[41].mxu1 }
0x414a   :  { %v4929_v36 = vadd.f32 %v4925_v37, %v9449_v14  ;;  %v4930_v11 = vadd.f32 %v4926_v34, %v9451_v15 }
0x414c   :  { %8559 = vtanh.f32 %v4929_v36  ;;  %v6777_v43 = vmul.f32 -1.442695, %v4929_v36  ;;  %v6778_v44 = vmul.f32 -1.442695, %v4930_v11 }
0x414d   :  { %8561 = vtanh.f32 %v4930_v11 }
0x414e   :  { %8563 = vpow2.f32 %v6777_v43 }
0x414f   :  { %v9598_v13 = vpop.f32.mrb[42].mxu1  ;;  %8565 = vpow2.f32 %v6778_v44 }
0x4150   :  { %v9600_v40 = vpop.f32.mrb[43].mxu1 }
0x4156   :  { %v8560_v12 = vpop.eup %8559 }
0x4157   :  { %v8562_v42 = vpop.eup %8561  ;;  %4955 = vrot.lane.b32.xlu0 %v8560_v12, %s8727_s18 }
0x4158   :  { %4957 = vrot.lane.b32.xlu1 %v8562_v42, %s8727_s18  ;;  %v8564_v45 = vpop.eup %8563 }
0x4159   :  { %v8566_v46 = vpop.eup %8565  ;;  %v4937_v47 = vadd.f32 1.0, %v8564_v45 }
0x415a   :  { %v4938_v49 = vadd.f32 1.0, %v8566_v46 }
0x415b   :  { %8567 = vrcp.f32 %v4937_v47 }
0x415c   :  { %8569 = vrcp.f32 %v4938_v49 }
0x4165   :  { %v8568_v50 = vpop.eup %8567 }
0x4166   :  { %v8570_v6 = vpop.eup %8569  ;;  %v4951_v61 = vmul.f32 %v8568_v50, %v4947_v24 }
0x4167   :  { %v4952_v28 = vmul.f32 %v8570_v6, %v4948_v56 }
0x41c9   :  { %v4956_v52 = vpop.permute.xlu0 %4955 }
0x41ca   :  { %v4958_v54 = vpop.permute.xlu1 %4957  ;;  %v4961_v53 = vmul.f32 %v8568_v50, %v4956_v52 }
0x41cb   :  { %v4962_v57 = vmul.f32 %v8570_v6, %v4958_v54 }
0x41cc   :  { %4965 = vrot.lane.b32.xlu0 %v4961_v53, %s8727_s18 }
0x41cd   :  { %4967 = vrot.lane.b32.xlu1 %v4962_v57, %s8727_s18 }
0x423e   :  { %v4966_v39 = vpop.permute.xlu0 %4965 }
0x423f   :  { %v4968_v41 = vpop.permute.xlu1 %4967  ;;  %v9608_v59 = vadd.f32 %v4966_v39, %v4951_v61 }
0x4240   :  { %v9610_v22 = vadd.f32 %v4968_v41, %v4952_v28 }
0x4241   :  { %8571 = vtanh.f32 %v9608_v59 }
0x4242   :  { %8573 = vtanh.f32 %v9610_v22 }
0x424b   :  { %v8572_v63 = vpop.eup %8571 }
0x424c   :  { %v8574_v2 = vpop.eup %8573  ;;  %4977 = vrot.lane.b32.xlu0 %v8572_v63, %s8727_s18 }
0x424d   :  { %4979 = vrot.lane.b32.xlu1 %v8574_v2, %s8727_s18 }
0x42be   :  { %v4978_v26 = vpop.permute.xlu0 %4977 }
0x42bf   :  { %v4980_v32 = vpop.permute.xlu1 %4979  ;;  %v4983_v8 = vmul.f32 %v8568_v50, %v4978_v26 }
0x42c0   :  { %v4984_v9 = vmul.f32 %v8570_v6, %v4980_v32 }
0x42c1   :  { %v4987_v10 = vrot.slane %v4983_v8, 6  ;;  %v9629_v48 = vsel %vm1360_vm9, %v9580_v18, %v4983_v8  ;;  %v6782_v18 = vld [vmem:[%s6633_s17] ss:$0 sm:$0xff] }
0x42c2   :  { %v4988_v30 = vrot.slane %v4984_v9, 5  ;;  %v9633_v27 = vsel %vm1360_vm9, %v9584_v21, %v4984_v9  ;;  %v9657_v55 = vadd.f32 %v6782_v18, %v9600_v40  ;;  %v9660_v58 = vadd.f32 %v9598_v13, %v6782_v18 }
0x42c4   :  { %v4989_v51 = vsel %vm370_vm2, %v4988_v30, %v4987_v10 }
0x42c5   :  { %4990 = vrot.lane.b32.xlu0 %v4989_v51, %s8728_s19 }
0x4337   :  { %v4991_v17 = vpop.permute.xlu0 %4990 }
0x4338   :  { %7603 = vmatmul.mubr.msk.f32.vlgmr.msra.gmra.mrb[34].mxu0 %vm239_vm3, %v4991_v17 }
0x4339   :  { %8080 = vmatpush3.bf16.msra.mxu0 %v9619_v4  ;;  %7624 = vmatprep.mubr.msk.f32.mxu0 %vm8724_vm0, %v8725_v1 }
0x433a   :  { %8081 = vmatprep.subr.bf16.mxu0 %v8722_v0 }
0x433d   :  { %8083 = vmatpush3.bf16.msra.mxu0 %v9623_v29 }
0x433e   :  { %8090 = vmatprep.subr.bf16.mxu0 %v8722_v0 }
0x4340   :  { %7625 = vmatmul.mubr.f32.vlgmr.msra.gmra.mrb[36].mxu0 %v8725_v1 }
0x4341   :  { %8092 = vmatpush3.bf16.msra.mxu0 %v9619_v4  ;;  %7646 = vmatprep.mubr.msk.f32.mxu0 %vm8724_vm0, %v8725_v1 }
0x4342   :  { %8093 = vmatprep.subr.bf16.mxu0 %v8722_v0 }
0x4345   :  { %8095 = vmatpush3.bf16.msra.mxu0 %v9623_v29 }
0x4346   :  { %8102 = vmatprep.subr.bf16.mxu0 %v8722_v0 }
0x440b   :  { %v9654_v16 = vpop.f32.mrb[34].mxu0 }
0x440c   :  { %v7604_v19 = vpop.f32.mrb[35].mxu0 }
0x4413   :  { %v5301_v21 = vpop.f32.mrb[36].mxu0 }
0x4414   :  { %v5306_v20 = vrot.slane %v5301_v21, 1  ;;  %v5309_v23 = vadd.f32 %v5301_v21, %v9657_v55  ;;  %v7626_v25 = vpop.f32.mrb[37].mxu0 }
0x4416   :  { %v5310_v31 = vadd.f32 %v5306_v20, %v9660_v58  ;;  %8575 = vtanh.f32 %v5309_v23  ;;  %v6785_v38 = vmul.f32 -1.442695, %v5309_v23 }
0x4418   :  { %8577 = vtanh.f32 %v5310_v31  ;;  %v6786_v37 = vmul.f32 -1.442695, %v5310_v31 }
0x4419   :  { %8579 = vpow2.f32 %v6785_v38 }
0x441a   :  { %8581 = vpow2.f32 %v6786_v37 }
0x4420   :  { %v8576_v62 = vpop.eup %8575 }
0x4421   :  { %5329 = vrot.lane.b32.xlu0 %v8576_v62, %s8727_s18 }
0x4422   :  { %v8578_v33 = vpop.eup %8577 }
0x4423   :  { %5331 = vrot.lane.b32.xlu1 %v8578_v33, %s8727_s18  ;;  %v8580_v34 = vpop.eup %8579 }
0x4424   :  { %v8582_v35 = vpop.eup %8581  ;;  %v5317_v36 = vadd.f32 1.0, %v8580_v34 }
0x4425   :  { %v5318_v11 = vadd.f32 1.0, %v8582_v35 }
0x4426   :  { %8583 = vrcp.f32 %v5317_v36 }
0x4427   :  { %8585 = vrcp.f32 %v5318_v11 }
0x4430   :  { %v8584_v13 = vpop.eup %8583 }
0x4431   :  { %v8586_v42 = vpop.eup %8585  ;;  %v5325_v45 = vmul.f32 0.0, %v8584_v13 }
0x4432   :  { %v5326_v49 = vmul.f32 0.0, %v8586_v42 }
0x4493   :  { %v5330_v40 = vpop.permute.xlu0 %5329 }
0x4494   :  { %v5335_v12 = vmul.f32 %v8584_v13, %v5330_v40 }
0x4495   :  { %v5332_v43 = vpop.permute.xlu1 %5331 }
0x4496   :  { %5339 = vrot.lane.b32.xlu0 %v5335_v12, %s8727_s18  ;;  %v5336_v44 = vmul.f32 %v8586_v42, %v5332_v43 }
0x4498   :  { %5341 = vrot.lane.b32.xlu1 %v5336_v44, %s8727_s18 }
0x4508   :  { %v5340_v46 = vpop.permute.xlu0 %5339 }
0x4509   :  { %v5345_v47 = vadd.f32 %v5340_v46, %v5325_v45 }
0x450a   :  { %v5342_v50 = vpop.permute.xlu1 %5341 }
0x450b   :  { %8587 = vtanh.f32 %v5345_v47  ;;  %v5346_v52 = vadd.f32 %v5342_v50, %v5326_v49  ;;  %v5459_v31 = vrot.slane %v5345_v47, 7 }
0x450d   :  { %8589 = vtanh.f32 %v5346_v52  ;;  %v5460_v23 = vrot.slane %v5346_v52, 7 }
0x4515   :  { %v8588_v6 = vpop.eup %8587 }
0x4516   :  { %5351 = vrot.lane.b32.xlu0 %v8588_v6, %s8727_s18 }
0x4517   :  { %v8590_v54 = vpop.eup %8589 }
0x4518   :  { %5353 = vrot.lane.b32.xlu1 %v8590_v54, %s8727_s18 }
0x4588   :  { %v5352_v53 = vpop.permute.xlu0 %5351 }
0x4589   :  { %v9672_v56 = vmul.f32 %v8584_v13, %v5352_v53 }
0x458a   :  { %v5354_v57 = vpop.permute.xlu1 %5353 }
0x458b   :  { %v9670_v24 = vmul.f32 %v8586_v42, %v5354_v57 }
0x458d   :  { %v5361_v61 = vrot.slane %v9670_v24, 7 }
0x458f   :  { %v5362_v28 = vsel %vm370_vm2, %v5361_v61, %v9672_v56 }
0x4590   :  { %5363 = vrot.lane.b32.xlu1 %v5362_v28, %s8728_s19 }
0x4602   :  { %v5364_v39 = vpop.permute.xlu1 %5363 }
0x4603   :  { %7636 = vmatmul.mubr.msk.f32.vlgmr.msra.gmra.mrb[44].mxu1 %vm239_vm3, %v5364_v39 }
0x4604   :  { %8098 = vmatpush3.bf16.msra.mxu1 %v9619_v4  ;;  %7657 = vmatprep.mubr.msk.f32.mxu1 %vm8724_vm0, %v8725_v1 }
0x4605   :  { %8099 = vmatprep.subr.bf16.mxu1 %v8722_v0 }
0x4608   :  { %8101 = vmatpush3.bf16.msra.mxu1 %v9623_v29 }
0x4609   :  { %8108 = vmatprep.subr.bf16.mxu1 %v8722_v0 }
0x46d6   :  { %v5433_v41 = vpop.f32.mrb[44].mxu1 }
0x46d7   :  { %v5438_v63 = vrot.slane %v5433_v41, 7  ;;  %v5442_v2 = vadd.f32 %v5433_v41, %v9660_v58  ;;  %v7637_v3 = vpop.f32.mrb[45].mxu1 }
0x46d9   :  { %v5441_v60 = vadd.f32 %v5438_v63, %v9657_v55  ;;  %8591 = vtanh.f32 %v5442_v2  ;;  %v6789_v26 = vmul.f32 -1.442695, %v5442_v2 }
0x46db   :  { %8593 = vtanh.f32 %v5441_v60  ;;  %v6788_v32 = vmul.f32 -1.442695, %v5441_v60 }
0x46dc   :  { %8595 = vpow2.f32 %v6789_v26 }
0x46dd   :  { %8597 = vpow2.f32 %v6788_v32 }
0x46e3   :  { %v8592_v5 = vpop.eup %8591 }
0x46e4   :  { %5469 = vrot.lane.b32.xlu1 %v8592_v5, %s8727_s18 }
0x46e5   :  { %v8594_v7 = vpop.eup %8593 }
0x46e6   :  { %5467 = vrot.lane.b32.xlu0 %v8594_v7, %s8727_s18  ;;  %v8596_v8 = vpop.eup %8595 }
0x46e7   :  { %v8598_v9 = vpop.eup %8597  ;;  %v5450_v10 = vadd.f32 1.0, %v8596_v8 }
0x46e8   :  { %v5449_v30 = vadd.f32 1.0, %v8598_v9 }
0x46e9   :  { %8599 = vrcp.f32 %v5450_v10 }
0x46ea   :  { %8601 = vrcp.f32 %v5449_v30 }
0x46f3   :  { %v8600_v51 = vpop.eup %8599 }
0x46f4   :  { %v8602_v18 = vpop.eup %8601  ;;  %v5464_v25 = vmul.f32 %v8600_v51, %v5460_v23 }
0x46f5   :  { %v5463_v38 = vmul.f32 %v8602_v18, %v5459_v31 }
0x4756   :  { %v5470_v17 = vpop.permute.xlu1 %5469 }
0x4757   :  { %v5474_v19 = vmul.f32 %v8600_v51, %v5470_v17 }
0x4758   :  { %v5468_v21 = vpop.permute.xlu0 %5467 }
0x4759   :  { %5479 = vrot.lane.b32.xlu1 %v5474_v19, %s8727_s18  ;;  %v5473_v20 = vmul.f32 %v8602_v18, %v5468_v21 }
0x475b   :  { %5477 = vrot.lane.b32.xlu0 %v5473_v20, %s8727_s18 }
0x47cb   :  { %v5480_v62 = vpop.permute.xlu1 %5479 }
0x47cc   :  { %v5484_v33 = vadd.f32 %v5480_v62, %v5464_v25 }
0x47cd   :  { %v5478_v37 = vpop.permute.xlu0 %5477 }
0x47ce   :  { %8603 = vtanh.f32 %v5484_v33  ;;  %v5483_v34 = vadd.f32 %v5478_v37, %v5463_v38  ;;  %v5599_v32 = vrot.slane %v5484_v33, 7 }
0x47d0   :  { %8605 = vtanh.f32 %v5483_v34  ;;  %v5598_v26 = vrot.slane %v5483_v34, 7 }
0x47d8   :  { %v8604_v35 = vpop.eup %8603 }
0x47d9   :  { %5491 = vrot.lane.b32.xlu1 %v8604_v35, %s8727_s18 }
0x47da   :  { %v8606_v36 = vpop.eup %8605 }
0x47db   :  { %5489 = vrot.lane.b32.xlu0 %v8606_v36, %s8727_s18 }
0x484b   :  { %v5492_v11 = vpop.permute.xlu1 %5491 }
0x484c   :  { %v5496_v12 = vmul.f32 %v8600_v51, %v5492_v11 }
0x484d   :  { %v5490_v13 = vpop.permute.xlu0 %5489 }
0x484e   :  { %v5495_v40 = vmul.f32 %v8602_v18, %v5490_v13  ;;  %v6337_v62 = vsel %vm1345_vm4, %v9670_v24, %v5496_v12 }
0x4850   :  { %v5499_v42 = vrot.slane %v5495_v40, 1  ;;  %v6336_v25 = vsel %vm1345_vm4, %v9672_v56, %v5495_v40 }
0x4852   :  { %v5500_v43 = vsel %vm370_vm2, %v5496_v12, %v5499_v42 }
0x4853   :  { %5501 = vrot.lane.b32.xlu0 %v5500_v43, %s8728_s19 }
0x48c5   :  { %v5502_v44 = vpop.permute.xlu0 %5501 }
0x48c6   :  { %7647 = vmatmul.mubr.msk.f32.vlgmr.msra.gmra.mrb[38].mxu0 %vm239_vm3, %v5502_v44 }
0x48c7   :  { %8104 = vmatpush3.bf16.msra.mxu0 %v9619_v4  ;;  %7668 = vmatprep.mubr.msk.f32.mxu0 %vm8724_vm0, %v8725_v1 }
0x48c8   :  { %8105 = vmatprep.subr.bf16.mxu0 %v8722_v0 }
0x48cb   :  { %8107 = vmatpush3.bf16.msra.mxu0 %v9623_v29 }
0x48cc   :  { %8114 = vmatprep.subr.bf16.mxu0 %v8722_v0 }
0x4999   :  { %v5571_v45 = vpop.f32.mrb[38].mxu0 }
0x499a   :  { %v5576_v46 = vrot.slane %v5571_v45, 6  ;;  %v5577_v47 = vrot.slane %v5571_v45, 7  ;;  %v7648_v49 = vpop.f32.mrb[39].mxu0 }
0x499c   :  { %v5580_v50 = vadd.f32 %v5576_v46, %v9657_v55  ;;  %v5581_v52 = vadd.f32 %v5577_v47, %v9660_v58 }
0x499e   :  { %8607 = vtanh.f32 %v5580_v50  ;;  %v6791_v53 = vmul.f32 -1.442695, %v5580_v50  ;;  %v6792_v57 = vmul.f32 -1.442695, %v5581_v52 }
0x499f   :  { %8609 = vtanh.f32 %v5581_v52 }
0x49a0   :  { %8611 = vpow2.f32 %v6791_v53 }
0x49a1   :  { %8613 = vpow2.f32 %v6792_v57 }
0x49a8   :  { %v8608_v6 = vpop.eup %8607 }
0x49a9   :  { %v8610_v54 = vpop.eup %8609  ;;  %5606 = vrot.lane.b32.xlu1 %v8608_v6, %s8727_s18 }
0x49aa   :  { %5608 = vrot.lane.b32.xlu0 %v8610_v54, %s8727_s18  ;;  %v8612_v61 = vpop.eup %8611 }
0x49ab   :  { %v8614_v28 = vpop.eup %8613  ;;  %v5588_v39 = vadd.f32 1.0, %v8612_v61 }
0x49ac   :  { %v5589_v41 = vadd.f32 1.0, %v8614_v28 }
0x49ad   :  { %8615 = vrcp.f32 %v5588_v39 }
0x49ae   :  { %8617 = vrcp.f32 %v5589_v41 }
0x49b7   :  { %v8616_v63 = vpop.eup %8615 }
0x49b8   :  { %v8618_v3 = vpop.eup %8617  ;;  %v5602_v8 = vmul.f32 %v8616_v63, %v5598_v26 }
0x49b9   :  { %v5603_v9 = vmul.f32 %v8618_v3, %v5599_v32 }
0x4a1b   :  { %v5607_v2 = vpop.permute.xlu1 %5606 }
0x4a1c   :  { %v5609_v60 = vpop.permute.xlu0 %5608  ;;  %v5612_v5 = vmul.f32 %v8616_v63, %v5607_v2 }
0x4a1d   :  { %v5613_v7 = vmul.f32 %v8618_v3, %v5609_v60 }
0x4a1e   :  { %5616 = vrot.lane.b32.xlu1 %v5612_v5, %s8727_s18 }
0x4a1f   :  { %5618 = vrot.lane.b32.xlu0 %v5613_v7, %s8727_s18 }
0x4a90   :  { %v5617_v10 = vpop.permute.xlu1 %5616 }
0x4a91   :  { %v5619_v30 = vpop.permute.xlu0 %5618  ;;  %v5622_v51 = vadd.f32 %v5617_v10, %v5602_v8 }
0x4a92   :  { %v5623_v17 = vadd.f32 %v5619_v30, %v5603_v9 }
0x4a93   :  { %8619 = vtanh.f32 %v5622_v51  ;;  %v5738_v28 = vrot.slane %v5622_v51, 7 }
0x4a94   :  { %8621 = vtanh.f32 %v5623_v17  ;;  %v5739_v39 = vrot.slane %v5623_v17, 7 }
0x4a9d   :  { %v8620_v19 = vpop.eup %8619 }
0x4a9e   :  { %v8622_v18 = vpop.eup %8621  ;;  %5628 = vrot.lane.b32.xlu1 %v8620_v19, %s8727_s18 }
0x4a9f   :  { %5630 = vrot.lane.b32.xlu0 %v8622_v18, %s8727_s18 }
0x4b10   :  { %v5629_v21 = vpop.permute.xlu1 %5628 }
0x4b11   :  { %v5631_v20 = vpop.permute.xlu0 %5630  ;;  %v5634_v23 = vmul.f32 %v8616_v63, %v5629_v21 }
0x4b12   :  { %v5635_v31 = vmul.f32 %v8618_v3, %v5631_v20 }
0x4b13   :  { %v5638_v33 = vrot.slane %v5634_v23, 2  ;;  %v6338_v38 = vsel %vm1348_vm5, %v6336_v25, %v5634_v23 }
0x4b14   :  { %v5639_v37 = vrot.slane %v5635_v31, 1  ;;  %v6339_v34 = vsel %vm1348_vm5, %v6337_v62, %v5635_v31 }
0x4b16   :  { %v5640_v35 = vsel %vm370_vm2, %v5639_v37, %v5638_v33 }
0x4b17   :  { %5641 = vrot.lane.b32.xlu1 %v5640_v35, %s8728_s19 }
0x4b89   :  { %v5642_v36 = vpop.permute.xlu1 %5641 }
0x4b8a   :  { %7658 = vmatmul.mubr.msk.f32.vlgmr.msra.gmra.mrb[46].mxu1 %vm239_vm3, %v5642_v36 }
0x4b8b   :  { %8110 = vmatpush3.bf16.msra.mxu1 %v9619_v4  ;;  %7679 = vmatprep.mubr.msk.f32.mxu1 %vm8724_vm0, %v8725_v1 }
0x4b8c   :  { %8111 = vmatprep.subr.bf16.mxu1 %v8722_v0 }
0x4b8f   :  { %8113 = vmatpush3.bf16.msra.mxu1 %v9623_v29 }
0x4b90   :  { %8120 = vmatprep.subr.bf16.mxu1 %v8722_v0 }
0x4c5d   :  { %v5711_v24 = vpop.f32.mrb[46].mxu1 }
0x4c5e   :  { %v5716_v56 = vrot.slane %v5711_v24, 5  ;;  %v5717_v11 = vrot.slane %v5711_v24, 6  ;;  %v7659_v13 = vpop.f32.mrb[47].mxu1 }
0x4c60   :  { %v5720_v40 = vadd.f32 %v5716_v56, %v9657_v55  ;;  %v5721_v12 = vadd.f32 %v5717_v11, %v9660_v58 }
0x4c62   :  { %8623 = vtanh.f32 %v5720_v40  ;;  %v6794_v44 = vmul.f32 -1.442695, %v5720_v40  ;;  %v6795_v45 = vmul.f32 -1.442695, %v5721_v12 }
0x4c63   :  { %8625 = vtanh.f32 %v5721_v12 }
0x4c64   :  { %8627 = vpow2.f32 %v6794_v44 }
0x4c65   :  { %8629 = vpow2.f32 %v6795_v45 }
0x4c6c   :  { %v8624_v42 = vpop.eup %8623 }
0x4c6d   :  { %v8626_v43 = vpop.eup %8625  ;;  %5746 = vrot.lane.b32.xlu0 %v8624_v42, %s8727_s18 }
0x4c6e   :  { %5748 = vrot.lane.b32.xlu1 %v8626_v43, %s8727_s18  ;;  %v8628_v46 = vpop.eup %8627 }
0x4c6f   :  { %v8630_v47 = vpop.eup %8629  ;;  %v5728_v49 = vadd.f32 1.0, %v8628_v46 }
0x4c70   :  { %v5729_v50 = vadd.f32 1.0, %v8630_v47 }
0x4c71   :  { %8631 = vrcp.f32 %v5728_v49 }
0x4c72   :  { %8633 = vrcp.f32 %v5729_v50 }
0x4c7b   :  { %v8632_v52 = vpop.eup %8631 }
0x4c7c   :  { %v8634_v54 = vpop.eup %8633  ;;  %v5742_v41 = vmul.f32 %v8632_v52, %v5738_v28 }
0x4c7d   :  { %v5743_v63 = vmul.f32 %v8634_v54, %v5739_v39 }
0x4cdf   :  { %v5747_v6 = vpop.permute.xlu0 %5746 }
0x4ce0   :  { %v5749_v53 = vpop.permute.xlu1 %5748  ;;  %v5752_v57 = vmul.f32 %v8632_v52, %v5747_v6 }
0x4ce1   :  { %v5753_v61 = vmul.f32 %v8634_v54, %v5749_v53 }
0x4ce2   :  { %5756 = vrot.lane.b32.xlu0 %v5752_v57, %s8727_s18 }
0x4ce3   :  { %5758 = vrot.lane.b32.xlu1 %v5753_v61, %s8727_s18 }
0x4d54   :  { %v5757_v2 = vpop.permute.xlu0 %5756 }
0x4d55   :  { %v5759_v3 = vpop.permute.xlu1 %5758  ;;  %v5762_v60 = vadd.f32 %v5757_v2, %v5742_v41 }
0x4d56   :  { %v5763_v5 = vadd.f32 %v5759_v3, %v5743_v63 }
0x4d57   :  { %8635 = vtanh.f32 %v5762_v60  ;;  %v5878_v45 = vrot.slane %v5762_v60, 7 }
0x4d58   :  { %8637 = vtanh.f32 %v5763_v5  ;;  %v5879_v46 = vrot.slane %v5763_v5, 7 }
0x4d61   :  { %v8636_v7 = vpop.eup %8635 }
0x4d62   :  { %v8638_v26 = vpop.eup %8637  ;;  %5768 = vrot.lane.b32.xlu0 %v8636_v7, %s8727_s18 }
0x4d63   :  { %5770 = vrot.lane.b32.xlu1 %v8638_v26, %s8727_s18 }
0x4dd4   :  { %v5769_v32 = vpop.permute.xlu0 %5768 }
0x4dd5   :  { %v5771_v8 = vpop.permute.xlu1 %5770  ;;  %v5774_v9 = vmul.f32 %v8632_v52, %v5769_v32 }
0x4dd6   :  { %v5775_v10 = vmul.f32 %v8634_v54, %v5771_v8 }
0x4dd7   :  { %v5778_v30 = vrot.slane %v5774_v9, 3  ;;  %v6340_v51 = vsel %vm1351_vm6, %v6338_v38, %v5774_v9 }
0x4dd8   :  { %v5779_v17 = vrot.slane %v5775_v10, 2  ;;  %v6341_v19 = vsel %vm1351_vm6, %v6339_v34, %v5775_v10 }
0x4dda   :  { %v5780_v18 = vsel %vm370_vm2, %v5779_v17, %v5778_v30 }
0x4ddb   :  { %5781 = vrot.lane.b32.xlu0 %v5780_v18, %s8728_s19 }
0x4e4d   :  { %v5782_v21 = vpop.permute.xlu0 %5781 }
0x4e4e   :  { %7669 = vmatmul.mubr.msk.f32.vlgmr.msra.gmra.mrb[40].mxu0 %vm239_vm3, %v5782_v21 }
0x4e4f   :  { %8116 = vmatpush3.bf16.msra.mxu0 %v9619_v4  ;;  %7690 = vmatprep.mubr.msk.f32.mxu0 %vm8724_vm0, %v8725_v1 }
0x4e50   :  { %8117 = vmatprep.subr.bf16.mxu0 %v8722_v0 }
0x4e53   :  { %8119 = vmatpush3.bf16.msra.mxu0 %v9623_v29 }
0x4e54   :  { %8126 = vmatprep.subr.bf16.mxu0 %v8722_v0 }
0x4f21   :  { %v5851_v20 = vpop.f32.mrb[40].mxu0 }
0x4f22   :  { %v5856_v23 = vrot.slane %v5851_v20, 4  ;;  %v5857_v25 = vrot.slane %v5851_v20, 5  ;;  %v7670_v31 = vpop.f32.mrb[41].mxu0 }
0x4f24   :  { %v5860_v62 = vadd.f32 %v5856_v23, %v9657_v55  ;;  %v5861_v33 = vadd.f32 %v5857_v25, %v9660_v58 }
0x4f26   :  { %8639 = vtanh.f32 %v5860_v62  ;;  %v6797_v34 = vmul.f32 -1.442695, %v5860_v62  ;;  %v6798_v35 = vmul.f32 -1.442695, %v5861_v33 }
0x4f27   :  { %8641 = vtanh.f32 %v5861_v33 }
0x4f28   :  { %8643 = vpow2.f32 %v6797_v34 }
0x4f29   :  { %8645 = vpow2.f32 %v6798_v35 }
0x4f30   :  { %v8640_v38 = vpop.eup %8639 }
0x4f31   :  { %v8642_v37 = vpop.eup %8641  ;;  %5886 = vrot.lane.b32.xlu1 %v8640_v38, %s8727_s18 }
0x4f32   :  { %5888 = vrot.lane.b32.xlu0 %v8642_v37, %s8727_s18  ;;  %v8644_v36 = vpop.eup %8643 }
0x4f33   :  { %v8646_v24 = vpop.eup %8645  ;;  %v5868_v56 = vadd.f32 1.0, %v8644_v36 }
0x4f34   :  { %v5869_v11 = vadd.f32 1.0, %v8646_v24 }
0x4f35   :  { %8647 = vrcp.f32 %v5868_v56 }
0x4f36   :  { %8649 = vrcp.f32 %v5869_v11 }
0x4f3f   :  { %v8648_v13 = vpop.eup %8647 }
0x4f40   :  { %v8650_v12 = vpop.eup %8649  ;;  %v5882_v47 = vmul.f32 %v8648_v13, %v5878_v45 }
0x4f41   :  { %v5883_v49 = vmul.f32 %v8650_v12, %v5879_v46 }
0x4fa3   :  { %v5887_v40 = vpop.permute.xlu1 %5886 }
0x4fa4   :  { %v5889_v42 = vpop.permute.xlu0 %5888  ;;  %v5892_v43 = vmul.f32 %v8648_v13, %v5887_v40 }
0x4fa5   :  { %v5893_v44 = vmul.f32 %v8650_v12, %v5889_v42 }
0x4fa6   :  { %5896 = vrot.lane.b32.xlu1 %v5892_v43, %s8727_s18 }
0x4fa7   :  { %5898 = vrot.lane.b32.xlu0 %v5893_v44, %s8727_s18 }
0x5018   :  { %v5897_v50 = vpop.permute.xlu1 %5896 }
0x5019   :  { %v5899_v52 = vpop.permute.xlu0 %5898  ;;  %v5902_v6 = vadd.f32 %v5897_v50, %v5882_v47 }
0x501a   :  { %v5903_v54 = vadd.f32 %v5899_v52, %v5883_v49 }
0x501b   :  { %8651 = vtanh.f32 %v5902_v6  ;;  %v6018_v37 = vrot.slane %v5902_v6, 7 }
0x501c   :  { %8653 = vtanh.f32 %v5903_v54  ;;  %v6019_v34 = vrot.slane %v5903_v54, 7 }
0x5025   :  { %v8652_v53 = vpop.eup %8651 }
0x5026   :  { %v8654_v57 = vpop.eup %8653  ;;  %5908 = vrot.lane.b32.xlu1 %v8652_v53, %s8727_s18 }
0x5027   :  { %5910 = vrot.lane.b32.xlu0 %v8654_v57, %s8727_s18 }
0x5098   :  { %v5909_v61 = vpop.permute.xlu1 %5908 }
0x5099   :  { %v5911_v28 = vpop.permute.xlu0 %5910  ;;  %v5914_v39 = vmul.f32 %v8648_v13, %v5909_v61 }
0x509a   :  { %v5915_v41 = vmul.f32 %v8650_v12, %v5911_v28 }
0x509b   :  { %v5918_v63 = vrot.slane %v5914_v39, 4  ;;  %v6342_v2 = vsel %vm1354_vm7, %v6340_v51, %v5914_v39 }
0x509c   :  { %v5919_v3 = vrot.slane %v5915_v41, 3  ;;  %v6343_v60 = vsel %vm1354_vm7, %v6341_v19, %v5915_v41 }
0x509e   :  { %v5920_v5 = vsel %vm370_vm2, %v5919_v3, %v5918_v63 }
0x509f   :  { %5921 = vrot.lane.b32.xlu1 %v5920_v5, %s8728_s19 }
0x5111   :  { %v5922_v7 = vpop.permute.xlu1 %5921 }
0x5112   :  { %7680 = vmatmul.mubr.msk.f32.vlgmr.msra.gmra.mrb[48].mxu1 %vm239_vm3, %v5922_v7 }
0x5113   :  { %8122 = vmatpush3.bf16.msra.mxu1 %v9619_v4  ;;  %7701 = vmatprep.mubr.msk.f32.mxu1 %vm8724_vm0, %v8725_v1 }
0x5114   :  { %8123 = vmatprep.subr.bf16.mxu1 %v8722_v0 }
0x5117   :  { %8125 = vmatpush3.bf16.msra.mxu1 %v9623_v29 }
0x5118   :  { %8132 = vmatprep.subr.bf16.mxu1 %v8722_v0 }
0x51e5   :  { %v5991_v26 = vpop.f32.mrb[48].mxu1 }
0x51e6   :  { %v5996_v32 = vrot.slane %v5991_v26, 3  ;;  %v5997_v8 = vrot.slane %v5991_v26, 4  ;;  %v7681_v9 = vpop.f32.mrb[49].mxu1 }
0x51e8   :  { %v6000_v10 = vadd.f32 %v5996_v32, %v9657_v55  ;;  %v6001_v30 = vadd.f32 %v5997_v8, %v9660_v58 }
0x51ea   :  { %8655 = vtanh.f32 %v6000_v10  ;;  %v6800_v17 = vmul.f32 -1.442695, %v6000_v10  ;;  %v6801_v29 = vmul.f32 -1.442695, %v6001_v30 }
0x51eb   :  { %8657 = vtanh.f32 %v6001_v30 }
0x51ec   :  { %8659 = vpow2.f32 %v6800_v17 }
0x51ed   :  { %8661 = vpow2.f32 %v6801_v29 }
0x51f4   :  { %v8656_v4 = vpop.eup %8655 }
0x51f5   :  { %v8658_v51 = vpop.eup %8657  ;;  %6026 = vrot.lane.b32.xlu0 %v8656_v4, %s8727_s18 }
0x51f6   :  { %6028 = vrot.lane.b32.xlu1 %v8658_v51, %s8727_s18  ;;  %v8660_v19 = vpop.eup %8659 }
0x51f7   :  { %v8662_v18 = vpop.eup %8661  ;;  %v6008_v21 = vadd.f32 1.0, %v8660_v19  ;;  %v5065_v19 = vrot.slane %v9654_v16, 1 }
0x51f8   :  { %v6009_v20 = vadd.f32 1.0, %v8662_v18 }
0x51f9   :  { %8663 = vrcp.f32 %v6008_v21 }
0x51fa   :  { %8665 = vrcp.f32 %v6009_v20 }
0x5203   :  { %v8664_v23 = vpop.eup %8663 }
0x5204   :  { %v8666_v31 = vpop.eup %8665  ;;  %v6022_v35 = vmul.f32 %v8664_v23, %v6018_v37  ;;  %v5066_v37 = vrot.slane %v9654_v16, 2 }
0x5205   :  { %v6023_v36 = vmul.f32 %v8666_v31, %v6019_v34 }
0x5206   :  { %v5070_v34 = vadd.f32 %v5066_v37, %v9451_v15 }
0x5267   :  { %v6027_v25 = vpop.permute.xlu0 %6026 }
0x5268   :  { %v6029_v62 = vpop.permute.xlu1 %6028  ;;  %v6032_v33 = vmul.f32 %v8664_v23, %v6027_v25 }
0x5269   :  { %v6033_v38 = vmul.f32 %v8666_v31, %v6029_v62 }
0x526a   :  { %6036 = vrot.lane.b32.xlu0 %v6032_v33, %s8727_s18 }
0x526b   :  { %6038 = vrot.lane.b32.xlu1 %v6033_v38, %s8727_s18 }
0x52dc   :  { %v6037_v24 = vpop.permute.xlu0 %6036 }
0x52dd   :  { %v6039_v56 = vpop.permute.xlu1 %6038  ;;  %v6042_v11 = vadd.f32 %v6037_v24, %v6022_v35 }
0x52de   :  { %v6043_v13 = vadd.f32 %v6039_v56, %v6023_v36 }
0x52df   :  { %8667 = vtanh.f32 %v6042_v11  ;;  %v6158_v51 = vrot.slane %v6042_v11, 7 }
0x52e0   :  { %8669 = vtanh.f32 %v6043_v13  ;;  %v6159_v17 = vrot.slane %v6043_v13, 7 }
0x52e9   :  { %v8668_v40 = vpop.eup %8667 }
0x52ea   :  { %v8670_v12 = vpop.eup %8669  ;;  %6048 = vrot.lane.b32.xlu0 %v8668_v40, %s8727_s18 }
0x52eb   :  { %6050 = vrot.lane.b32.xlu1 %v8670_v12, %s8727_s18 }
0x535c   :  { %v6049_v42 = vpop.permute.xlu0 %6048 }
0x535d   :  { %v6051_v43 = vpop.permute.xlu1 %6050  ;;  %v6054_v44 = vmul.f32 %v8664_v23, %v6049_v42 }
0x535e   :  { %v6055_v45 = vmul.f32 %v8666_v31, %v6051_v43  ;;  %v5069_v31 = vadd.f32 %v5065_v19, %v9449_v14  ;;  %v6781_v43 = vmul.f32 -1.442695, %v5070_v34 }
0x535f   :  { %v6058_v46 = vrot.slane %v6054_v44, 5  ;;  %v9772_v47 = vsel %vm1357_vm8, %v6342_v2, %v6054_v44 }
0x5360   :  { %v6059_v49 = vrot.slane %v6055_v45, 4  ;;  %v9775_v50 = vsel %vm1357_vm8, %v6343_v60, %v6055_v45  ;;  %v6780_v42 = vmul.f32 -1.442695, %v5069_v31 }
0x5362   :  { %v6060_v52 = vsel %vm370_vm2, %v6059_v49, %v6058_v46 }
0x5363   :  { %6061 = vrot.lane.b32.xlu0 %v6060_v52, %s8728_s19 }
0x53d5   :  { %v6062_v6 = vpop.permute.xlu0 %6061 }
0x53d6   :  { %7691 = vmatmul.mubr.msk.f32.vlgmr.msra.gmra.mrb[42].mxu0 %vm239_vm3, %v6062_v6 }
0x53d7   :  { %7712 = vmatprep.mubr.msk.f32.mxu0 %vm8724_vm0, %v8725_v1 }
0x54a9   :  { %v6131_v54 = vpop.f32.mrb[42].mxu0 }
0x54aa   :  { %v6136_v53 = vrot.slane %v6131_v54, 2  ;;  %v6137_v57 = vrot.slane %v6131_v54, 3  ;;  %v7692_v61 = vpop.f32.mrb[43].mxu0 }
0x54ac   :  { %v6140_v28 = vadd.f32 %v6136_v53, %v9657_v55  ;;  %v6141_v39 = vadd.f32 %v6137_v57, %v9660_v58 }
0x54ae   :  { %8671 = vtanh.f32 %v6140_v28  ;;  %v6803_v2 = vmul.f32 -1.442695, %v6140_v28  ;;  %v6804_v3 = vmul.f32 -1.442695, %v6141_v39 }
0x54af   :  { %8673 = vtanh.f32 %v6141_v39 }
0x54b0   :  { %8675 = vpow2.f32 %v6803_v2 }
0x54b1   :  { %8677 = vpow2.f32 %v6804_v3 }
0x54b8   :  { %v8672_v41 = vpop.eup %8671 }
0x54b9   :  { %v8674_v63 = vpop.eup %8673  ;;  %6166 = vrot.lane.b32.xlu1 %v8672_v41, %s8727_s18 }
0x54ba   :  { %6168 = vrot.lane.b32.xlu0 %v8674_v63, %s8727_s18  ;;  %v8676_v60 = vpop.eup %8675 }
0x54bb   :  { %v8678_v5 = vpop.eup %8677  ;;  %v6148_v7 = vadd.f32 1.0, %v8676_v60 }
0x54bc   :  { %v6149_v26 = vadd.f32 1.0, %v8678_v5 }
0x54bd   :  { %8679 = vrcp.f32 %v6148_v7 }
0x54be   :  { %8681 = vrcp.f32 %v6149_v26 }
0x54c7   :  { %v8680_v32 = vpop.eup %8679 }
0x54c8   :  { %v8682_v9 = vpop.eup %8681  ;;  %v6162_v29 = vmul.f32 %v8680_v32, %v6158_v51 }
0x54c9   :  { %v6163_v18 = vmul.f32 %v8682_v9, %v6159_v17 }
0x552b   :  { %v6167_v8 = vpop.permute.xlu1 %6166 }
0x552c   :  { %v6169_v10 = vpop.permute.xlu0 %6168  ;;  %v6172_v30 = vmul.f32 %v8680_v32, %v6167_v8  ;;  %v6351_v8 = vld [vmem:[%s6613_s23 + $0x8] sm:$0xff] }
0x552d   :  { %v6173_v4 = vmul.f32 %v8682_v9, %v6169_v10  ;;  %vm6353_vm4 = vcmp.gt.f32.partialorder %v6351_v8, 0.5 }
0x552e   :  { %6176 = vrot.lane.b32.xlu1 %v6172_v30, %s8727_s18 }
0x552f   :  { %6178 = vrot.lane.b32.xlu0 %v6173_v4, %s8727_s18  ;;  %v5087_v4 = vrot.slane %v9608_v59, 7 }
0x55a0   :  { %v6177_v21 = vpop.permute.xlu1 %6176 }
0x55a1   :  { %v6179_v20 = vpop.permute.xlu0 %6178  ;;  %v9789_v23 = vadd.f32 %v6177_v21, %v6162_v29  ;;  %v5088_v29 = vrot.slane %v9610_v22, 7 }
0x55a2   :  { %v9791_v25 = vadd.f32 %v6179_v20, %v6163_v18  ;;  %v6382_v18 = vld [vmem:[%s6614_s27 + $0x8] sm:$0xff]  ;;  %v6381_v20 = vld [vmem:[%s6614_s27] sm:$0xff] }
0x55a3   :  { %8683 = vtanh.f32 %v9789_v23  ;;  %vm6384_vm5 = vcmp.gt.f32.partialorder %v6382_v18, 0.5  ;;  %vm6383_vm6 = vcmp.gt.f32.partialorder %v6381_v20, 0.5 }
0x55a4   :  { %8685 = vtanh.f32 %v9791_v25 }
0x55a5   :  { %8687 = vtanh.f32 %v5069_v31 }
0x55a6   :  { %8689 = vtanh.f32 %v5070_v34 }
0x55a7   :  { %8691 = vpow2.f32 %v6780_v42 }
0x55a8   :  { %8693 = vpow2.f32 %v6781_v43 }
0x55ad   :  { %v8684_v62 = vpop.eup %8683 }
0x55ae   :  { %v8686_v33 = vpop.eup %8685  ;;  %6188 = vrot.lane.b32.xlu1 %v8684_v62, %s8727_s18 }
0x55af   :  { %6190 = vrot.lane.b32.xlu0 %v8686_v33, %s8727_s18  ;;  %v8688_v38 = vpop.eup %8687 }
0x55b0   :  { %v8690_v15 = vpop.eup %8689 }
0x55b1   :  { %v8692_v44 = vpop.eup %8691 }
0x55b2   :  { %v8694_v46 = vpop.eup %8693  ;;  %v5077_v52 = vadd.f32 1.0, %v8692_v44 }
0x55b3   :  { %5095 = vrot.lane.b32.xlu0 %v8688_v38, %s8727_s18  ;;  %v5078_v53 = vadd.f32 1.0, %v8694_v46 }
0x5620   :  { %v6189_v35 = vpop.permute.xlu1 %6188 }
0x5621   :  { %v6191_v36 = vpop.permute.xlu0 %6190  ;;  %v6194_v14 = vmul.f32 %v8680_v32, %v6189_v35  ;;  %v6350_v32 = vld [vmem:[%s6613_s23] sm:$0xff] }
0x5622   :  { %v6195_v24 = vmul.f32 %v8682_v9, %v6191_v36 }
0x5623   :  { %v6198_v56 = vrot.slane %v6194_v14, 6  ;;  %v9803_v11 = vsel %vm1360_vm9, %v9772_v47, %v6194_v14 }
0x5624   :  { %v6199_v13 = vrot.slane %v6195_v24, 5  ;;  %v9807_v40 = vsel %vm1360_vm9, %v9775_v50, %v6195_v24  ;;  %v6298_v24 = vrot.slane %v9789_v23, 7  ;;  %vm6366_vm9 = vcmask 785920  }
0x5625   :  { %v5096_v61 = vpop.permute.xlu0 %5095 }
0x5626   :  { %v6200_v12 = vsel %vm370_vm2, %v6199_v13, %v6198_v56  ;;  %v6299_v56 = vrot.slane %v9791_v25, 7 }
0x5627   :  { %6201 = vrot.lane.b32.xlu1 %v6200_v12, %s8728_s19 }
0x562b   :  { %5097 = vrot.lane.b32.xlu1 %v8690_v15, %s8727_s18 }
0x5699   :  { %v6202_v16 = vpop.permute.xlu1 %6201 }
0x569a   :  { %7702 = vmatmul.mubr.msk.f32.vlgmr.msra.gmra.mrb[50].mxu1 %vm239_vm3, %v6202_v16 }
0x569b   :  { %7723 = vmatprep.mubr.msk.f32.mxu1 %vm8724_vm0, %v8725_v1  ;;  %v8750_v1 = vmov 0   ;;  %vm6352_vm0 = vcmp.gt.f32.partialorder %v6350_v32, 0.5 }
0x569c   :  { %8182 = vset.pattern.permute.xlu1 %v8750_v1  ;;  %8181 = vset.pattern.permute.xlu0 %v8750_v1  ;;  %v6354_v62 = vsel %vm6352_vm0, 1, %v8750_v1  ;;  %v6355_v37 = vsel %vm6353_vm4, 1, %v8750_v1  ;;  %v6386_v34 = vsel %vm6384_vm5, 1, %v8750_v1  ;;  %v6385_v35 = vsel %vm6383_vm6, 1, %v8750_v1 }
0x569d   :  { %v5098_v39 = vpop.permute.xlu1 %5097 }
0x576d   :  { %v6271_v45 = vpop.f32.mrb[50].mxu1 }
0x576e   :  { %v6276_v47 = vrot.slane %v6271_v45, 1  ;;  %v6277_v49 = vrot.slane %v6271_v45, 2  ;;  %v7703_v50 = vpop.f32.mrb[51].mxu1 }
0x576f   :  { %v6412_v50 = vld [vmem:[%s6634_s1 + $0x8] sm:$0xff] }
0x5770   :  { %v6280_v6 = vadd.f32 %v6276_v47, %v9657_v55  ;;  %v6281_v54 = vadd.f32 %v6277_v49, %v9660_v58  ;;  %v6411_v49 = vld [vmem:[%s6634_s1] sm:$0xff] }
0x5772   :  { %8695 = vtanh.f32 %v6280_v6  ;;  %v6806_v2 = vmul.f32 -1.442695, %v6280_v6  ;;  %v6807_v3 = vmul.f32 -1.442695, %v6281_v54  ;;  %v8133_v6 = vpack.c.bf16 %v6412_v50, %v6411_v49 }
0x5773   :  { %8697 = vtanh.f32 %v6281_v54  ;;  %v6414_v54 = vld [vmem:[%s6634_s1 + $0x18] sm:$0xff] }
0x5774   :  { %8699 = vrcp.f32 %v5077_v52  ;;  %v6413_v52 = vld [vmem:[%s6634_s1 + $0x10] sm:$0xff]  ;;  %8134 = vmatpush3.bf16.msra.mxu1 %v8133_v6 }
0x5775   :  { %8701 = vrcp.f32 %v5078_v53  ;;  %v8136_v1 = vpack.c.bf16 %v6414_v54, %v6413_v52  ;;  %8135 = vmatprep.subr.bf16.mxu1 %v8722_v0  ;;  %v6811_v54 = vld [vmem:[%s6637_s16] ss:$0 sm:$0xff] }
0x5776   :  { %8703 = vpow2.f32 %v6806_v2 }
0x5777   :  { %8705 = vpow2.f32 %v6807_v3 }
0x5778   :  { %8137 = vmatpush3.bf16.msra.mxu1 %v8136_v1 }
0x577c   :  { %v8696_v57 = vpop.eup %8695 }
0x577d   :  { %v8698_v28 = vpop.eup %8697  ;;  %6306 = vrot.lane.b32.xlu0 %v8696_v57, %s8727_s18 }
0x577e   :  { %v9818_v41 = vpop.eup %8699  ;;  %6308 = vrot.lane.b32.xlu1 %v8698_v28, %s8727_s18 }
0x577f   :  { %v9821_v55 = vpop.eup %8701  ;;  %v5101_v58 = vmul.f32 %v9818_v41, %v5096_v61  ;;  %v5091_v21 = vmul.f32 %v9818_v41, %v5087_v4  ;;  %v6416_v4 = vld [vmem:[%s6635_s5 + $0x8] sm:$0xff] }
0x5780   :  { %v5102_v63 = vmul.f32 %v9821_v55, %v5098_v39  ;;  %v8704_v60 = vpop.eup %8703  ;;  %v5092_v59 = vmul.f32 %v9821_v55, %v5088_v29 }
0x5781   :  { %5105 = vrot.lane.b32.xlu0 %v5101_v58, %s8727_s18  ;;  %v8706_v5 = vpop.eup %8705  ;;  %v6288_v7 = vadd.f32 1.0, %v8704_v60 }
0x5782   :  { %5107 = vrot.lane.b32.xlu1 %v5102_v63, %s8727_s18  ;;  %v6289_v26 = vadd.f32 1.0, %v8706_v5 }
0x5783   :  { %8707 = vrcp.f32 %v6288_v7 }
0x5784   :  { %8709 = vrcp.f32 %v6289_v26 }
0x578d   :  { %v9833_v9 = vpop.eup %8707 }
0x578e   :  { %v9835_v30 = vpop.eup %8709  ;;  %v6302_v13 = vmul.f32 %v9833_v9, %v6298_v24 }
0x578f   :  { %v6303_v15 = vmul.f32 %v9835_v30, %v6299_v56 }
0x57ef   :  { %v6307_v10 = vpop.permute.xlu0 %6306 }
0x57f0   :  { %v6312_v51 = vmul.f32 %v9833_v9, %v6307_v10  ;;  %v6309_v17 = vpop.permute.xlu1 %6308  ;;  %v6415_v10 = vld [vmem:[%s6635_s5] sm:$0xff] }
0x57f1   :  { %v6313_v19 = vmul.f32 %v9835_v30, %v6309_v17  ;;  %v8127_v29 = vpack.c.bf16 %v6416_v4, %v6415_v10 }
0x57f2   :  { %6316 = vrot.lane.b32.xlu0 %v6312_v51, %s8727_s18  ;;  %v6417_v51 = vld [vmem:[%s6635_s5 + $0x10] sm:$0xff] }
0x57f3   :  { %6318 = vrot.lane.b32.xlu1 %v6313_v19, %s8727_s18  ;;  %v5106_v31 = vpop.permute.xlu0 %5105  ;;  %v6418_v19 = vld [vmem:[%s6635_s5 + $0x18] sm:$0xff]  ;;  %8128 = vmatpush3.bf16.msra.mxu0 %v8127_v29 }
0x57f4   :  { %v5111_v33 = vadd.f32 %v5106_v31, %v5091_v21  ;;  %v5108_v38 = vpop.permute.xlu1 %5107  ;;  %v8130_v20 = vpack.c.bf16 %v6418_v19, %v6417_v51  ;;  %8129 = vmatprep.subr.bf16.mxu0 %v8722_v0 }
0x57f5   :  { %v5112_v22 = vadd.f32 %v5108_v38, %v5092_v59 }
0x57f6   :  { %8711 = vtanh.f32 %v5111_v33  ;;  %6357 = vperm.xlu0 %8181, %v6354_v62  }
0x57f7   :  { %8713 = vtanh.f32 %v5112_v22  ;;  %6360 = vperm.xlu1 %8182, %v6355_v37   ;;  %8131 = vmatpush3.bf16.msra.mxu0 %v8130_v20 }
0x57fa   :  { %6391 = vperm.xlu0 %8181, %v6386_v34  }
0x57fb   :  { %6388 = vperm.xlu1 %8182, %v6385_v35  }
0x5800   :  { %v8712_v36 = vpop.eup %8711 }
0x5801   :  { %v8714_v14 = vpop.eup %8713  ;;  %5117 = vrot.lane.b32.xlu1 %v8712_v36, %s8727_s18 }
0x5802   :  { %5119 = vrot.lane.b32.xlu0 %v8714_v14, %s8727_s18 }
0x5864   :  { %v6317_v12 = vpop.permute.xlu0 %6316 }
0x5865   :  { %v6322_v16 = vadd.f32 %v6317_v12, %v6302_v13  ;;  %v6319_v42 = vpop.permute.xlu1 %6318 }
0x5866   :  { %v6323_v43 = vadd.f32 %v6319_v42, %v6303_v15 }
0x5867   :  { %8715 = vtanh.f32 %v6322_v16 }
0x5868   :  { %8717 = vtanh.f32 %v6323_v43 }
0x5871   :  { %v8716_v44 = vpop.eup %8715 }
0x5872   :  { %v8718_v45 = vpop.eup %8717  ;;  %6328 = vrot.lane.b32.xlu1 %v8716_v44, %s8727_s18 }
0x5873   :  { %6330 = vrot.lane.b32.xlu0 %v8718_v45, %s8727_s18 }
0x5875   :  { %v6358_v23 = vpop.permute.xlu0 %6357 }
0x5876   :  { %v6361_v25 = vpop.permute.xlu1 %6360  ;;  %vm6362_vm8 = vcmp.eq.s32.totalorder %v6358_v23, 1 }
0x5877   :  { %vm6363_vm7 = vcmp.eq.s32.totalorder %v6361_v25, 1 }
0x5879   :  { %v6392_v46 = vpop.permute.xlu0 %6391 }
0x587a   :  { %v6389_v47 = vpop.permute.xlu1 %6388  ;;  %vm6394_vm12 = vcmp.eq.s32.totalorder %v6392_v46, 1  ;;  %v70_v46 = vstv %s6638_s9 }
0x587b   :  { %vm6393_vm11 = vcmp.eq.s32.totalorder %v6389_v47, 1  ;;  %71 = vst [vmem:[#allocation2] sm:$0x1] %v70_v46 }
0x587d   :  { %v5120_v53 = vpop.permute.xlu0 %5119 }
0x587e   :  { %v5124_v57 = vmul.f32 %v9821_v55, %v5120_v53  ;;  %v5118_v61 = vpop.permute.xlu1 %5117 }
0x587f   :  { %v5123_v28 = vmul.f32 %v9818_v41, %v5118_v61 }
0x5880   :  { %v5138_v39 = vsel %vm1363_vm10, %v9633_v27, %v5124_v57 }
0x5881   :  { %v6365_v58 = vsel %vm6363_vm7, -1e+30, %v5138_v39  ;;  %v5137_v63 = vsel %vm1363_vm10, %v9629_v48, %v5123_v28 }
0x5882   :  { %v6374_v2 = vsel %vm6366_vm9, %v6365_v58, -inf  ;;  %v6364_v3 = vsel %vm6362_vm8, -1e+30, %v5137_v63  ;;  %v6812_v61 = vld [vmem:[#allocation2] ss:$0 sm:$0xff] }
0x5883   :  { %v6375_v60 = vrot.slane %v6374_v2, 4  ;;  %v6367_v55 = vsel %vm6366_vm9, %v6364_v3, -inf }
0x5884   :  { %v6368_v5 = vrot.slane %v6367_v55, 4 }
0x5885   :  { %v6376_v7 = vmax.f32 %v6374_v2, %v6375_v60 }
0x5886   :  { %v6369_v41 = vmax.f32 %v6367_v55, %v6368_v5 }
0x5887   :  { %v6377_v27 = vrot.slane %v6376_v7, 2 }
0x5888   :  { %v6370_v26 = vrot.slane %v6369_v41, 2 }
0x5889   :  { %v6378_v32 = vmax.f32 %v6376_v7, %v6377_v27 }
0x588a   :  { %v6371_v8 = vmax.f32 %v6369_v41, %v6370_v26 }
0x588b   :  { %v6379_v48 = vrot.slane %v6378_v32, 1 }
0x588c   :  { %v6372_v17 = vrot.slane %v6371_v8, 1 }
0x588d   :  { %v6380_v18 = vmax.f32 %v6378_v32, %v6379_v48 }
0x588e   :  { %v6373_v21 = vmax.f32 %v6371_v8, %v6372_v17 }
0x5890   :  { %v6498_v31 = vsel %vm370_vm2, %v6380_v18, %v6373_v21 }
0x5891   :  { %6499 = vrot.lane.b32.xlu0 %v6498_v31, %s8728_s19 }
0x58e4   :  { %v6329_v59 = vpop.permute.xlu1 %6328 }
0x58e5   :  { %v6331_v62 = vpop.permute.xlu0 %6330  ;;  %v6334_v33 = vmul.f32 %v9833_v9, %v6329_v59 }
0x58e6   :  { %v6335_v38 = vmul.f32 %v9835_v30, %v6331_v62 }
0x58e7   :  { %v6348_v37 = vsel %vm1363_vm10, %v9803_v11, %v6334_v33 }
0x58e8   :  { %v6349_v22 = vsel %vm1363_vm10, %v9807_v40, %v6335_v38  ;;  %v6395_v0 = vsel %vm6393_vm11, -1e+30, %v6348_v37 }
0x58e9   :  { %v6396_v34 = vsel %vm6394_vm12, -1e+30, %v6349_v22  ;;  %v6397_v35 = vsel %vm6366_vm9, %v6395_v0, -inf }
0x58ea   :  { %v6404_v36 = vsel %vm6366_vm9, %v6396_v34, -inf  ;;  %v6398_v14 = vrot.slane %v6397_v35, 4 }
0x58eb   :  { %v6405_v24 = vrot.slane %v6404_v36, 4 }
0x58ec   :  { %v6399_v56 = vmax.f32 %v6397_v35, %v6398_v14 }
0x58ed   :  { %v6406_v9 = vmax.f32 %v6404_v36, %v6405_v24 }
0x58ee   :  { %v6400_v13 = vrot.slane %v6399_v56, 2 }
0x58ef   :  { %v6407_v30 = vrot.slane %v6406_v9, 2 }
0x58f0   :  { %v6401_v12 = vmax.f32 %v6399_v56, %v6400_v13 }
0x58f1   :  { %v6408_v15 = vmax.f32 %v6406_v9, %v6407_v30 }
0x58f2   :  { %v6402_v16 = vrot.slane %v6401_v12, 1 }
0x58f3   :  { %v6409_v11 = vrot.slane %v6408_v15, 1 }
0x58f4   :  { %v6403_v42 = vmax.f32 %v6401_v12, %v6402_v16 }
0x58f5   :  { %v6410_v43 = vmax.f32 %v6408_v15, %v6409_v11 }
0x58f7   :  { %v6421_v40 = vsel %vm370_vm2, %v6410_v43, %v6403_v42  ;;  %vm6590_vm2 = vcmask 254976  }
0x58f8   :  { %6422 = vrot.lane.b32.xlu1 %v6421_v40, %s8728_s19  ;;  %s6636_s19 = sld [smem:[%s9896_s0 + %s8756_s10]]  }
0x58fe   :  { %v6810_v49 = vld [vmem:[%s6636_s19] ss:$0 sm:$0xff] }
0x5903   :  { %v6500_v44 = vpop.permute.xlu0 %6499 }
0x5904   :  { %7724 = vmatmul.mubr.msk.f32.vlgmr.msra.gmra.mrb[52].mxu1 %vm239_vm3, %v6500_v44 }
0x596a   :  { %v6423_v45 = vpop.permute.xlu1 %6422 }
0x596b   :  { %7713 = vmatmul.mubr.msk.f32.vlgmr.msra.gmra.mrb[44].mxu0 %vm239_vm3, %v6423_v45  ;;  %vm6602_vm3 = vcmask 1024  }
0x59d7   :  { %v6569_v23 = vpop.f32.mrb[52].mxu1 }
0x59d8   :  { %v7725_v25 = vpop.f32.mrb[53].mxu1 }
0x5a3e   :  { %v6492_v47 = vpop.f32.mrb[44].mxu0 }
0x5a3f   :  { %v6570_v50 = vadd.f32 %v6569_v23, %v6492_v47  ;;  %v7714_v52 = vpop.f32.mrb[45].mxu0 }
0x5a41   :  { %v6580_v6 = vadd.f32 %v6810_v49, %v6570_v50 }
0x5a43   :  { %8719 = vtanh.f32 %v6580_v6 }
0x5a4d   :  { %v8720_v53 = vpop.eup %8719 }
0x5a4e   :  { %v6589_v1 = vmul.f32 %v8720_v53, %v6811_v54 }
0x5a50   :  { %v6591_v57 = vsel %vm6590_vm2, %v6589_v1, 0.0 }
0x5a51   :  { %6592 = vadd.xlane.f32.xlu1 %v6591_v57 }
0x5ade   :  { %v6593_v28 = vpop.xlane.xlu1 %6592 }
0x5adf   :  { %v6601_v39 = vadd.f32 %v6812_v61, %v6593_v28 }
0x5ae1   :  { %6603 = vst.msk [vmem:[%s6639_s21] sm:$0x3] %vm6602_vm3, %v6601_v39 }

</bundles_post_ra>
